<compile_context>
chip_gen: v7x
topology: tpu7x:2x2x1
jax: 0.10.0
libtpu: 0.0.40
codegen_flags: <defaults>
</compile_context>

<pallas_src>
import functools

import jax
import jax.numpy as jnp
from jax.experimental import pallas as pl
from jax.experimental.pallas import tpu as pltpu


# ---------------------------------------------------------------------------
# Fused Pallas kernel: the full MidFlow chain for one batch element.
# ---------------------------------------------------------------------------
def _midflow_kernel(x_ref, dwk_ref, pwf_ref, bias_ref, o_ref, pad_ref, *, C):
    # x_ref   : (1, H, WC)        input activations, lane-dense (WC = W*C)
    # dwk_ref : (S, 9, 1, WC)     lane-tiled depthwise taps (edge mask folded in)
    # pwf_ref : (S, WC, WC)       block-diagonal BN-folded pointwise weights
    # bias_ref: (S, 1, WC)        lane-tiled BN-folded bias
    # o_ref   : (1, H, WC)        output activations
    # pad_ref : VMEM (H+2, WC)    H-padded activation scratch
    H, WC = x_ref.shape[1], x_ref.shape[2]
    S = pwf_ref.shape[0]

    # Zero only the two halo rows once; they stay zero for every step
    # (only the interior rows [1, H+1) are overwritten below).
    zero_row = jnp.zeros((1, WC), jnp.float32)
    pad_ref[pl.ds(0, 1), :] = zero_row
    pad_ref[pl.ds(H + 1, 1), :] = zero_row

    cur = x_ref[0]                                           # (H, WC)
    for s in range(S):                                       # unrolled (static)
        # ReLU, written into the interior of the H-padded scratch.
        pad_ref[pl.ds(1, H), :] = jnp.maximum(cur, 0.0)

        # Depthwise 3x3 (pad=1): 3 H-shifted row reads x 3 lane-rolls (XLU),
        # each a plain vreg multiply-add against a lane-tiled tap weight.
        acc = jnp.zeros((H, WC), jnp.float32)
        for dh in range(3):
            row = pad_ref[pl.ds(dh, H), :]                   # (H, WC)
            acc = acc + row * dwk_ref[s, dh * 3 + 1]         # dw=1 (no shift)
            acc = acc + pltpu.roll(row, C, 1) * dwk_ref[s, dh * 3 + 0]       # dw=0
            acc = acc + pltpu.roll(row, WC - C, 1) * dwk_ref[s, dh * 3 + 2]  # dw=2

        # Pointwise 1x1 + folded BN: block-diagonal MXU matmul + bias.
        cur = jnp.dot(acc, pwf_ref[s],
                      precision=jax.lax.Precision.HIGHEST,
                      preferred_element_type=jnp.float32) + bias_ref[s]

    o_ref[0] = cur


def midflow_pallas(x_nhwc, folded):
    """Fused MidFlow forward. x_nhwc: (N, H, W, Cin) -> (N, H, W, Cout)."""
    N, H, W, Cin = x_nhwc.shape
    C = folded["C"]
    S = folded["pwf"].shape[0]
    cout = folded["cout"]
    WC = W * C

    x = x_nhwc
    if Cin < C:   # one tiny channel pad for the whole chain (not per step)
        x = jnp.pad(x, ((0, 0), (0, 0), (0, 0), (0, C - Cin)))
    x = x.reshape(N, H, WC)                                  # lane-dense

    kernel = functools.partial(_midflow_kernel, C=C)
    out = pl.pallas_call(
        kernel,
        out_shape=jax.ShapeDtypeStruct((N, H, WC), jnp.float32),
        grid=(N,),
        in_specs=[
            pl.BlockSpec((1, H, WC), lambda n: (n, 0, 0)),
            pl.BlockSpec((S, 9, 1, WC), lambda n: (0, 0, 0, 0)),
            pl.BlockSpec((S, WC, WC), lambda n: (0, 0, 0)),
            pl.BlockSpec((S, 1, WC), lambda n: (0, 0, 0)),
        ],
        out_specs=pl.BlockSpec((1, H, WC), lambda n: (n, 0, 0)),
        scratch_shapes=[pltpu.VMEM((H + 2, WC), jnp.float32)],
        compiler_params=pltpu.CompilerParams(
            dimension_semantics=("parallel",)),  # batch -> both TCs on v7x
    )(x, folded["dwk"], folded["pwf"], folded["bias"])

    out = out.reshape(N, H, W, C)
    return out[..., :cout]


# ---------------------------------------------------------------------------
# Parameter construction (deterministic, synthetic) + BN folding / lane tiling
# ---------------------------------------------------------------------------
def _init_sepconv_raw(key, cin, cout):
    ks = jax.random.split(key, 10)
    return dict(
        dw=0.2 * jax.random.normal(ks[0], (3, 3, cin), jnp.float32),
        g1=1.0 + 0.1 * jax.random.normal(ks[1], (cin,), jnp.float32),
        b1=0.1 * jax.random.normal(ks[2], (cin,), jnp.float32),
        m1=0.1 * jax.random.normal(ks[3], (cin,), jnp.float32),
        v1=0.5 + jnp.abs(jax.random.normal(ks[4], (cin,), jnp.float32)),
        pw=(1.0 / jnp.sqrt(cin)) * jax.random.normal(ks[5], (cin, cout), jnp.float32),
        g2=1.0 + 0.1 * jax.random.normal(ks[6], (cout,), jnp.float32),
        b2=0.1 * jax.random.normal(ks[7], (cout,), jnp.float32),
        m2=0.1 * jax.random.normal(ks[8], (cout,), jnp.float32),
        v2=0.5 + jnp.abs(jax.random.normal(ks[9], (cout,), jnp.float32)),
    )


def init_midflow_raw(key, in_channels, out_channels, num_repeats):
    steps = []
    cin = in_channels
    for i in range(num_repeats):
        kb = jax.random.fold_in(key, i)
        k1, k2, k3 = jax.random.split(kb, 3)
        steps.append(_init_sepconv_raw(k1, cin, out_channels))
        steps.append(_init_sepconv_raw(k2, out_channels, out_channels))
        steps.append(_init_sepconv_raw(k3, out_channels, out_channels))
        cin = out_channels
    return steps


def fold_midflow_params(raw_steps, W, eps=1e-5):
    """Fold inference BN into pointwise weights/bias; build lane-dense weights.

    Produces, per step s:
      dwk [9, 1, W*C]  lane-tiled depthwise taps with the W-edge zero-padding
                       folded in (taps with dw=0 / dw=2 are zeroed on the
                       first / last image column),
      pwf [W*C, W*C]   block-diagonal (W copies of the C x C folded pw),
      bias[1, W*C]     lane-tiled folded bias.
    """
    cmax = max(max(p["pw"].shape) for p in raw_steps)
    cout = raw_steps[-1]["pw"].shape[-1]
    WC = W * cmax
    lane = jnp.arange(WC)

    # Per-tap edge mask for the lane-rolled W shifts (constant across steps).
    tap_masks = []
    for t in range(9):
        dw = t % 3
        if dw == 0:                       # reads column w-1 -> zero at w == 0
            m = (lane >= cmax).astype(jnp.float32)
        elif dw == 2:                     # reads column w+1 -> zero at w == W-1
            m = (lane < WC - cmax).astype(jnp.float32)
        else:
            m = jnp.ones((WC,), jnp.float32)
        tap_masks.append(m)
    tap_mask = jnp.stack(tap_masks)       # (9, WC)

    eye_w = jnp.eye(W, dtype=jnp.float32)
    dwk_l, pwf_l, bias_l = [], [], []
    for p in raw_steps:
        ci, co = p["pw"].shape
        s1 = p["g1"] / jnp.sqrt(p["v1"] + eps)
        b1 = p["b1"] - p["m1"] * s1
        s2 = p["g2"] / jnp.sqrt(p["v2"] + eps)
        b2 = p["b2"] - p["m2"] * s2
        pwf = (s1[:, None] * p["pw"]) * s2[None, :]            # (ci, co)
        bias = (b1 @ p["pw"]) * s2 + b2                        # (co,)

        # Depthwise taps: channel-pad to cmax, lane-tile W x, fold edge mask.
        k9 = jnp.pad(p["dw"].reshape(9, ci), ((0, 0), (0, cmax - ci)))
        dwk = jnp.tile(k9, (1, W)) * tap_mask                  # (9, WC)
        dwk_l.append(dwk.reshape(9, 1, WC))

        # Pointwise: pad to (cmax, cmax), block-diagonal for the MXU.
        pwf_pad = jnp.pad(pwf, ((0, cmax - ci), (0, cmax - co)))
        pwf_l.append(jnp.kron(eye_w, pwf_pad))                 # (WC, WC)

        bias_l.append(jnp.tile(jnp.pad(bias, (0, cmax - co)), W).reshape(1, WC))

    return dict(dwk=jnp.stack(dwk_l), pwf=jnp.stack(pwf_l),
                bias=jnp.stack(bias_l), cout=cout, C=cmax)


# ---------------------------------------------------------------------------
# Pure-JAX reference (unfolded BN, inference mode) for validation
# ---------------------------------------------------------------------------
def _sepconv_ref(x, p, eps=1e-5):
    x = jnp.maximum(x, 0.0)
    H, W = x.shape[1], x.shape[2]
    xp = jnp.pad(x, ((0, 0), (1, 1), (1, 1), (0, 0)))
    acc = jnp.zeros(x.shape, jnp.float32)
    for dh in range(3):
        for dw in range(3):
            acc = acc + xp[:, dh:dh + H, dw:dw + W, :] * p["dw"][dh, dw, :]
    s1 = p["g1"] / jnp.sqrt(p["v1"] + eps)
    b1 = p["b1"] - p["m1"] * s1
    y = acc * s1 + b1
    z = jnp.einsum("nhwc,co->nhwo", y, p["pw"],
                   precision=jax.lax.Precision.HIGHEST)
    s2 = p["g2"] / jnp.sqrt(p["v2"] + eps)
    b2 = p["b2"] - p["m2"] * s2
    return z * s2 + b2


def midflow_ref(x_nhwc, raw_steps):
    x = x_nhwc
    for p in raw_steps:
        x = _sepconv_ref(x, p)
    return x


# ---------------------------------------------------------------------------
if __name__ == "__main__":
    key = jax.random.PRNGKey(0)
    N, Cin, H, W = 2, 4, 16, 16        # PyTorch NCHW input: (2, 4, 16, 16)
    Cout, num_repeats = 8, 2

    kx, kp = jax.random.split(key)
    x_nchw = jax.random.normal(kx, (N, Cin, H, W), jnp.float32)
    raw = init_midflow_raw(kp, Cin, Cout, num_repeats)
    folded = fold_midflow_params(raw, W=W)

    x_nhwc = jnp.transpose(x_nchw, (0, 2, 3, 1))               # NCHW -> NHWC

    out = midflow_pallas(x_nhwc, folded)
    out = jax.block_until_ready(out)
    assert out.shape == (N, H, W, Cout)

    ref = midflow_ref(x_nhwc, raw)
    max_err = float(jnp.max(jnp.abs(out - ref)))
    if not bool(jnp.allclose(out, ref, atol=2e-3, rtol=2e-3)):
        raise AssertionError(f"Pallas vs reference mismatch, max |err| = {max_err}")

    # Output corresponds to PyTorch NCHW shape (N, Cout, H, W) via transpose.
    _ = jnp.transpose(out, (0, 3, 1, 2))
    print("KERNEL_OK")
</pallas_src>

<mosaic_0001>
module attributes {stable_mosaic.version = 11 : i64} {
  func.func @_midflow_kernel(%arg0: i32, %arg1: memref<1x16x128xf32, #tpu.memory_space<vmem>>, %arg2: memref<6x9x1x128xf32, #tpu.memory_space<vmem>>, %arg3: memref<6x128x128xf32, #tpu.memory_space<vmem>>, %arg4: memref<6x1x128xf32, #tpu.memory_space<vmem>>, %arg5: memref<1x16x128xf32, #tpu.memory_space<vmem>>, %arg6: memref<18x128xf32, #tpu.memory_space<vmem>>) attributes {dimension_semantics = [#tpu.dimension_semantics<parallel>], iteration_bounds = array<i64: 2>, scalar_prefetch = 0 : i64, scratch_operands = 1 : i64, tpu.core_type = #tpu.core_type<tc>, window_params = [{transform_indices = @transform_0, window_bounds = array<i64: 1, 16, 128>}, {pipeline_mode = #tpu.pipeline_mode<synchronous>, transform_indices = @transform_1, window_bounds = array<i64: 6, 9, 1, 128>}, {pipeline_mode = #tpu.pipeline_mode<synchronous>, transform_indices = @transform_2, window_bounds = array<i64: 6, 128, 128>}, {pipeline_mode = #tpu.pipeline_mode<synchronous>, transform_indices = @transform_3, window_bounds = array<i64: 6, 1, 128>}, {transform_indices = @transform_4, window_bounds = array<i64: 1, 16, 128>}]} {
    %cst = arith.constant 0.000000e+00 : f32
    %0 = vector.broadcast %cst : f32 to vector<1x128xf32>
    %c0 = arith.constant 0 : index
    %c0_0 = arith.constant 0 : index
    %1 = vector.load %arg6[%c0, %c0_0] : memref<18x128xf32, #tpu.memory_space<vmem>>, vector<1x128xf32>
    tpu.vector_store %arg6[%c0, %c0_0], %0 {strides = array<i32>} : memref<18x128xf32, #tpu.memory_space<vmem>>, vector<1x128xf32>,
    %c17 = arith.constant 17 : index
    %c0_1 = arith.constant 0 : index
    %2 = vector.load %arg6[%c17, %c0_1] : memref<18x128xf32, #tpu.memory_space<vmem>>, vector<1x128xf32>
    tpu.vector_store %arg6[%c17, %c0_1], %0 {strides = array<i32>} : memref<18x128xf32, #tpu.memory_space<vmem>>, vector<1x128xf32>,
    %c0_2 = arith.constant 0 : index
    %c0_3 = arith.constant 0 : index
    %c0_4 = arith.constant 0 : index
    %3 = vector.load %arg1[%c0_2, %c0_3, %c0_4] : memref<1x16x128xf32, #tpu.memory_space<vmem>>, vector<1x16x128xf32>
    %4 = vector.shape_cast %3 : vector<1x16x128xf32> to vector<16x128xf32>
    %cst_5 = arith.constant 0.000000e+00 : f32
    %5 = vector.broadcast %cst_5 : f32 to vector<16x128xf32>
    %6 = arith.maximumf %4, %5 : vector<16x128xf32>
    %c1 = arith.constant 1 : index
    %c0_6 = arith.constant 0 : index
    %7 = vector.load %arg6[%c1, %c0_6] : memref<18x128xf32, #tpu.memory_space<vmem>>, vector<16x128xf32>
    tpu.vector_store %arg6[%c1, %c0_6], %6 {strides = array<i32>} : memref<18x128xf32, #tpu.memory_space<vmem>>, vector<16x128xf32>,
    %cst_7 = arith.constant 0.000000e+00 : f32
    %8 = vector.broadcast %cst_7 : f32 to vector<16x128xf32>
    %c0_8 = arith.constant 0 : index
    %c0_9 = arith.constant 0 : index
    %9 = vector.load %arg6[%c0_8, %c0_9] : memref<18x128xf32, #tpu.memory_space<vmem>>, vector<16x128xf32>
    %c0_10 = arith.constant 0 : index
    %c1_11 = arith.constant 1 : index
    %c0_12 = arith.constant 0 : index
    %c0_13 = arith.constant 0 : index
    %10 = vector.load %arg2[%c0_10, %c1_11, %c0_12, %c0_13] : memref<6x9x1x128xf32, #tpu.memory_space<vmem>>, vector<1x1x1x128xf32>
    %11 = vector.shape_cast %10 : vector<1x1x1x128xf32> to vector<1x128xf32>
    %12 = vector.broadcast %11 : vector<1x128xf32> to vector<16x128xf32>
    %13 = arith.mulf %9, %12 : vector<16x128xf32>
    %14 = arith.addf %8, %13 : vector<16x128xf32>
    %c8_i32 = arith.constant 8 : i32
    %15 = tpu.dynamic_rotate %9 by %c8_i32 dim 1 : vector<16x128xf32>, i32 -> vector<16x128xf32>
    %c0_14 = arith.constant 0 : index
    %c0_15 = arith.constant 0 : index
    %c0_16 = arith.constant 0 : index
    %c0_17 = arith.constant 0 : index
    %16 = vector.load %arg2[%c0_14, %c0_15, %c0_16, %c0_17] : memref<6x9x1x128xf32, #tpu.memory_space<vmem>>, vector<1x1x1x128xf32>
    %17 = vector.shape_cast %16 : vector<1x1x1x128xf32> to vector<1x128xf32>
    %18 = vector.broadcast %17 : vector<1x128xf32> to vector<16x128xf32>
    %19 = arith.mulf %15, %18 : vector<16x128xf32>
    %20 = arith.addf %14, %19 : vector<16x128xf32>
    %c120_i32 = arith.constant 120 : i32
    %21 = tpu.dynamic_rotate %9 by %c120_i32 dim 1 : vector<16x128xf32>, i32 -> vector<16x128xf32>
    %c0_18 = arith.constant 0 : index
    %c2 = arith.constant 2 : index
    %c0_19 = arith.constant 0 : index
    %c0_20 = arith.constant 0 : index
    %22 = vector.load %arg2[%c0_18, %c2, %c0_19, %c0_20] : memref<6x9x1x128xf32, #tpu.memory_space<vmem>>, vector<1x1x1x128xf32>
    %23 = vector.shape_cast %22 : vector<1x1x1x128xf32> to vector<1x128xf32>
    %24 = vector.broadcast %23 : vector<1x128xf32> to vector<16x128xf32>
    %25 = arith.mulf %21, %24 : vector<16x128xf32>
    %26 = arith.addf %20, %25 : vector<16x128xf32>
    %c1_21 = arith.constant 1 : index
    %c0_22 = arith.constant 0 : index
    %27 = vector.load %arg6[%c1_21, %c0_22] : memref<18x128xf32, #tpu.memory_space<vmem>>, vector<16x128xf32>
    %c0_23 = arith.constant 0 : index
    %c4 = arith.constant 4 : index
    %c0_24 = arith.constant 0 : index
    %c0_25 = arith.constant 0 : index
    %28 = vector.load %arg2[%c0_23, %c4, %c0_24, %c0_25] : memref<6x9x1x128xf32, #tpu.memory_space<vmem>>, vector<1x1x1x128xf32>
    %29 = vector.shape_cast %28 : vector<1x1x1x128xf32> to vector<1x128xf32>
    %30 = vector.broadcast %29 : vector<1x128xf32> to vector<16x128xf32>
    %31 = arith.mulf %27, %30 : vector<16x128xf32>
    %32 = arith.addf %26, %31 : vector<16x128xf32>
    %c8_i32_26 = arith.constant 8 : i32
    %33 = tpu.dynamic_rotate %27 by %c8_i32_26 dim 1 : vector<16x128xf32>, i32 -> vector<16x128xf32>
    %c0_27 = arith.constant 0 : index
    %c3 = arith.constant 3 : index
    %c0_28 = arith.constant 0 : index
    %c0_29 = arith.constant 0 : index
    %34 = vector.load %arg2[%c0_27, %c3, %c0_28, %c0_29] : memref<6x9x1x128xf32, #tpu.memory_space<vmem>>, vector<1x1x1x128xf32>
    %35 = vector.shape_cast %34 : vector<1x1x1x128xf32> to vector<1x128xf32>
    %36 = vector.broadcast %35 : vector<1x128xf32> to vector<16x128xf32>
    %37 = arith.mulf %33, %36 : vector<16x128xf32>
    %38 = arith.addf %32, %37 : vector<16x128xf32>
    %c120_i32_30 = arith.constant 120 : i32
    %39 = tpu.dynamic_rotate %27 by %c120_i32_30 dim 1 : vector<16x128xf32>, i32 -> vector<16x128xf32>
    %c0_31 = arith.constant 0 : index
    %c5 = arith.constant 5 : index
    %c0_32 = arith.constant 0 : index
    %c0_33 = arith.constant 0 : index
    %40 = vector.load %arg2[%c0_31, %c5, %c0_32, %c0_33] : memref<6x9x1x128xf32, #tpu.memory_space<vmem>>, vector<1x1x1x128xf32>
    %41 = vector.shape_cast %40 : vector<1x1x1x128xf32> to vector<1x128xf32>
    %42 = vector.broadcast %41 : vector<1x128xf32> to vector<16x128xf32>
    %43 = arith.mulf %39, %42 : vector<16x128xf32>
    %44 = arith.addf %38, %43 : vector<16x128xf32>
    %c2_34 = arith.constant 2 : index
    %c0_35 = arith.constant 0 : index
    %45 = vector.load %arg6[%c2_34, %c0_35] : memref<18x128xf32, #tpu.memory_space<vmem>>, vector<16x128xf32>
    %c0_36 = arith.constant 0 : index
    %c7 = arith.constant 7 : index
    %c0_37 = arith.constant 0 : index
    %c0_38 = arith.constant 0 : index
    %46 = vector.load %arg2[%c0_36, %c7, %c0_37, %c0_38] : memref<6x9x1x128xf32, #tpu.memory_space<vmem>>, vector<1x1x1x128xf32>
    %47 = vector.shape_cast %46 : vector<1x1x1x128xf32> to vector<1x128xf32>
    %48 = vector.broadcast %47 : vector<1x128xf32> to vector<16x128xf32>
    %49 = arith.mulf %45, %48 : vector<16x128xf32>
    %50 = arith.addf %44, %49 : vector<16x128xf32>
    %c8_i32_39 = arith.constant 8 : i32
    %51 = tpu.dynamic_rotate %45 by %c8_i32_39 dim 1 : vector<16x128xf32>, i32 -> vector<16x128xf32>
    %c0_40 = arith.constant 0 : index
    %c6 = arith.constant 6 : index
    %c0_41 = arith.constant 0 : index
    %c0_42 = arith.constant 0 : index
    %52 = vector.load %arg2[%c0_40, %c6, %c0_41, %c0_42] : memref<6x9x1x128xf32, #tpu.memory_space<vmem>>, vector<1x1x1x128xf32>
    %53 = vector.shape_cast %52 : vector<1x1x1x128xf32> to vector<1x128xf32>
    %54 = vector.broadcast %53 : vector<1x128xf32> to vector<16x128xf32>
    %55 = arith.mulf %51, %54 : vector<16x128xf32>
    %56 = arith.addf %50, %55 : vector<16x128xf32>
    %c120_i32_43 = arith.constant 120 : i32
    %57 = tpu.dynamic_rotate %45 by %c120_i32_43 dim 1 : vector<16x128xf32>, i32 -> vector<16x128xf32>
    %c0_44 = arith.constant 0 : index
    %c8 = arith.constant 8 : index
    %c0_45 = arith.constant 0 : index
    %c0_46 = arith.constant 0 : index
    %58 = vector.load %arg2[%c0_44, %c8, %c0_45, %c0_46] : memref<6x9x1x128xf32, #tpu.memory_space<vmem>>, vector<1x1x1x128xf32>
    %59 = vector.shape_cast %58 : vector<1x1x1x128xf32> to vector<1x128xf32>
    %60 = vector.broadcast %59 : vector<1x128xf32> to vector<16x128xf32>
    %61 = arith.mulf %57, %60 : vector<16x128xf32>
    %62 = arith.addf %56, %61 : vector<16x128xf32>
    %c0_47 = arith.constant 0 : index
    %c0_48 = arith.constant 0 : index
    %c0_49 = arith.constant 0 : index
    %63 = vector.load %arg3[%c0_47, %c0_48, %c0_49] : memref<6x128x128xf32, #tpu.memory_space<vmem>>, vector<1x128x128xf32>
    %64 = vector.shape_cast %63 : vector<1x128x128xf32> to vector<128x128xf32>
    %cst_50 = arith.constant dense<0.000000e+00> : vector<16x128xf32>
    %65 = tpu.matmul %62, %64, %cst_50 {dimension_numbers = #tpu.dot_dimension_numbers<[1], [0], [0], [1], [0, 0, 1, 1], [], []>, precision = #tpu.contract_precision<fp32>} : vector<16x128xf32>, vector<128x128xf32>, vector<16x128xf32> -> vector<16x128xf32>
    %c0_51 = arith.constant 0 : index
    %c0_52 = arith.constant 0 : index
    %c0_53 = arith.constant 0 : index
    %66 = vector.load %arg4[%c0_51, %c0_52, %c0_53] : memref<6x1x128xf32, #tpu.memory_space<vmem>>, vector<1x1x128xf32>
    %67 = vector.shape_cast %66 : vector<1x1x128xf32> to vector<1x128xf32>
    %68 = vector.broadcast %67 : vector<1x128xf32> to vector<16x128xf32>
    %69 = arith.addf %65, %68 : vector<16x128xf32>
    %cst_54 = arith.constant 0.000000e+00 : f32
    %70 = vector.broadcast %cst_54 : f32 to vector<16x128xf32>
    %71 = arith.maximumf %69, %70 : vector<16x128xf32>
    %c1_55 = arith.constant 1 : index
    %c0_56 = arith.constant 0 : index
    %72 = vector.load %arg6[%c1_55, %c0_56] : memref<18x128xf32, #tpu.memory_space<vmem>>, vector<16x128xf32>
    tpu.vector_store %arg6[%c1_55, %c0_56], %71 {strides = array<i32>} : memref<18x128xf32, #tpu.memory_space<vmem>>, vector<16x128xf32>,
    %cst_57 = arith.constant 0.000000e+00 : f32
    %73 = vector.broadcast %cst_57 : f32 to vector<16x128xf32>
    %c0_58 = arith.constant 0 : index
    %c0_59 = arith.constant 0 : index
    %74 = vector.load %arg6[%c0_58, %c0_59] : memref<18x128xf32, #tpu.memory_space<vmem>>, vector<16x128xf32>
    %c1_60 = arith.constant 1 : index
    %c1_61 = arith.constant 1 : index
    %c0_62 = arith.constant 0 : index
    %c0_63 = arith.constant 0 : index
    %75 = vector.load %arg2[%c1_60, %c1_61, %c0_62, %c0_63] : memref<6x9x1x128xf32, #tpu.memory_space<vmem>>, vector<1x1x1x128xf32>
    %76 = vector.shape_cast %75 : vector<1x1x1x128xf32> to vector<1x128xf32>
    %77 = vector.broadcast %76 : vector<1x128xf32> to vector<16x128xf32>
    %78 = arith.mulf %74, %77 : vector<16x128xf32>
    %79 = arith.addf %73, %78 : vector<16x128xf32>
    %c8_i32_64 = arith.constant 8 : i32
    %80 = tpu.dynamic_rotate %74 by %c8_i32_64 dim 1 : vector<16x128xf32>, i32 -> vector<16x128xf32>
    %c1_65 = arith.constant 1 : index
    %c0_66 = arith.constant 0 : index
    %c0_67 = arith.constant 0 : index
    %c0_68 = arith.constant 0 : index
    %81 = vector.load %arg2[%c1_65, %c0_66, %c0_67, %c0_68] : memref<6x9x1x128xf32, #tpu.memory_space<vmem>>, vector<1x1x1x128xf32>
    %82 = vector.shape_cast %81 : vector<1x1x1x128xf32> to vector<1x128xf32>
    %83 = vector.broadcast %82 : vector<1x128xf32> to vector<16x128xf32>
    %84 = arith.mulf %80, %83 : vector<16x128xf32>
    %85 = arith.addf %79, %84 : vector<16x128xf32>
    %c120_i32_69 = arith.constant 120 : i32
    %86 = tpu.dynamic_rotate %74 by %c120_i32_69 dim 1 : vector<16x128xf32>, i32 -> vector<16x128xf32>
    %c1_70 = arith.constant 1 : index
    %c2_71 = arith.constant 2 : index
    %c0_72 = arith.constant 0 : index
    %c0_73 = arith.constant 0 : index
    %87 = vector.load %arg2[%c1_70, %c2_71, %c0_72, %c0_73] : memref<6x9x1x128xf32, #tpu.memory_space<vmem>>, vector<1x1x1x128xf32>
    %88 = vector.shape_cast %87 : vector<1x1x1x128xf32> to vector<1x128xf32>
    %89 = vector.broadcast %88 : vector<1x128xf32> to vector<16x128xf32>
    %90 = arith.mulf %86, %89 : vector<16x128xf32>
    %91 = arith.addf %85, %90 : vector<16x128xf32>
    %c1_74 = arith.constant 1 : index
    %c0_75 = arith.constant 0 : index
    %92 = vector.load %arg6[%c1_74, %c0_75] : memref<18x128xf32, #tpu.memory_space<vmem>>, vector<16x128xf32>
    %c1_76 = arith.constant 1 : index
    %c4_77 = arith.constant 4 : index
    %c0_78 = arith.constant 0 : index
    %c0_79 = arith.constant 0 : index
    %93 = vector.load %arg2[%c1_76, %c4_77, %c0_78, %c0_79] : memref<6x9x1x128xf32, #tpu.memory_space<vmem>>, vector<1x1x1x128xf32>
    %94 = vector.shape_cast %93 : vector<1x1x1x128xf32> to vector<1x128xf32>
    %95 = vector.broadcast %94 : vector<1x128xf32> to vector<16x128xf32>
    %96 = arith.mulf %92, %95 : vector<16x128xf32>
    %97 = arith.addf %91, %96 : vector<16x128xf32>
    %c8_i32_80 = arith.constant 8 : i32
    %98 = tpu.dynamic_rotate %92 by %c8_i32_80 dim 1 : vector<16x128xf32>, i32 -> vector<16x128xf32>
    %c1_81 = arith.constant 1 : index
    %c3_82 = arith.constant 3 : index
    %c0_83 = arith.constant 0 : index
    %c0_84 = arith.constant 0 : index
    %99 = vector.load %arg2[%c1_81, %c3_82, %c0_83, %c0_84] : memref<6x9x1x128xf32, #tpu.memory_space<vmem>>, vector<1x1x1x128xf32>
    %100 = vector.shape_cast %99 : vector<1x1x1x128xf32> to vector<1x128xf32>
    %101 = vector.broadcast %100 : vector<1x128xf32> to vector<16x128xf32>
    %102 = arith.mulf %98, %101 : vector<16x128xf32>
    %103 = arith.addf %97, %102 : vector<16x128xf32>
    %c120_i32_85 = arith.constant 120 : i32
    %104 = tpu.dynamic_rotate %92 by %c120_i32_85 dim 1 : vector<16x128xf32>, i32 -> vector<16x128xf32>
    %c1_86 = arith.constant 1 : index
    %c5_87 = arith.constant 5 : index
    %c0_88 = arith.constant 0 : index
    %c0_89 = arith.constant 0 : index
    %105 = vector.load %arg2[%c1_86, %c5_87, %c0_88, %c0_89] : memref<6x9x1x128xf32, #tpu.memory_space<vmem>>, vector<1x1x1x128xf32>
    %106 = vector.shape_cast %105 : vector<1x1x1x128xf32> to vector<1x128xf32>
    %107 = vector.broadcast %106 : vector<1x128xf32> to vector<16x128xf32>
    %108 = arith.mulf %104, %107 : vector<16x128xf32>
    %109 = arith.addf %103, %108 : vector<16x128xf32>
    %c2_90 = arith.constant 2 : index
    %c0_91 = arith.constant 0 : index
    %110 = vector.load %arg6[%c2_90, %c0_91] : memref<18x128xf32, #tpu.memory_space<vmem>>, vector<16x128xf32>
    %c1_92 = arith.constant 1 : index
    %c7_93 = arith.constant 7 : index
    %c0_94 = arith.constant 0 : index
    %c0_95 = arith.constant 0 : index
    %111 = vector.load %arg2[%c1_92, %c7_93, %c0_94, %c0_95] : memref<6x9x1x128xf32, #tpu.memory_space<vmem>>, vector<1x1x1x128xf32>
    %112 = vector.shape_cast %111 : vector<1x1x1x128xf32> to vector<1x128xf32>
    %113 = vector.broadcast %112 : vector<1x128xf32> to vector<16x128xf32>
    %114 = arith.mulf %110, %113 : vector<16x128xf32>
    %115 = arith.addf %109, %114 : vector<16x128xf32>
    %c8_i32_96 = arith.constant 8 : i32
    %116 = tpu.dynamic_rotate %110 by %c8_i32_96 dim 1 : vector<16x128xf32>, i32 -> vector<16x128xf32>
    %c1_97 = arith.constant 1 : index
    %c6_98 = arith.constant 6 : index
    %c0_99 = arith.constant 0 : index
    %c0_100 = arith.constant 0 : index
    %117 = vector.load %arg2[%c1_97, %c6_98, %c0_99, %c0_100] : memref<6x9x1x128xf32, #tpu.memory_space<vmem>>, vector<1x1x1x128xf32>
    %118 = vector.shape_cast %117 : vector<1x1x1x128xf32> to vector<1x128xf32>
    %119 = vector.broadcast %118 : vector<1x128xf32> to vector<16x128xf32>
    %120 = arith.mulf %116, %119 : vector<16x128xf32>
    %121 = arith.addf %115, %120 : vector<16x128xf32>
    %c120_i32_101 = arith.constant 120 : i32
    %122 = tpu.dynamic_rotate %110 by %c120_i32_101 dim 1 : vector<16x128xf32>, i32 -> vector<16x128xf32>
    %c1_102 = arith.constant 1 : index
    %c8_103 = arith.constant 8 : index
    %c0_104 = arith.constant 0 : index
    %c0_105 = arith.constant 0 : index
    %123 = vector.load %arg2[%c1_102, %c8_103, %c0_104, %c0_105] : memref<6x9x1x128xf32, #tpu.memory_space<vmem>>, vector<1x1x1x128xf32>
    %124 = vector.shape_cast %123 : vector<1x1x1x128xf32> to vector<1x128xf32>
    %125 = vector.broadcast %124 : vector<1x128xf32> to vector<16x128xf32>
    %126 = arith.mulf %122, %125 : vector<16x128xf32>
    %127 = arith.addf %121, %126 : vector<16x128xf32>
    %c1_106 = arith.constant 1 : index
    %c0_107 = arith.constant 0 : index
    %c0_108 = arith.constant 0 : index
    %128 = vector.load %arg3[%c1_106, %c0_107, %c0_108] : memref<6x128x128xf32, #tpu.memory_space<vmem>>, vector<1x128x128xf32>
    %129 = vector.shape_cast %128 : vector<1x128x128xf32> to vector<128x128xf32>
    %cst_109 = arith.constant dense<0.000000e+00> : vector<16x128xf32>
    %130 = tpu.matmul %127, %129, %cst_109 {dimension_numbers = #tpu.dot_dimension_numbers<[1], [0], [0], [1], [0, 0, 1, 1], [], []>, precision = #tpu.contract_precision<fp32>} : vector<16x128xf32>, vector<128x128xf32>, vector<16x128xf32> -> vector<16x128xf32>
    %c1_110 = arith.constant 1 : index
    %c0_111 = arith.constant 0 : index
    %c0_112 = arith.constant 0 : index
    %131 = vector.load %arg4[%c1_110, %c0_111, %c0_112] : memref<6x1x128xf32, #tpu.memory_space<vmem>>, vector<1x1x128xf32>
    %132 = vector.shape_cast %131 : vector<1x1x128xf32> to vector<1x128xf32>
    %133 = vector.broadcast %132 : vector<1x128xf32> to vector<16x128xf32>
    %134 = arith.addf %130, %133 : vector<16x128xf32>
    %cst_113 = arith.constant 0.000000e+00 : f32
    %135 = vector.broadcast %cst_113 : f32 to vector<16x128xf32>
    %136 = arith.maximumf %134, %135 : vector<16x128xf32>
    %c1_114 = arith.constant 1 : index
    %c0_115 = arith.constant 0 : index
    %137 = vector.load %arg6[%c1_114, %c0_115] : memref<18x128xf32, #tpu.memory_space<vmem>>, vector<16x128xf32>
    tpu.vector_store %arg6[%c1_114, %c0_115], %136 {strides = array<i32>} : memref<18x128xf32, #tpu.memory_space<vmem>>, vector<16x128xf32>,
    %cst_116 = arith.constant 0.000000e+00 : f32
    %138 = vector.broadcast %cst_116 : f32 to vector<16x128xf32>
    %c0_117 = arith.constant 0 : index
    %c0_118 = arith.constant 0 : index
    %139 = vector.load %arg6[%c0_117, %c0_118] : memref<18x128xf32, #tpu.memory_space<vmem>>, vector<16x128xf32>
    %c2_119 = arith.constant 2 : index
    %c1_120 = arith.constant 1 : index
    %c0_121 = arith.constant 0 : index
    %c0_122 = arith.constant 0 : index
    %140 = vector.load %arg2[%c2_119, %c1_120, %c0_121, %c0_122] : memref<6x9x1x128xf32, #tpu.memory_space<vmem>>, vector<1x1x1x128xf32>
    %141 = vector.shape_cast %140 : vector<1x1x1x128xf32> to vector<1x128xf32>
    %142 = vector.broadcast %141 : vector<1x128xf32> to vector<16x128xf32>
    %143 = arith.mulf %139, %142 : vector<16x128xf32>
    %144 = arith.addf %138, %143 : vector<16x128xf32>
    %c8_i32_123 = arith.constant 8 : i32
    %145 = tpu.dynamic_rotate %139 by %c8_i32_123 dim 1 : vector<16x128xf32>, i32 -> vector<16x128xf32>
    %c2_124 = arith.constant 2 : index
    %c0_125 = arith.constant 0 : index
    %c0_126 = arith.constant 0 : index
    %c0_127 = arith.constant 0 : index
    %146 = vector.load %arg2[%c2_124, %c0_125, %c0_126, %c0_127] : memref<6x9x1x128xf32, #tpu.memory_space<vmem>>, vector<1x1x1x128xf32>
    %147 = vector.shape_cast %146 : vector<1x1x1x128xf32> to vector<1x128xf32>
    %148 = vector.broadcast %147 : vector<1x128xf32> to vector<16x128xf32>
    %149 = arith.mulf %145, %148 : vector<16x128xf32>
    %150 = arith.addf %144, %149 : vector<16x128xf32>
    %c120_i32_128 = arith.constant 120 : i32
    %151 = tpu.dynamic_rotate %139 by %c120_i32_128 dim 1 : vector<16x128xf32>, i32 -> vector<16x128xf32>
    %c2_129 = arith.constant 2 : index
    %c2_130 = arith.constant 2 : index
    %c0_131 = arith.constant 0 : index
    %c0_132 = arith.constant 0 : index
    %152 = vector.load %arg2[%c2_129, %c2_130, %c0_131, %c0_132] : memref<6x9x1x128xf32, #tpu.memory_space<vmem>>, vector<1x1x1x128xf32>
    %153 = vector.shape_cast %152 : vector<1x1x1x128xf32> to vector<1x128xf32>
    %154 = vector.broadcast %153 : vector<1x128xf32> to vector<16x128xf32>
    %155 = arith.mulf %151, %154 : vector<16x128xf32>
    %156 = arith.addf %150, %155 : vector<16x128xf32>
    %c1_133 = arith.constant 1 : index
    %c0_134 = arith.constant 0 : index
    %157 = vector.load %arg6[%c1_133, %c0_134] : memref<18x128xf32, #tpu.memory_space<vmem>>, vector<16x128xf32>
    %c2_135 = arith.constant 2 : index
    %c4_136 = arith.constant 4 : index
    %c0_137 = arith.constant 0 : index
    %c0_138 = arith.constant 0 : index
    %158 = vector.load %arg2[%c2_135, %c4_136, %c0_137, %c0_138] : memref<6x9x1x128xf32, #tpu.memory_space<vmem>>, vector<1x1x1x128xf32>
    %159 = vector.shape_cast %158 : vector<1x1x1x128xf32> to vector<1x128xf32>
    %160 = vector.broadcast %159 : vector<1x128xf32> to vector<16x128xf32>
    %161 = arith.mulf %157, %160 : vector<16x128xf32>
    %162 = arith.addf %156, %161 : vector<16x128xf32>
    %c8_i32_139 = arith.constant 8 : i32
    %163 = tpu.dynamic_rotate %157 by %c8_i32_139 dim 1 : vector<16x128xf32>, i32 -> vector<16x128xf32>
    %c2_140 = arith.constant 2 : index
    %c3_141 = arith.constant 3 : index
    %c0_142 = arith.constant 0 : index
    %c0_143 = arith.constant 0 : index
    %164 = vector.load %arg2[%c2_140, %c3_141, %c0_142, %c0_143] : memref<6x9x1x128xf32, #tpu.memory_space<vmem>>, vector<1x1x1x128xf32>
    %165 = vector.shape_cast %164 : vector<1x1x1x128xf32> to vector<1x128xf32>
    %166 = vector.broadcast %165 : vector<1x128xf32> to vector<16x128xf32>
    %167 = arith.mulf %163, %166 : vector<16x128xf32>
    %168 = arith.addf %162, %167 : vector<16x128xf32>
    %c120_i32_144 = arith.constant 120 : i32
    %169 = tpu.dynamic_rotate %157 by %c120_i32_144 dim 1 : vector<16x128xf32>, i32 -> vector<16x128xf32>
    %c2_145 = arith.constant 2 : index
    %c5_146 = arith.constant 5 : index
    %c0_147 = arith.constant 0 : index
    %c0_148 = arith.constant 0 : index
    %170 = vector.load %arg2[%c2_145, %c5_146, %c0_147, %c0_148] : memref<6x9x1x128xf32, #tpu.memory_space<vmem>>, vector<1x1x1x128xf32>
    %171 = vector.shape_cast %170 : vector<1x1x1x128xf32> to vector<1x128xf32>
    %172 = vector.broadcast %171 : vector<1x128xf32> to vector<16x128xf32>
    %173 = arith.mulf %169, %172 : vector<16x128xf32>
    %174 = arith.addf %168, %173 : vector<16x128xf32>
    %c2_149 = arith.constant 2 : index
    %c0_150 = arith.constant 0 : index
    %175 = vector.load %arg6[%c2_149, %c0_150] : memref<18x128xf32, #tpu.memory_space<vmem>>, vector<16x128xf32>
    %c2_151 = arith.constant 2 : index
    %c7_152 = arith.constant 7 : index
    %c0_153 = arith.constant 0 : index
    %c0_154 = arith.constant 0 : index
    %176 = vector.load %arg2[%c2_151, %c7_152, %c0_153, %c0_154] : memref<6x9x1x128xf32, #tpu.memory_space<vmem>>, vector<1x1x1x128xf32>
    %177 = vector.shape_cast %176 : vector<1x1x1x128xf32> to vector<1x128xf32>
    %178 = vector.broadcast %177 : vector<1x128xf32> to vector<16x128xf32>
    %179 = arith.mulf %175, %178 : vector<16x128xf32>
    %180 = arith.addf %174, %179 : vector<16x128xf32>
    %c8_i32_155 = arith.constant 8 : i32
    %181 = tpu.dynamic_rotate %175 by %c8_i32_155 dim 1 : vector<16x128xf32>, i32 -> vector<16x128xf32>
    %c2_156 = arith.constant 2 : index
    %c6_157 = arith.constant 6 : index
    %c0_158 = arith.constant 0 : index
    %c0_159 = arith.constant 0 : index
    %182 = vector.load %arg2[%c2_156, %c6_157, %c0_158, %c0_159] : memref<6x9x1x128xf32, #tpu.memory_space<vmem>>, vector<1x1x1x128xf32>
    %183 = vector.shape_cast %182 : vector<1x1x1x128xf32> to vector<1x128xf32>
    %184 = vector.broadcast %183 : vector<1x128xf32> to vector<16x128xf32>
    %185 = arith.mulf %181, %184 : vector<16x128xf32>
    %186 = arith.addf %180, %185 : vector<16x128xf32>
    %c120_i32_160 = arith.constant 120 : i32
    %187 = tpu.dynamic_rotate %175 by %c120_i32_160 dim 1 : vector<16x128xf32>, i32 -> vector<16x128xf32>
    %c2_161 = arith.constant 2 : index
    %c8_162 = arith.constant 8 : index
    %c0_163 = arith.constant 0 : index
    %c0_164 = arith.constant 0 : index
    %188 = vector.load %arg2[%c2_161, %c8_162, %c0_163, %c0_164] : memref<6x9x1x128xf32, #tpu.memory_space<vmem>>, vector<1x1x1x128xf32>
    %189 = vector.shape_cast %188 : vector<1x1x1x128xf32> to vector<1x128xf32>
    %190 = vector.broadcast %189 : vector<1x128xf32> to vector<16x128xf32>
    %191 = arith.mulf %187, %190 : vector<16x128xf32>
    %192 = arith.addf %186, %191 : vector<16x128xf32>
    %c2_165 = arith.constant 2 : index
    %c0_166 = arith.constant 0 : index
    %c0_167 = arith.constant 0 : index
    %193 = vector.load %arg3[%c2_165, %c0_166, %c0_167] : memref<6x128x128xf32, #tpu.memory_space<vmem>>, vector<1x128x128xf32>
    %194 = vector.shape_cast %193 : vector<1x128x128xf32> to vector<128x128xf32>
    %cst_168 = arith.constant dense<0.000000e+00> : vector<16x128xf32>
    %195 = tpu.matmul %192, %194, %cst_168 {dimension_numbers = #tpu.dot_dimension_numbers<[1], [0], [0], [1], [0, 0, 1, 1], [], []>, precision = #tpu.contract_precision<fp32>} : vector<16x128xf32>, vector<128x128xf32>, vector<16x128xf32> -> vector<16x128xf32>
    %c2_169 = arith.constant 2 : index
    %c0_170 = arith.constant 0 : index
    %c0_171 = arith.constant 0 : index
    %196 = vector.load %arg4[%c2_169, %c0_170, %c0_171] : memref<6x1x128xf32, #tpu.memory_space<vmem>>, vector<1x1x128xf32>
    %197 = vector.shape_cast %196 : vector<1x1x128xf32> to vector<1x128xf32>
    %198 = vector.broadcast %197 : vector<1x128xf32> to vector<16x128xf32>
    %199 = arith.addf %195, %198 : vector<16x128xf32>
    %cst_172 = arith.constant 0.000000e+00 : f32
    %200 = vector.broadcast %cst_172 : f32 to vector<16x128xf32>
    %201 = arith.maximumf %199, %200 : vector<16x128xf32>
    %c1_173 = arith.constant 1 : index
    %c0_174 = arith.constant 0 : index
    %202 = vector.load %arg6[%c1_173, %c0_174] : memref<18x128xf32, #tpu.memory_space<vmem>>, vector<16x128xf32>
    tpu.vector_store %arg6[%c1_173, %c0_174], %201 {strides = array<i32>} : memref<18x128xf32, #tpu.memory_space<vmem>>, vector<16x128xf32>,
    %cst_175 = arith.constant 0.000000e+00 : f32
    %203 = vector.broadcast %cst_175 : f32 to vector<16x128xf32>
    %c0_176 = arith.constant 0 : index
    %c0_177 = arith.constant 0 : index
    %204 = vector.load %arg6[%c0_176, %c0_177] : memref<18x128xf32, #tpu.memory_space<vmem>>, vector<16x128xf32>
    %c3_178 = arith.constant 3 : index
    %c1_179 = arith.constant 1 : index
    %c0_180 = arith.constant 0 : index
    %c0_181 = arith.constant 0 : index
    %205 = vector.load %arg2[%c3_178, %c1_179, %c0_180, %c0_181] : memref<6x9x1x128xf32, #tpu.memory_space<vmem>>, vector<1x1x1x128xf32>
    %206 = vector.shape_cast %205 : vector<1x1x1x128xf32> to vector<1x128xf32>
    %207 = vector.broadcast %206 : vector<1x128xf32> to vector<16x128xf32>
    %208 = arith.mulf %204, %207 : vector<16x128xf32>
    %209 = arith.addf %203, %208 : vector<16x128xf32>
    %c8_i32_182 = arith.constant 8 : i32
    %210 = tpu.dynamic_rotate %204 by %c8_i32_182 dim 1 : vector<16x128xf32>, i32 -> vector<16x128xf32>
    %c3_183 = arith.constant 3 : index
    %c0_184 = arith.constant 0 : index
    %c0_185 = arith.constant 0 : index
    %c0_186 = arith.constant 0 : index
    %211 = vector.load %arg2[%c3_183, %c0_184, %c0_185, %c0_186] : memref<6x9x1x128xf32, #tpu.memory_space<vmem>>, vector<1x1x1x128xf32>
    %212 = vector.shape_cast %211 : vector<1x1x1x128xf32> to vector<1x128xf32>
    %213 = vector.broadcast %212 : vector<1x128xf32> to vector<16x128xf32>
    %214 = arith.mulf %210, %213 : vector<16x128xf32>
    %215 = arith.addf %209, %214 : vector<16x128xf32>
    %c120_i32_187 = arith.constant 120 : i32
    %216 = tpu.dynamic_rotate %204 by %c120_i32_187 dim 1 : vector<16x128xf32>, i32 -> vector<16x128xf32>
    %c3_188 = arith.constant 3 : index
    %c2_189 = arith.constant 2 : index
    %c0_190 = arith.constant 0 : index
    %c0_191 = arith.constant 0 : index
    %217 = vector.load %arg2[%c3_188, %c2_189, %c0_190, %c0_191] : memref<6x9x1x128xf32, #tpu.memory_space<vmem>>, vector<1x1x1x128xf32>
    %218 = vector.shape_cast %217 : vector<1x1x1x128xf32> to vector<1x128xf32>
    %219 = vector.broadcast %218 : vector<1x128xf32> to vector<16x128xf32>
    %220 = arith.mulf %216, %219 : vector<16x128xf32>
    %221 = arith.addf %215, %220 : vector<16x128xf32>
    %c1_192 = arith.constant 1 : index
    %c0_193 = arith.constant 0 : index
    %222 = vector.load %arg6[%c1_192, %c0_193] : memref<18x128xf32, #tpu.memory_space<vmem>>, vector<16x128xf32>
    %c3_194 = arith.constant 3 : index
    %c4_195 = arith.constant 4 : index
    %c0_196 = arith.constant 0 : index
    %c0_197 = arith.constant 0 : index
    %223 = vector.load %arg2[%c3_194, %c4_195, %c0_196, %c0_197] : memref<6x9x1x128xf32, #tpu.memory_space<vmem>>, vector<1x1x1x128xf32>
    %224 = vector.shape_cast %223 : vector<1x1x1x128xf32> to vector<1x128xf32>
    %225 = vector.broadcast %224 : vector<1x128xf32> to vector<16x128xf32>
    %226 = arith.mulf %222, %225 : vector<16x128xf32>
    %227 = arith.addf %221, %226 : vector<16x128xf32>
    %c8_i32_198 = arith.constant 8 : i32
    %228 = tpu.dynamic_rotate %222 by %c8_i32_198 dim 1 : vector<16x128xf32>, i32 -> vector<16x128xf32>
    %c3_199 = arith.constant 3 : index
    %c3_200 = arith.constant 3 : index
    %c0_201 = arith.constant 0 : index
    %c0_202 = arith.constant 0 : index
    %229 = vector.load %arg2[%c3_199, %c3_200, %c0_201, %c0_202] : memref<6x9x1x128xf32, #tpu.memory_space<vmem>>, vector<1x1x1x128xf32>
    %230 = vector.shape_cast %229 : vector<1x1x1x128xf32> to vector<1x128xf32>
    %231 = vector.broadcast %230 : vector<1x128xf32> to vector<16x128xf32>
    %232 = arith.mulf %228, %231 : vector<16x128xf32>
    %233 = arith.addf %227, %232 : vector<16x128xf32>
    %c120_i32_203 = arith.constant 120 : i32
    %234 = tpu.dynamic_rotate %222 by %c120_i32_203 dim 1 : vector<16x128xf32>, i32 -> vector<16x128xf32>
    %c3_204 = arith.constant 3 : index
    %c5_205 = arith.constant 5 : index
    %c0_206 = arith.constant 0 : index
    %c0_207 = arith.constant 0 : index
    %235 = vector.load %arg2[%c3_204, %c5_205, %c0_206, %c0_207] : memref<6x9x1x128xf32, #tpu.memory_space<vmem>>, vector<1x1x1x128xf32>
    %236 = vector.shape_cast %235 : vector<1x1x1x128xf32> to vector<1x128xf32>
    %237 = vector.broadcast %236 : vector<1x128xf32> to vector<16x128xf32>
    %238 = arith.mulf %234, %237 : vector<16x128xf32>
    %239 = arith.addf %233, %238 : vector<16x128xf32>
    %c2_208 = arith.constant 2 : index
    %c0_209 = arith.constant 0 : index
    %240 = vector.load %arg6[%c2_208, %c0_209] : memref<18x128xf32, #tpu.memory_space<vmem>>, vector<16x128xf32>
    %c3_210 = arith.constant 3 : index
    %c7_211 = arith.constant 7 : index
    %c0_212 = arith.constant 0 : index
    %c0_213 = arith.constant 0 : index
    %241 = vector.load %arg2[%c3_210, %c7_211, %c0_212, %c0_213] : memref<6x9x1x128xf32, #tpu.memory_space<vmem>>, vector<1x1x1x128xf32>
    %242 = vector.shape_cast %241 : vector<1x1x1x128xf32> to vector<1x128xf32>
    %243 = vector.broadcast %242 : vector<1x128xf32> to vector<16x128xf32>
    %244 = arith.mulf %240, %243 : vector<16x128xf32>
    %245 = arith.addf %239, %244 : vector<16x128xf32>
    %c8_i32_214 = arith.constant 8 : i32
    %246 = tpu.dynamic_rotate %240 by %c8_i32_214 dim 1 : vector<16x128xf32>, i32 -> vector<16x128xf32>
    %c3_215 = arith.constant 3 : index
    %c6_216 = arith.constant 6 : index
    %c0_217 = arith.constant 0 : index
    %c0_218 = arith.constant 0 : index
    %247 = vector.load %arg2[%c3_215, %c6_216, %c0_217, %c0_218] : memref<6x9x1x128xf32, #tpu.memory_space<vmem>>, vector<1x1x1x128xf32>
    %248 = vector.shape_cast %247 : vector<1x1x1x128xf32> to vector<1x128xf32>
    %249 = vector.broadcast %248 : vector<1x128xf32> to vector<16x128xf32>
    %250 = arith.mulf %246, %249 : vector<16x128xf32>
    %251 = arith.addf %245, %250 : vector<16x128xf32>
    %c120_i32_219 = arith.constant 120 : i32
    %252 = tpu.dynamic_rotate %240 by %c120_i32_219 dim 1 : vector<16x128xf32>, i32 -> vector<16x128xf32>
    %c3_220 = arith.constant 3 : index
    %c8_221 = arith.constant 8 : index
    %c0_222 = arith.constant 0 : index
    %c0_223 = arith.constant 0 : index
    %253 = vector.load %arg2[%c3_220, %c8_221, %c0_222, %c0_223] : memref<6x9x1x128xf32, #tpu.memory_space<vmem>>, vector<1x1x1x128xf32>
    %254 = vector.shape_cast %253 : vector<1x1x1x128xf32> to vector<1x128xf32>
    %255 = vector.broadcast %254 : vector<1x128xf32> to vector<16x128xf32>
    %256 = arith.mulf %252, %255 : vector<16x128xf32>
    %257 = arith.addf %251, %256 : vector<16x128xf32>
    %c3_224 = arith.constant 3 : index
    %c0_225 = arith.constant 0 : index
    %c0_226 = arith.constant 0 : index
    %258 = vector.load %arg3[%c3_224, %c0_225, %c0_226] : memref<6x128x128xf32, #tpu.memory_space<vmem>>, vector<1x128x128xf32>
    %259 = vector.shape_cast %258 : vector<1x128x128xf32> to vector<128x128xf32>
    %cst_227 = arith.constant dense<0.000000e+00> : vector<16x128xf32>
    %260 = tpu.matmul %257, %259, %cst_227 {dimension_numbers = #tpu.dot_dimension_numbers<[1], [0], [0], [1], [0, 0, 1, 1], [], []>, precision = #tpu.contract_precision<fp32>} : vector<16x128xf32>, vector<128x128xf32>, vector<16x128xf32> -> vector<16x128xf32>
    %c3_228 = arith.constant 3 : index
    %c0_229 = arith.constant 0 : index
    %c0_230 = arith.constant 0 : index
    %261 = vector.load %arg4[%c3_228, %c0_229, %c0_230] : memref<6x1x128xf32, #tpu.memory_space<vmem>>, vector<1x1x128xf32>
    %262 = vector.shape_cast %261 : vector<1x1x128xf32> to vector<1x128xf32>
    %263 = vector.broadcast %262 : vector<1x128xf32> to vector<16x128xf32>
    %264 = arith.addf %260, %263 : vector<16x128xf32>
    %cst_231 = arith.constant 0.000000e+00 : f32
    %265 = vector.broadcast %cst_231 : f32 to vector<16x128xf32>
    %266 = arith.maximumf %264, %265 : vector<16x128xf32>
    %c1_232 = arith.constant 1 : index
    %c0_233 = arith.constant 0 : index
    %267 = vector.load %arg6[%c1_232, %c0_233] : memref<18x128xf32, #tpu.memory_space<vmem>>, vector<16x128xf32>
    tpu.vector_store %arg6[%c1_232, %c0_233], %266 {strides = array<i32>} : memref<18x128xf32, #tpu.memory_space<vmem>>, vector<16x128xf32>,
    %cst_234 = arith.constant 0.000000e+00 : f32
    %268 = vector.broadcast %cst_234 : f32 to vector<16x128xf32>
    %c0_235 = arith.constant 0 : index
    %c0_236 = arith.constant 0 : index
    %269 = vector.load %arg6[%c0_235, %c0_236] : memref<18x128xf32, #tpu.memory_space<vmem>>, vector<16x128xf32>
    %c4_237 = arith.constant 4 : index
    %c1_238 = arith.constant 1 : index
    %c0_239 = arith.constant 0 : index
    %c0_240 = arith.constant 0 : index
    %270 = vector.load %arg2[%c4_237, %c1_238, %c0_239, %c0_240] : memref<6x9x1x128xf32, #tpu.memory_space<vmem>>, vector<1x1x1x128xf32>
    %271 = vector.shape_cast %270 : vector<1x1x1x128xf32> to vector<1x128xf32>
    %272 = vector.broadcast %271 : vector<1x128xf32> to vector<16x128xf32>
    %273 = arith.mulf %269, %272 : vector<16x128xf32>
    %274 = arith.addf %268, %273 : vector<16x128xf32>
    %c8_i32_241 = arith.constant 8 : i32
    %275 = tpu.dynamic_rotate %269 by %c8_i32_241 dim 1 : vector<16x128xf32>, i32 -> vector<16x128xf32>
    %c4_242 = arith.constant 4 : index
    %c0_243 = arith.constant 0 : index
    %c0_244 = arith.constant 0 : index
    %c0_245 = arith.constant 0 : index
    %276 = vector.load %arg2[%c4_242, %c0_243, %c0_244, %c0_245] : memref<6x9x1x128xf32, #tpu.memory_space<vmem>>, vector<1x1x1x128xf32>
    %277 = vector.shape_cast %276 : vector<1x1x1x128xf32> to vector<1x128xf32>
    %278 = vector.broadcast %277 : vector<1x128xf32> to vector<16x128xf32>
    %279 = arith.mulf %275, %278 : vector<16x128xf32>
    %280 = arith.addf %274, %279 : vector<16x128xf32>
    %c120_i32_246 = arith.constant 120 : i32
    %281 = tpu.dynamic_rotate %269 by %c120_i32_246 dim 1 : vector<16x128xf32>, i32 -> vector<16x128xf32>
    %c4_247 = arith.constant 4 : index
    %c2_248 = arith.constant 2 : index
    %c0_249 = arith.constant 0 : index
    %c0_250 = arith.constant 0 : index
    %282 = vector.load %arg2[%c4_247, %c2_248, %c0_249, %c0_250] : memref<6x9x1x128xf32, #tpu.memory_space<vmem>>, vector<1x1x1x128xf32>
    %283 = vector.shape_cast %282 : vector<1x1x1x128xf32> to vector<1x128xf32>
    %284 = vector.broadcast %283 : vector<1x128xf32> to vector<16x128xf32>
    %285 = arith.mulf %281, %284 : vector<16x128xf32>
    %286 = arith.addf %280, %285 : vector<16x128xf32>
    %c1_251 = arith.constant 1 : index
    %c0_252 = arith.constant 0 : index
    %287 = vector.load %arg6[%c1_251, %c0_252] : memref<18x128xf32, #tpu.memory_space<vmem>>, vector<16x128xf32>
    %c4_253 = arith.constant 4 : index
    %c4_254 = arith.constant 4 : index
    %c0_255 = arith.constant 0 : index
    %c0_256 = arith.constant 0 : index
    %288 = vector.load %arg2[%c4_253, %c4_254, %c0_255, %c0_256] : memref<6x9x1x128xf32, #tpu.memory_space<vmem>>, vector<1x1x1x128xf32>
    %289 = vector.shape_cast %288 : vector<1x1x1x128xf32> to vector<1x128xf32>
    %290 = vector.broadcast %289 : vector<1x128xf32> to vector<16x128xf32>
    %291 = arith.mulf %287, %290 : vector<16x128xf32>
    %292 = arith.addf %286, %291 : vector<16x128xf32>
    %c8_i32_257 = arith.constant 8 : i32
    %293 = tpu.dynamic_rotate %287 by %c8_i32_257 dim 1 : vector<16x128xf32>, i32 -> vector<16x128xf32>
    %c4_258 = arith.constant 4 : index
    %c3_259 = arith.constant 3 : index
    %c0_260 = arith.constant 0 : index
    %c0_261 = arith.constant 0 : index
    %294 = vector.load %arg2[%c4_258, %c3_259, %c0_260, %c0_261] : memref<6x9x1x128xf32, #tpu.memory_space<vmem>>, vector<1x1x1x128xf32>
    %295 = vector.shape_cast %294 : vector<1x1x1x128xf32> to vector<1x128xf32>
    %296 = vector.broadcast %295 : vector<1x128xf32> to vector<16x128xf32>
    %297 = arith.mulf %293, %296 : vector<16x128xf32>
    %298 = arith.addf %292, %297 : vector<16x128xf32>
    %c120_i32_262 = arith.constant 120 : i32
    %299 = tpu.dynamic_rotate %287 by %c120_i32_262 dim 1 : vector<16x128xf32>, i32 -> vector<16x128xf32>
    %c4_263 = arith.constant 4 : index
    %c5_264 = arith.constant 5 : index
    %c0_265 = arith.constant 0 : index
    %c0_266 = arith.constant 0 : index
    %300 = vector.load %arg2[%c4_263, %c5_264, %c0_265, %c0_266] : memref<6x9x1x128xf32, #tpu.memory_space<vmem>>, vector<1x1x1x128xf32>
    %301 = vector.shape_cast %300 : vector<1x1x1x128xf32> to vector<1x128xf32>
    %302 = vector.broadcast %301 : vector<1x128xf32> to vector<16x128xf32>
    %303 = arith.mulf %299, %302 : vector<16x128xf32>
    %304 = arith.addf %298, %303 : vector<16x128xf32>
    %c2_267 = arith.constant 2 : index
    %c0_268 = arith.constant 0 : index
    %305 = vector.load %arg6[%c2_267, %c0_268] : memref<18x128xf32, #tpu.memory_space<vmem>>, vector<16x128xf32>
    %c4_269 = arith.constant 4 : index
    %c7_270 = arith.constant 7 : index
    %c0_271 = arith.constant 0 : index
    %c0_272 = arith.constant 0 : index
    %306 = vector.load %arg2[%c4_269, %c7_270, %c0_271, %c0_272] : memref<6x9x1x128xf32, #tpu.memory_space<vmem>>, vector<1x1x1x128xf32>
    %307 = vector.shape_cast %306 : vector<1x1x1x128xf32> to vector<1x128xf32>
    %308 = vector.broadcast %307 : vector<1x128xf32> to vector<16x128xf32>
    %309 = arith.mulf %305, %308 : vector<16x128xf32>
    %310 = arith.addf %304, %309 : vector<16x128xf32>
    %c8_i32_273 = arith.constant 8 : i32
    %311 = tpu.dynamic_rotate %305 by %c8_i32_273 dim 1 : vector<16x128xf32>, i32 -> vector<16x128xf32>
    %c4_274 = arith.constant 4 : index
    %c6_275 = arith.constant 6 : index
    %c0_276 = arith.constant 0 : index
    %c0_277 = arith.constant 0 : index
    %312 = vector.load %arg2[%c4_274, %c6_275, %c0_276, %c0_277] : memref<6x9x1x128xf32, #tpu.memory_space<vmem>>, vector<1x1x1x128xf32>
    %313 = vector.shape_cast %312 : vector<1x1x1x128xf32> to vector<1x128xf32>
    %314 = vector.broadcast %313 : vector<1x128xf32> to vector<16x128xf32>
    %315 = arith.mulf %311, %314 : vector<16x128xf32>
    %316 = arith.addf %310, %315 : vector<16x128xf32>
    %c120_i32_278 = arith.constant 120 : i32
    %317 = tpu.dynamic_rotate %305 by %c120_i32_278 dim 1 : vector<16x128xf32>, i32 -> vector<16x128xf32>
    %c4_279 = arith.constant 4 : index
    %c8_280 = arith.constant 8 : index
    %c0_281 = arith.constant 0 : index
    %c0_282 = arith.constant 0 : index
    %318 = vector.load %arg2[%c4_279, %c8_280, %c0_281, %c0_282] : memref<6x9x1x128xf32, #tpu.memory_space<vmem>>, vector<1x1x1x128xf32>
    %319 = vector.shape_cast %318 : vector<1x1x1x128xf32> to vector<1x128xf32>
    %320 = vector.broadcast %319 : vector<1x128xf32> to vector<16x128xf32>
    %321 = arith.mulf %317, %320 : vector<16x128xf32>
    %322 = arith.addf %316, %321 : vector<16x128xf32>
    %c4_283 = arith.constant 4 : index
    %c0_284 = arith.constant 0 : index
    %c0_285 = arith.constant 0 : index
    %323 = vector.load %arg3[%c4_283, %c0_284, %c0_285] : memref<6x128x128xf32, #tpu.memory_space<vmem>>, vector<1x128x128xf32>
    %324 = vector.shape_cast %323 : vector<1x128x128xf32> to vector<128x128xf32>
    %cst_286 = arith.constant dense<0.000000e+00> : vector<16x128xf32>
    %325 = tpu.matmul %322, %324, %cst_286 {dimension_numbers = #tpu.dot_dimension_numbers<[1], [0], [0], [1], [0, 0, 1, 1], [], []>, precision = #tpu.contract_precision<fp32>} : vector<16x128xf32>, vector<128x128xf32>, vector<16x128xf32> -> vector<16x128xf32>
    %c4_287 = arith.constant 4 : index
    %c0_288 = arith.constant 0 : index
    %c0_289 = arith.constant 0 : index
    %326 = vector.load %arg4[%c4_287, %c0_288, %c0_289] : memref<6x1x128xf32, #tpu.memory_space<vmem>>, vector<1x1x128xf32>
    %327 = vector.shape_cast %326 : vector<1x1x128xf32> to vector<1x128xf32>
    %328 = vector.broadcast %327 : vector<1x128xf32> to vector<16x128xf32>
    %329 = arith.addf %325, %328 : vector<16x128xf32>
    %cst_290 = arith.constant 0.000000e+00 : f32
    %330 = vector.broadcast %cst_290 : f32 to vector<16x128xf32>
    %331 = arith.maximumf %329, %330 : vector<16x128xf32>
    %c1_291 = arith.constant 1 : index
    %c0_292 = arith.constant 0 : index
    %332 = vector.load %arg6[%c1_291, %c0_292] : memref<18x128xf32, #tpu.memory_space<vmem>>, vector<16x128xf32>
    tpu.vector_store %arg6[%c1_291, %c0_292], %331 {strides = array<i32>} : memref<18x128xf32, #tpu.memory_space<vmem>>, vector<16x128xf32>,
    %cst_293 = arith.constant 0.000000e+00 : f32
    %333 = vector.broadcast %cst_293 : f32 to vector<16x128xf32>
    %c0_294 = arith.constant 0 : index
    %c0_295 = arith.constant 0 : index
    %334 = vector.load %arg6[%c0_294, %c0_295] : memref<18x128xf32, #tpu.memory_space<vmem>>, vector<16x128xf32>
    %c5_296 = arith.constant 5 : index
    %c1_297 = arith.constant 1 : index
    %c0_298 = arith.constant 0 : index
    %c0_299 = arith.constant 0 : index
    %335 = vector.load %arg2[%c5_296, %c1_297, %c0_298, %c0_299] : memref<6x9x1x128xf32, #tpu.memory_space<vmem>>, vector<1x1x1x128xf32>
    %336 = vector.shape_cast %335 : vector<1x1x1x128xf32> to vector<1x128xf32>
    %337 = vector.broadcast %336 : vector<1x128xf32> to vector<16x128xf32>
    %338 = arith.mulf %334, %337 : vector<16x128xf32>
    %339 = arith.addf %333, %338 : vector<16x128xf32>
    %c8_i32_300 = arith.constant 8 : i32
    %340 = tpu.dynamic_rotate %334 by %c8_i32_300 dim 1 : vector<16x128xf32>, i32 -> vector<16x128xf32>
    %c5_301 = arith.constant 5 : index
    %c0_302 = arith.constant 0 : index
    %c0_303 = arith.constant 0 : index
    %c0_304 = arith.constant 0 : index
    %341 = vector.load %arg2[%c5_301, %c0_302, %c0_303, %c0_304] : memref<6x9x1x128xf32, #tpu.memory_space<vmem>>, vector<1x1x1x128xf32>
    %342 = vector.shape_cast %341 : vector<1x1x1x128xf32> to vector<1x128xf32>
    %343 = vector.broadcast %342 : vector<1x128xf32> to vector<16x128xf32>
    %344 = arith.mulf %340, %343 : vector<16x128xf32>
    %345 = arith.addf %339, %344 : vector<16x128xf32>
    %c120_i32_305 = arith.constant 120 : i32
    %346 = tpu.dynamic_rotate %334 by %c120_i32_305 dim 1 : vector<16x128xf32>, i32 -> vector<16x128xf32>
    %c5_306 = arith.constant 5 : index
    %c2_307 = arith.constant 2 : index
    %c0_308 = arith.constant 0 : index
    %c0_309 = arith.constant 0 : index
    %347 = vector.load %arg2[%c5_306, %c2_307, %c0_308, %c0_309] : memref<6x9x1x128xf32, #tpu.memory_space<vmem>>, vector<1x1x1x128xf32>
    %348 = vector.shape_cast %347 : vector<1x1x1x128xf32> to vector<1x128xf32>
    %349 = vector.broadcast %348 : vector<1x128xf32> to vector<16x128xf32>
    %350 = arith.mulf %346, %349 : vector<16x128xf32>
    %351 = arith.addf %345, %350 : vector<16x128xf32>
    %c1_310 = arith.constant 1 : index
    %c0_311 = arith.constant 0 : index
    %352 = vector.load %arg6[%c1_310, %c0_311] : memref<18x128xf32, #tpu.memory_space<vmem>>, vector<16x128xf32>
    %c5_312 = arith.constant 5 : index
    %c4_313 = arith.constant 4 : index
    %c0_314 = arith.constant 0 : index
    %c0_315 = arith.constant 0 : index
    %353 = vector.load %arg2[%c5_312, %c4_313, %c0_314, %c0_315] : memref<6x9x1x128xf32, #tpu.memory_space<vmem>>, vector<1x1x1x128xf32>
    %354 = vector.shape_cast %353 : vector<1x1x1x128xf32> to vector<1x128xf32>
    %355 = vector.broadcast %354 : vector<1x128xf32> to vector<16x128xf32>
    %356 = arith.mulf %352, %355 : vector<16x128xf32>
    %357 = arith.addf %351, %356 : vector<16x128xf32>
    %c8_i32_316 = arith.constant 8 : i32
    %358 = tpu.dynamic_rotate %352 by %c8_i32_316 dim 1 : vector<16x128xf32>, i32 -> vector<16x128xf32>
    %c5_317 = arith.constant 5 : index
    %c3_318 = arith.constant 3 : index
    %c0_319 = arith.constant 0 : index
    %c0_320 = arith.constant 0 : index
    %359 = vector.load %arg2[%c5_317, %c3_318, %c0_319, %c0_320] : memref<6x9x1x128xf32, #tpu.memory_space<vmem>>, vector<1x1x1x128xf32>
    %360 = vector.shape_cast %359 : vector<1x1x1x128xf32> to vector<1x128xf32>
    %361 = vector.broadcast %360 : vector<1x128xf32> to vector<16x128xf32>
    %362 = arith.mulf %358, %361 : vector<16x128xf32>
    %363 = arith.addf %357, %362 : vector<16x128xf32>
    %c120_i32_321 = arith.constant 120 : i32
    %364 = tpu.dynamic_rotate %352 by %c120_i32_321 dim 1 : vector<16x128xf32>, i32 -> vector<16x128xf32>
    %c5_322 = arith.constant 5 : index
    %c5_323 = arith.constant 5 : index
    %c0_324 = arith.constant 0 : index
    %c0_325 = arith.constant 0 : index
    %365 = vector.load %arg2[%c5_322, %c5_323, %c0_324, %c0_325] : memref<6x9x1x128xf32, #tpu.memory_space<vmem>>, vector<1x1x1x128xf32>
    %366 = vector.shape_cast %365 : vector<1x1x1x128xf32> to vector<1x128xf32>
    %367 = vector.broadcast %366 : vector<1x128xf32> to vector<16x128xf32>
    %368 = arith.mulf %364, %367 : vector<16x128xf32>
    %369 = arith.addf %363, %368 : vector<16x128xf32>
    %c2_326 = arith.constant 2 : index
    %c0_327 = arith.constant 0 : index
    %370 = vector.load %arg6[%c2_326, %c0_327] : memref<18x128xf32, #tpu.memory_space<vmem>>, vector<16x128xf32>
    %c5_328 = arith.constant 5 : index
    %c7_329 = arith.constant 7 : index
    %c0_330 = arith.constant 0 : index
    %c0_331 = arith.constant 0 : index
    %371 = vector.load %arg2[%c5_328, %c7_329, %c0_330, %c0_331] : memref<6x9x1x128xf32, #tpu.memory_space<vmem>>, vector<1x1x1x128xf32>
    %372 = vector.shape_cast %371 : vector<1x1x1x128xf32> to vector<1x128xf32>
    %373 = vector.broadcast %372 : vector<1x128xf32> to vector<16x128xf32>
    %374 = arith.mulf %370, %373 : vector<16x128xf32>
    %375 = arith.addf %369, %374 : vector<16x128xf32>
    %c8_i32_332 = arith.constant 8 : i32
    %376 = tpu.dynamic_rotate %370 by %c8_i32_332 dim 1 : vector<16x128xf32>, i32 -> vector<16x128xf32>
    %c5_333 = arith.constant 5 : index
    %c6_334 = arith.constant 6 : index
    %c0_335 = arith.constant 0 : index
    %c0_336 = arith.constant 0 : index
    %377 = vector.load %arg2[%c5_333, %c6_334, %c0_335, %c0_336] : memref<6x9x1x128xf32, #tpu.memory_space<vmem>>, vector<1x1x1x128xf32>
    %378 = vector.shape_cast %377 : vector<1x1x1x128xf32> to vector<1x128xf32>
    %379 = vector.broadcast %378 : vector<1x128xf32> to vector<16x128xf32>
    %380 = arith.mulf %376, %379 : vector<16x128xf32>
    %381 = arith.addf %375, %380 : vector<16x128xf32>
    %c120_i32_337 = arith.constant 120 : i32
    %382 = tpu.dynamic_rotate %370 by %c120_i32_337 dim 1 : vector<16x128xf32>, i32 -> vector<16x128xf32>
    %c5_338 = arith.constant 5 : index
    %c8_339 = arith.constant 8 : index
    %c0_340 = arith.constant 0 : index
    %c0_341 = arith.constant 0 : index
    %383 = vector.load %arg2[%c5_338, %c8_339, %c0_340, %c0_341] : memref<6x9x1x128xf32, #tpu.memory_space<vmem>>, vector<1x1x1x128xf32>
    %384 = vector.shape_cast %383 : vector<1x1x1x128xf32> to vector<1x128xf32>
    %385 = vector.broadcast %384 : vector<1x128xf32> to vector<16x128xf32>
    %386 = arith.mulf %382, %385 : vector<16x128xf32>
    %387 = arith.addf %381, %386 : vector<16x128xf32>
    %c5_342 = arith.constant 5 : index
    %c0_343 = arith.constant 0 : index
    %c0_344 = arith.constant 0 : index
    %388 = vector.load %arg3[%c5_342, %c0_343, %c0_344] : memref<6x128x128xf32, #tpu.memory_space<vmem>>, vector<1x128x128xf32>
    %389 = vector.shape_cast %388 : vector<1x128x128xf32> to vector<128x128xf32>
    %cst_345 = arith.constant dense<0.000000e+00> : vector<16x128xf32>
    %390 = tpu.matmul %387, %389, %cst_345 {dimension_numbers = #tpu.dot_dimension_numbers<[1], [0], [0], [1], [0, 0, 1, 1], [], []>, precision = #tpu.contract_precision<fp32>} : vector<16x128xf32>, vector<128x128xf32>, vector<16x128xf32> -> vector<16x128xf32>
    %c5_346 = arith.constant 5 : index
    %c0_347 = arith.constant 0 : index
    %c0_348 = arith.constant 0 : index
    %391 = vector.load %arg4[%c5_346, %c0_347, %c0_348] : memref<6x1x128xf32, #tpu.memory_space<vmem>>, vector<1x1x128xf32>
    %392 = vector.shape_cast %391 : vector<1x1x128xf32> to vector<1x128xf32>
    %393 = vector.broadcast %392 : vector<1x128xf32> to vector<16x128xf32>
    %394 = arith.addf %390, %393 : vector<16x128xf32>
    %c0_349 = arith.constant 0 : index
    %c0_350 = arith.constant 0 : index
    %c0_351 = arith.constant 0 : index
    %395 = vector.load %arg5[%c0_349, %c0_350, %c0_351] : memref<1x16x128xf32, #tpu.memory_space<vmem>>, vector<1x16x128xf32>
    %396 = vector.shape_cast %395 : vector<1x16x128xf32> to vector<16x128xf32>
    %397 = vector.shape_cast %394 : vector<16x128xf32> to vector<1x16x128xf32>
    tpu.vector_store %arg5[%c0_349, %c0_350, %c0_351], %397 {strides = array<i32>} : memref<1x16x128xf32, #tpu.memory_space<vmem>>, vector<1x16x128xf32>,
    return
  }
  func.func @transform_0(%arg0: i32) -> (i32, i32, i32) {
    %c0_i32 = arith.constant 0 : i32
    %c0_i32_0 = arith.constant 0 : i32
    %c0_i32_1 = arith.constant 0 : i32
    return %arg0, %c0_i32, %c0_i32_0 : i32, i32, i32
  }
  func.func @transform_1(%arg0: i32) -> (i32, i32, i32, i32) {
    %c0_i32 = arith.constant 0 : i32
    %c0_i32_0 = arith.constant 0 : i32
    %c0_i32_1 = arith.constant 0 : i32
    %c0_i32_2 = arith.constant 0 : i32
    %c0_i32_3 = arith.constant 0 : i32
    return %c0_i32, %c0_i32_0, %c0_i32_1, %c0_i32_2 : i32, i32, i32, i32
  }
  func.func @transform_2(%arg0: i32) -> (i32, i32, i32) {
    %c0_i32 = arith.constant 0 : i32
    %c0_i32_0 = arith.constant 0 : i32
    %c0_i32_1 = arith.constant 0 : i32
    %c0_i32_2 = arith.constant 0 : i32
    return %c0_i32, %c0_i32_0, %c0_i32_1 : i32, i32, i32
  }
  func.func @transform_3(%arg0: i32) -> (i32, i32, i32) {
    %c0_i32 = arith.constant 0 : i32
    %c0_i32_0 = arith.constant 0 : i32
    %c0_i32_1 = arith.constant 0 : i32
    %c0_i32_2 = arith.constant 0 : i32
    return %c0_i32, %c0_i32_0, %c0_i32_1 : i32, i32, i32
  }
  func.func @transform_4(%arg0: i32) -> (i32, i32, i32) {
    %c0_i32 = arith.constant 0 : i32
    %c0_i32_0 = arith.constant 0 : i32
    %c0_i32_1 = arith.constant 0 : i32
    return %arg0, %c0_i32, %c0_i32_0 : i32, i32, i32
  }
}

</mosaic_0001>

<bundles_post_ra>
// kernel: tpu_custom_call.1
= control target key start
LH: loop header
LB: loop body
LE: loop exit
PB: predicated region body
PF: predicated region fallthrough
CT: control target
= control target key end

     0   :  { %9 = vsyncpa [#allocation4], 0  ;;  %s11980_s0 = inlined_call_operand.hbm [shape: f32[2,16,128], index: 0, kind: input, shape index: {}]   ;;  %s11981_s1 = inlined_call_operand.hbm [shape: f32[6,9,1,128], index: 1, kind: input, shape index: {}]   ;;  %s11982_s2 = inlined_call_operand.hbm [shape: f32[6,128,128], index: 2, kind: input, shape index: {}]   ;;  %s11983_s3 = inlined_call_operand.vmem [shape: f32[6,1,128], index: 3, kind: input, shape index: {}]   ;;  %s11984_s4 = inlined_call_operand.hbm [shape: f32[2,16,128], index: 4, kind: output, shape index: {}]  }
   0x1   :  { %11 = vsyncpa [#allocation4 + $0x1], 0 }
   0x2   :  { %12 = vsyncpa [#allocation7], 0 }
   0x3   :  { %13 = vsyncpa [#allocation5], 0 }
   0x4   :  { %15 = vsyncpa [#allocation5 + $0x1], 0  ;;  %s8947_s15 = smov 0   ;;  %s8949_s16 = smov 0  }
   0x5   :  { %s8951_s17 = smov 0   ;;  %s8953_s18 = smov 0  }
   0x6 LB: > { %s8968_s19 = sadd.s32 4294967295, %s8908_s18   ;;  %s5460_s20 = sadd.s32 4294967294, %s8908_s18   ;;  %s8908_s18 = sphi %s8953_s18, %s12319_s18   ;;  %s8904_s17 = sphi %s8951_s17, %s12318_s17   ;;  %s8900_s16 = sphi %s8949_s16, %s12317_s16   ;;  %s8896_s15 = sphi %s8947_s15, %s12316_s15  }
   0x7   : > { %p41_p0 = scmp.ne.s32.totalorder %s8900_s16, %s8896_s15  ;;  %p11985_p1 = scmp.eq.s32.totalorder %s8968_s19, 0 }
   0x8   : > { %p134_p3 = scmp.eq.s32.totalorder %s5460_s20, 1  ;;  %p5461_p5 = scmp.ge.s32.totalorder %s8908_s18, 1 }
   0x9   : > { %p8977_p4 = por %p11985_p1, %p41_p0  ;;  %p141_p7 = scmp.lt.s32.totalorder %s8908_s18, 3 }
   0xa   : > { %p8982_p6 = por %p134_p3, %p41_p0  ;;  %s8910_s24 = smov [#allocation6]  }
   0xb   : > { %s12125_s21 = scalar_select %p8977_p4, 1, 0 }
   0xc   : > { %s12126_s22 = scalar_select %p8982_p6, 1, 0 }
   0xd   : > { %p8987_p8 = pnand %p5461_p5, %p141_p7  ;;  %s153_s25 = sshll.u32 %s8910_s24, 4  ;;  %s8991_s25 = int_to_ptr.vmem [resolvable:$true] %s153_s25 }
   0xe   : > { %s8911_s27 = smov [#allocation8]   ;;  %s8752_s5 = scalar_lea.hbm %s11981_s1, 864 }
   0xf   : > { %p8689_p9 = pneg %p8987_p8  ;;  %s166_s28 = sshll.u32 %s8911_s27, 4  ;;  %s9002_s28 = int_to_ptr.vmem [resolvable:$true] %s166_s28 }
  0x10   : > { %p8753_p12 = scmp.ne.s32.totalorder %s11981_s1, %s8752_s5  ;;  %p8759_p5 = scmp.lt.u32.totalorder %s8752_s5, %s11981_s1 }
  0x11   : > { %p8998_p11 = pnand %p8689_p9, %p11985_p1 }
  0x13   : > { %p8754_p13 = pneg %p8998_p11 }
  0x15   : > { %p8755_p0 = pnand %p8754_p13, %p8753_p12 }
  0x17   : > { %p8756_p3 = pneg %p8755_p0 }
  0x19   : > { %p8761_p7 = pnand %p8759_p5, %p8756_p3 }
  0x1b   : > { %8764 = shalt.err (!%p8761_p7)
}
  0x1c   : > { %s8765_s10 = scalar_lea.vmem %s8991_s25, 864  ;;  %p8773_p2 = scmp.lt.s32.totalorder %s8991_s25, %s8991_s25 }
  0x1d   : > { %p8766_p9 = scmp.ne.s32.totalorder %s8991_s25, %s8765_s10  ;;  %p8774_p12 = scmp.lt.s32.totalorder %s8765_s10, %s8765_s10 }
  0x1f   : > { %p8768_p10 = pnand %p8766_p9, %p8754_p13  ;;  %p8775_p0 = por %p8774_p12, %p8773_p2 }
  0x21   : > { %p8769_p1 = pneg %p8768_p10 }
  0x23   : > { %p8776_p6 = pnand %p8775_p0, %p8769_p1 }
  0x25   : > { %8779 = shalt.err (!%p8776_p6)
}
  0x26   : > { %s8912_s11 = smov 16   ;;  %s8913_s12 = smov 1  }
  0x27   : > { %8692 = dma.hbm_to_vmem [thread:$0]  (!%p8998_p11), %s11981_s1, 864, %s8991_s25, [#allocation7], %s8912_s11, %s8912_s11, %s8913_s12  }
  0x28   : > { %s8780_s27 = scalar_lea.hbm %s11982_s2, 12288 }
  0x29   : > { %p8781_p2 = scmp.ne.s32.totalorder %s11982_s2, %s8780_s27  ;;  %p8787_p10 = scmp.lt.u32.totalorder %s8780_s27, %s11982_s2 }
  0x2b   : > { %p8783_p1 = pnand %p8781_p2, %p8754_p13 }
  0x2d   : > { %p8784_p6 = pneg %p8783_p1 }
  0x2f   : > { %p8789_p3 = pnand %p8787_p10, %p8784_p6 }
  0x31   : > { %8792 = shalt.err (!%p8789_p3)
}
  0x32   : > { %s8793_s25 = scalar_lea.vmem %s9002_s28, 12288  ;;  %p8801_p12 = scmp.lt.s32.totalorder %s9002_s28, %s9002_s28 }
  0x33   : > { %p8794_p5 = scmp.ne.s32.totalorder %s9002_s28, %s8793_s25  ;;  %p8802_p0 = scmp.lt.s32.totalorder %s8793_s25, %s8793_s25 }
  0x35   : > { %p8796_p7 = pnand %p8794_p5, %p8754_p13  ;;  %p8803_p2 = por %p8802_p0, %p8801_p12 }
  0x37   : > { %p8797_p9 = pneg %p8796_p7 }
  0x39   : > { %p8804_p1 = pnand %p8803_p2, %p8797_p9 }
  0x3b   : > { %8807 = shalt.err (!%p8804_p1)
}
  0x3c   : > { %s8914_s7 = smov 128   ;;  %s8915_s8 = smov 8  }
  0x3d   : > { %8695 = dma.hbm_to_vmem [thread:$0]  (!%p8998_p11), %s11982_s2, 12288, %s9002_s28, [#allocation7], %s8914_s7, %s8914_s7, %s8915_s8  }
  0x3e   : > { %s9060_s11 = sadd.s32 1, %s8908_s18   ;;  %s28_s13 = sadd.s32 1, %s8904_s17 }
  0x3f   : > { %s25_s12 = ssub.s32 %s8908_s18, %s9060_s11  ;;  %p35_p6 = scmp.ne.s32.totalorder %s8904_s17, %s8900_s16 }
  0x40   : > { %p26_p13 = scmp.eq.s32.totalorder %s25_s12, 0  ;;  %p36_p10 = scmp.eq.s32.totalorder %s8908_s18, 0 }
  0x41   : > { %p12129_p5 = scmp.eq.s32.totalorder %s8968_s19, 1  ;;  %p8706_p9 = scmp.lt.s32.totalorder %s8908_s18, 2 }
  0x42   : > { %s9069_s14 = scalar_select %p26_p13, %s8904_s17, %s28_s13  }
  0x43   : > { %p37_p3 = por %p36_p10, %p35_p6  ;;  %p9073_p7 = por %p12129_p5, %p35_p6 }
  0x44   : > { %s183_s20 = sand.u32 1, %s8904_s17   ;;  %s5543_s28 = sshll.u32 %s8908_s18, 8 }
  0x45   : > { %s12130_s26 = scalar_select %p9073_p7, 1, 0 }
  0x46   : > { %s5465_s24 = sshll.u32 %s183_s20, 4  ;;  %s9083_s30 = scalar_lea.hbm %s11980_s0, %s5543_s28 }
  0x47   : > { %s187_s5 = scalar_lea.vmem [#allocation3], %s5465_s24  ;;  %p9087_p11 = pnand %p8706_p9, %p37_p3 }
  0x48   : > { %s194_s6 = sshll.u32 %s187_s5, 4  ;;  %s9091_s9 = scalar_lea.sflag [#allocation4], %s183_s20  ;;  %s9085_s6 = int_to_ptr.vmem [resolvable:$true] %s194_s6 }
  0x49   : > { %s8808_s10 = scalar_lea.hbm %s9083_s30, 256  ;;  %p8810_p0 = pneg %p9087_p11 }
  0x4a   : > { %p8809_p12 = scmp.ne.s32.totalorder %s9083_s30, %s8808_s10  ;;  %s8813_s24 = scalar_lea.hbm %s11980_s0, 512 }
  0x4b   : > { %p8814_p13 = scmp.lt.u32.totalorder %s9083_s30, %s11980_s0  ;;  %p8815_p6 = scmp.lt.u32.totalorder %s8813_s24, %s8808_s10 }
  0x4c   : > { %p8811_p2 = pnand %p8810_p0, %p8809_p12  ;;  %p8817_p3 = scmp.lt.u32.totalorder %s8808_s10, %s9083_s30 }
  0x4d   : > { %p8816_p10 = por %p8815_p6, %p8814_p13 }
  0x4e   : > { %p8812_p1 = pneg %p8811_p2 }
  0x4f   : > { %p8818_p5 = por %p8817_p3, %p8816_p10 }
  0x51   : > { %p8819_p9 = pnand %p8818_p5, %p8812_p1 }
  0x53   : > { %8822 = shalt.err (!%p8819_p9)
}
  0x54   : > { %s8823_s20 = scalar_lea.vmem %s9085_s6, 256  ;;  %s8916_s29 = smov [#allocation3]  }
  0x55   : > { %p8824_p12 = scmp.ne.s32.totalorder %s9085_s6, %s8823_s20  ;;  %s8828_s5 = sshll.u32 %s8916_s29, 4  ;;  %s8829_s5 = int_to_ptr.vmem [resolvable:$false] %s8828_s5 }
  0x56   : > { %s8830_s12 = scalar_lea.vmem %s8829_s5, 512  ;;  %p8831_p4 = scmp.lt.s32.totalorder %s9085_s6, %s8829_s5 }
  0x57   : > { %p8826_p2 = pnand %p8824_p12, %p8810_p0  ;;  %p8832_p13 = scmp.lt.s32.totalorder %s8830_s12, %s8823_s20 }
  0x59   : > { %p8827_p7 = pneg %p8826_p2  ;;  %p8833_p6 = por %p8832_p13, %p8831_p4 }
  0x5b   : > { %p8834_p10 = pnand %p8833_p6, %p8827_p7 }
  0x5d   : > { %8837 = shalt.err (!%p8834_p10)
}
  0x5e   : > { %8699 = dma.hbm_to_vmem [thread:$0]  (!%p9087_p11), %s9083_s30, 256, %s9085_s6, %s9091_s9, %s8914_s7, %s8914_s7, %s8915_s8  }
  0x5f   : > { %206 = sbr.rel (%p8987_p8) target bundleno = 3335 (0xd07), region = 36 }
  0x66   : > { %s9125_s10 = sand.u32 1, %s8900_s16   ;;  %p12132_p4 = scmp.ne.s32.totalorder %s12125_s21, 0 }
  0x67   : > { %s5469_s13 = sshll.u32 %s9125_s10, 4  ;;  %s209_s24 = scalar_lea.sflag [#allocation4], %s9125_s10 }
  0x68   : > { %s212_s25 = scalar_lea.vmem [#allocation3], %s5469_s13 }
  0x69   : > { %8883 = dma.done.wait (%p12132_p4), %s209_s24, 256  }
  0x6a   : > { %8885 = vsyncadd (%p12132_p4), %s209_s24, 4294967040  ;;  %p12133_p7 = scmp.eq.s32.totalorder %s8968_s19, 0 }
  0x6c   : > { %8887 = dma.done.wait (%p12133_p7), [#allocation7], 13152   ;;  %p12134_p8 = pmov %p12133_p7 }
  0x6d   : > { %v8917_v0 = vmov 0.0   ;;  %v247_v1 = vld [vmem:[%s212_s25] sm:$0xff]  ;;  %v248_v2 = vld [vmem:[%s212_s25 + $0x8] sm:$0xff]  ;;  %s8918_s21 = smov 120   ;;  %s8919_s23 = smov 8  }
  0x6e   : > { %8889 = vsyncadd (%p12134_p8), [#allocation7], 4294954144  ;;  %245 = vst [vmem:[#allocation2] sm:$0x1] %v8917_v0  ;;  %v9139_v3 = vmax.f32 %v247_v1, 0.0  ;;  %v9141_v4 = vmax.f32 %v248_v2, 0.0 }
  0x6f   : > { %246 = vst [vmem:[#allocation2 + $0x11] sm:$0x1] %v8917_v0  ;;  %v390_v5 = vld [vmem:[#allocation8] sm:$0xff]  ;;  %v391_v6 = vld [vmem:[#allocation8 + $0x8] sm:$0xff]  ;;  %v9143_v7 = vld [vmem:[#allocation8 + $0x10] sm:$0xff]  ;;  %s244_s25 = scalar_lea.vmem [#allocation9], %s5469_s13 }
  0x70   : > { %251 = vst [vmem:[#allocation2 + $0x1] sm:$0xff] %v9139_v3  ;;  %252 = vst [vmem:[#allocation2 + $0x9] sm:$0xff] %v9141_v4  ;;  %v414_v8 = vand.u32 4294901760, %v390_v5  ;;  %v417_v9 = vand.u32 4294901760, %v391_v6  ;;  %v9147_v10 = vld [vmem:[#allocation8 + $0x18] sm:$0xff]  ;;  %v420_v11 = vand.u32 4294901760, %v9143_v7 }
  0x71   : > { %v423_v12 = vand.u32 4294901760, %v9147_v10  ;;  %v9151_v13 = vld [vmem:[#allocation8 + $0x20] sm:$0xff]  ;;  %v9153_v14 = vld [vmem:[#allocation8 + $0x28] sm:$0xff]  ;;  %v9166_v19 = vld [vmem:[#allocation8 + $0x30] sm:$0xff]  ;;  %s5544_s7 = sshll.u32 %s8968_s19, 8  ;;  %s5355_s9 = scalar_lea.sflag [#allocation5], %s9125_s10 }
  0x72   : > { %v9155_v15 = vpack.c.bf16 %v417_v9, %v414_v8  ;;  %v426_v16 = vand.u32 4294901760, %v9151_v13  ;;  %v429_v17 = vand.u32 4294901760, %v9153_v14  ;;  %v9168_v20 = vld [vmem:[#allocation8 + $0x38] sm:$0xff]  ;;  %v432_v22 = vand.u32 4294901760, %v9166_v19  ;;  %v9186_v25 = vld [vmem:[#allocation8 + $0x40] sm:$0xff]  ;;  %v9191_v27 = vld [vmem:[#allocation8 + $0x48] sm:$0xff]  ;;  %s11935_s6 = scalar_lea.hbm %s11984_s4, %s5544_s7 }
  0x73   : > { %v9163_v18 = vpack.c.bf16 %v423_v12, %v420_v11  ;;  %v435_v23 = vand.u32 4294901760, %v9168_v20  ;;  %v438_v29 = vand.u32 4294901760, %v9186_v25  ;;  %v441_v30 = vand.u32 4294901760, %v9191_v27  ;;  %v9206_v31 = vld [vmem:[#allocation8 + $0x50] sm:$0xff]  ;;  %v9208_v32 = vld [vmem:[#allocation8 + $0x58] sm:$0xff]  ;;  %v9224_v36 = vld [vmem:[#allocation8 + $0x60] sm:$0xff] }
  0x74   : > { %7454 = vmatprep.subr.bf16.mxu0 %v9155_v15  ;;  %v9176_v21 = vpack.c.bf16 %v429_v17, %v426_v16  ;;  %v444_v34 = vand.u32 4294901760, %v9206_v31  ;;  %v447_v35 = vand.u32 4294901760, %v9208_v32  ;;  %v9226_v37 = vld [vmem:[#allocation8 + $0x68] sm:$0xff]  ;;  %v450_v39 = vand.u32 4294901760, %v9224_v36  ;;  %v9246_v43 = vld [vmem:[#allocation8 + $0x70] sm:$0xff]  ;;  %v9248_v44 = vld [vmem:[#allocation8 + $0x78] sm:$0xff] }
  0x75   : > { %7456 = vmatpush3.bf16.msra.mxu0 %v9155_v15  ;;  %v9198_v28 = vpack.c.bf16 %v435_v23, %v432_v22  ;;  %v9216_v33 = vpack.c.bf16 %v441_v30, %v438_v29  ;;  %v453_v40 = vand.u32 4294901760, %v9226_v37  ;;  %v9238_v41 = vsub.f32 %v390_v5, %v414_v8  ;;  %p12313_p0 = scmp.ne.s32.totalorder %s12130_s26, 0  ;;  %s8920_s19 = smov [#allocation9]  }
  0x76   : > { %7458 = vmatprep.subr.bf16.mxu0 %v9163_v18  ;;  %v9234_v38 = vpack.c.bf16 %v447_v35, %v444_v34  ;;  %v9240_v42 = vsub.f32 %v391_v6, %v417_v9  ;;  %v456_v47 = vand.u32 4294901760, %v9246_v43  ;;  %v459_v48 = vand.u32 4294901760, %v9248_v44  ;;  %s8842_s28 = sshll.u32 %s8920_s19, 4  ;;  %s8843_s28 = int_to_ptr.vmem [resolvable:$false] %s8842_s28 }
  0x77   : > { %v9180_v24 = vld [vmem:[#allocation2] sm:$0xff]  ;;  %v9188_v26 = vld [vmem:[#allocation2 + $0x8] sm:$0xff]  ;;  %v12003_v49 = vand.u32 4294901760, %v9238_v41  ;;  %v9264_v51 = vpack.c.bf16 %v453_v40, %v450_v39  ;;  %v9279_v54 = vsub.f32 %v9143_v7, %v420_v11  ;;  %v9284_v55 = vsub.f32 %v9147_v10, %v423_v12  ;;  %s8844_s27 = scalar_lea.vmem %s8843_s28, 512 }
  0x78   : > { %282 = vrot.lane.b32.xlu1 %v9180_v24, %s8918_s21  ;;  %267 = vrot.lane.b32.xlu0 %v9180_v24, %s8919_s23  ;;  %v9250_v45 = vld [vmem:[#allocation2 + $0xa] sm:$0xff]  ;;  %v9252_v46 = vld [vmem:[#allocation2 + $0x2] sm:$0xff]  ;;  %v12002_v50 = vand.u32 4294901760, %v9240_v42  ;;  %v9291_v56 = vpack.c.bf16 %v459_v48, %v456_v47  ;;  %v9309_v63 = vsub.f32 %v9151_v13, %v426_v16  ;;  %v9315_v0 = vsub.f32 %v9153_v14, %v429_v17 }
  0x79   : > { %7460 = vmatpush3.bf16.msra.mxu0 %v9163_v18  ;;  %v518_v52 = vsub.f32 %v9238_v41, %v12003_v49  ;;  %v12001_v59 = vand.u32 4294901760, %v9279_v54  ;;  %v12000_v60 = vand.u32 4294901760, %v9284_v55  ;;  %v9330_v10 = vsub.f32 %v9166_v19, %v432_v22 }
  0x7a   : > { %7462 = vmatprep.subr.bf16.mxu0 %v9176_v21  ;;  %v525_v53 = vsub.f32 %v9240_v42, %v12002_v50  ;;  %v11999_v6 = vand.u32 4294901760, %v9309_v63  ;;  %v11998_v7 = vand.u32 4294901760, %v9315_v0  ;;  %v9335_v11 = vsub.f32 %v9168_v20, %v435_v23 }
  0x7b   : > { %v519_v57 = vand.u32 4294901760, %v518_v52  ;;  %v532_v61 = vsub.f32 %v9279_v54, %v12001_v59  ;;  %v539_v62 = vsub.f32 %v9284_v55, %v12000_v60  ;;  %v11997_v14 = vand.u32 4294901760, %v9330_v10  ;;  %v5477_v59 = vld [vmem:[#allocation6 + $0x3] ss:$0 sm:$0xff] }
  0x7c   : > { %284 = vrot.lane.b32.xlu1 %v9188_v26, %s8918_s21  ;;  %269 = vrot.lane.b32.xlu0 %v9188_v26, %s8919_s23  ;;  %v526_v58 = vand.u32 4294901760, %v525_v53  ;;  %v546_v9 = vsub.f32 %v9309_v63, %v11999_v6  ;;  %v553_v12 = vsub.f32 %v9315_v0, %v11998_v7  ;;  %v11996_v16 = vand.u32 4294901760, %v9335_v11  ;;  %v5476_v7 = vld [vmem:[#allocation6 + $0x4] ss:$0 sm:$0xff] }
  0x7d   : > { %7464 = vmatpush3.bf16.msra.mxu0 %v9176_v21  ;;  %v533_v2 = vand.u32 4294901760, %v532_v61  ;;  %v540_v5 = vand.u32 4294901760, %v539_v62  ;;  %v560_v19 = vsub.f32 %v9330_v10, %v11997_v14  ;;  %v9353_v22 = vsub.f32 %v9186_v25, %v438_v29 }
  0x7e   : > { %7466 = vmatprep.subr.bf16.mxu0 %v9198_v28  ;;  %v9318_v1 = vpack.c.bf16 %v526_v58, %v519_v57  ;;  %v547_v13 = vand.u32 4294901760, %v546_v9  ;;  %v554_v17 = vand.u32 4294901760, %v553_v12  ;;  %v567_v20 = vsub.f32 %v9335_v11, %v11996_v16 }
  0x7f   : > { %v9322_v8 = vpack.c.bf16 %v540_v5, %v533_v2  ;;  %v9358_v23 = vsub.f32 %v9191_v27, %v441_v30  ;;  %v561_v53 = vand.u32 4294901760, %v560_v19  ;;  %v11995_v58 = vand.u32 4294901760, %v9353_v22 }
  0x80   : > { %314 = vrot.lane.b32.xlu1 %v9141_v4, %s8919_s23  ;;  %312 = vrot.lane.b32.xlu0 %v9139_v3, %s8919_s23  ;;  %v9360_v52 = vpack.c.bf16 %v554_v17, %v547_v13  ;;  %v568_v57 = vand.u32 4294901760, %v567_v20  ;;  %v9375_v27 = vsub.f32 %v9206_v31, %v444_v34  ;;  %v9380_v30 = vsub.f32 %v9208_v32, %v447_v35 }
  0x81   : > { %7468 = vmatpush3.bf16.msra.mxu0 %v9198_v28  ;;  %v11994_v61 = vand.u32 4294901760, %v9358_v23  ;;  %v574_v25 = vsub.f32 %v9353_v22, %v11995_v58  ;;  %v9392_v31 = vsub.f32 %v9224_v36, %v450_v39  ;;  %v9397_v32 = vsub.f32 %v9226_v37, %v453_v40 }
  0x82   : > { %7470 = vmatprep.subr.bf16.mxu0 %v9216_v33  ;;  %v9364_v62 = vpack.c.bf16 %v568_v57, %v561_v53  ;;  %12135 = vst [vmem:[#allocation13_spill] sm:$0xff] %v9375_v27  ;;  %12136 = vst [vmem:[#allocation14_spill] sm:$0xff] %v9380_v30  ;;  %v11993_v9 = vand.u32 4294901760, %v9375_v27  ;;  %v11992_v12 = vand.u32 4294901760, %v9380_v30  ;;  %v9413_v37 = vsub.f32 %v9246_v43, %v456_v47 }
  0x83   : > { %v581_v29 = vsub.f32 %v9358_v23, %v11994_v61  ;;  %v575_v2 = vand.u32 4294901760, %v574_v25  ;;  %12137 = vst [vmem:[#allocation15_spill] sm:$0xff] %v9392_v31  ;;  %12138 = vst [vmem:[#allocation16_spill] sm:$0xff] %v9397_v32  ;;  %v11991_v19 = vand.u32 4294901760, %v9392_v31  ;;  %v11990_v20 = vand.u32 4294901760, %v9397_v32 }
  0x84   : > { %330 = vrot.lane.b32.xlu1 %v9141_v4, %s8918_s21  ;;  %328 = vrot.lane.b32.xlu0 %v9139_v3, %s8918_s21  ;;  %v588_v17 = vsub.f32 %v9375_v27, %v11993_v9  ;;  %v595_v34 = vsub.f32 %v9380_v30, %v11992_v12  ;;  %12139 = vst [vmem:[#allocation17_spill] sm:$0xff] %v9413_v37 }
  0x85   : > { %7472 = vmatpush3.bf16.msra.mxu0 %v9216_v33  ;;  %v582_v5 = vand.u32 4294901760, %v581_v29  ;;  %v602_v36 = vsub.f32 %v9392_v31, %v11991_v19  ;;  %v609_v39 = vsub.f32 %v9397_v32, %v11990_v20  ;;  %v9418_v40 = vsub.f32 %v9248_v44, %v459_v48 }
  0x86   : > { %7474 = vmatprep.subr.bf16.mxu0 %v9234_v38  ;;  %v589_v35 = vand.u32 4294901760, %v588_v17  ;;  %v596_v53 = vand.u32 4294901760, %v595_v34 }
  0x87   : > { %v9384_v13 = vpack.c.bf16 %v582_v5, %v575_v2  ;;  %12140 = vst [vmem:[#allocation18_spill] sm:$0xff] %v9418_v40  ;;  %v603_v25 = vand.u32 4294901760, %v602_v36  ;;  %v610_v29 = vand.u32 4294901760, %v609_v39  ;;  %v11989_v2 = vand.u32 4294901760, %v9413_v37 }
  0x88   : > { %360 = vrot.lane.b32.xlu1 %v9250_v45, %s8919_s23  ;;  %358 = vrot.lane.b32.xlu0 %v9252_v46, %s8919_s23  ;;  %v9420_v57 = vpack.c.bf16 %v596_v53, %v589_v35  ;;  %v11988_v5 = vand.u32 4294901760, %v9418_v40  ;;  %v9436_v35 = vpack.c.bf16 %v9240_v42, %v9238_v41  ;;  %v9440_v53 = vpack.c.bf16 %v9284_v55, %v9279_v54 }
  0x89   : > { %7476 = vmatpush3.bf16.msra.mxu0 %v9234_v38  ;;  %v9424_v17 = vpack.c.bf16 %v610_v29, %v603_v25  ;;  %v616_v43 = vsub.f32 %v9413_v37, %v11989_v2  ;;  %v9444_v36 = vpack.c.bf16 %v9315_v0, %v9309_v63  ;;  %v9448_v39 = vpack.c.bf16 %v9335_v11, %v9330_v10  ;;  %v5475_v2 = vld [vmem:[#allocation6 + $0x2] ss:$0 sm:$0xff] }
  0x8a   : > { %7478 = vmatprep.subr.bf16.mxu0 %v9264_v51  ;;  %v623_v47 = vsub.f32 %v9418_v40, %v11988_v5  ;;  %v9452_v25 = vpack.c.bf16 %v9358_v23, %v9353_v22  ;;  %v9456_v29 = vpack.c.bf16 %v9380_v30, %v9375_v27 }
  0x8b   : > { %v617_v44 = vand.u32 4294901760, %v616_v43  ;;  %v9460_v43 = vpack.c.bf16 %v9397_v32, %v9392_v31 }
  0x8c   : > { %376 = vrot.lane.b32.xlu1 %v9250_v45, %s8918_s21  ;;  %374 = vrot.lane.b32.xlu0 %v9252_v46, %s8918_s21  ;;  %v624_v48 = vand.u32 4294901760, %v623_v47  ;;  %v9464_v47 = vpack.c.bf16 %v9418_v40, %v9413_v37  ;;  %v309_v40 = vmul.f32 %v5476_v7, %v9141_v4 }
  0x8d   : > { %7480 = vmatpush3.bf16.msra.mxu0 %v9264_v51 }
  0x8e   : > { %7482 = vmatprep.subr.bf16.mxu0 %v9291_v56  ;;  %v9432_v34 = vpack.c.bf16 %v624_v48, %v617_v44  ;;  %v5473_v44 = vld [vmem:[#allocation6 + $0x1] ss:$0 sm:$0xff]  ;;  %v5474_v48 = vld [vmem:[#allocation6] ss:$0 sm:$0xff] }
  0x8f   : > { %v263_v5 = vmul.f32 %v5473_v44, %v9180_v24  ;;  %v264_v58 = vmul.f32 %v5473_v44, %v9188_v26  ;;  %v308_v24 = vmul.f32 %v5476_v7, %v9139_v3  ;;  %v5480_v3 = vld [vmem:[#allocation6 + $0x6] ss:$0 sm:$0xff] }
  0x91   : > { %7484 = vmatpush3.bf16.msra.mxu0 %v9291_v56 }
  0x92   : > { %7486 = vmatprep.subr.bf16.mxu0 %v9318_v1 }
  0xea   : > { %v283_v20 = vpop.permute.xlu1 %282  ;;  %v268_v19 = vpop.permute.xlu0 %267 }
  0xeb   : > { %v278_v12 = vmul.f32 %v5474_v48, %v268_v19  ;;  %v294_v9 = vmul.f32 %v5475_v2, %v283_v20 }
  0xed   : > { %v280_v61 = vadd.f32 %v278_v12, %v263_v5  ;;  %v5479_v12 = vld [vmem:[#allocation6 + $0x7] ss:$0 sm:$0xff]  ;;  %v5478_v5 = vld [vmem:[#allocation6 + $0x5] ss:$0 sm:$0xff] }
  0xee   : > { %v285_v16 = vpop.permute.xlu1 %284  ;;  %v270_v14 = vpop.permute.xlu0 %269 }
  0xef   : > { %v295_v6 = vmul.f32 %v5475_v2, %v285_v16  ;;  %v279_v60 = vmul.f32 %v5474_v48, %v270_v14  ;;  %v296_v50 = vadd.f32 %v294_v9, %v280_v61  ;;  %v355_v14 = vmul.f32 %v5479_v12, %v9250_v45 }
  0xf0   : > { %v354_v16 = vmul.f32 %v5479_v12, %v9252_v46 }
  0xf1   : > { %v281_v49 = vadd.f32 %v279_v60, %v264_v58  ;;  %v310_v44 = vadd.f32 %v308_v24, %v296_v50  ;;  %v5481_v50 = vld [vmem:[#allocation6 + $0x8] ss:$0 sm:$0xff] }
  0xf2   : > { %v315_v37 = vpop.permute.xlu1 %314  ;;  %v313_v32 = vpop.permute.xlu0 %312 }
  0xf3   : > { %v297_v31 = vadd.f32 %v295_v6, %v281_v49  ;;  %v325_v19 = vmul.f32 %v5477_v59, %v315_v37  ;;  %v324_v20 = vmul.f32 %v5477_v59, %v313_v32 }
  0xf5   : > { %v311_v26 = vadd.f32 %v309_v40, %v297_v31  ;;  %v326_v58 = vadd.f32 %v324_v20, %v310_v44 }
  0xf6   : > { %v331_v30 = vpop.permute.xlu1 %330  ;;  %v329_v27 = vpop.permute.xlu0 %328 }
  0xf7   : > { %v327_v60 = vadd.f32 %v325_v19, %v311_v26  ;;  %v341_v4 = vmul.f32 %v5478_v5, %v331_v30  ;;  %v340_v61 = vmul.f32 %v5478_v5, %v329_v27 }
  0xf9   : > { %v343_v7 = vadd.f32 %v341_v4, %v327_v60  ;;  %v342_v9 = vadd.f32 %v340_v61, %v326_v58 }
  0xfa   : > { %v361_v49 = vpop.permute.xlu1 %360  ;;  %v359_v6 = vpop.permute.xlu0 %358 }
  0xfb   : > { %v357_v59 = vadd.f32 %v355_v14, %v343_v7  ;;  %v371_v32 = vmul.f32 %v5480_v3, %v361_v49  ;;  %v356_v37 = vadd.f32 %v354_v16, %v342_v9  ;;  %v370_v31 = vmul.f32 %v5480_v3, %v359_v6  ;;  %v9599_v6 = vld [vmem:[#allocation8 + $0x90] sm:$0xff] }
  0xfd   : > { %v373_v48 = vadd.f32 %v371_v32, %v357_v59  ;;  %v372_v45 = vadd.f32 %v370_v31, %v356_v37  ;;  %v9601_v59 = vld [vmem:[#allocation8 + $0x98] sm:$0xff]  ;;  %v1271_v37 = vand.u32 4294901760, %v9599_v6 }
  0xfe   : > { %v377_v40 = vpop.permute.xlu1 %376  ;;  %v375_v2 = vpop.permute.xlu0 %374  ;;  %v1274_v31 = vand.u32 4294901760, %v9601_v59 }
  0xff   : > { %v387_v24 = vmul.f32 %v5481_v50, %v377_v40  ;;  %v386_v46 = vmul.f32 %v5481_v50, %v375_v2  ;;  %v9621_v2 = vld [vmem:[#allocation8 + $0xa0] sm:$0xff] }
 0x100   : > { %v9618_v40 = vpack.c.bf16 %v1274_v31, %v1271_v37 }
 0x101   : > { %v389_v19 = vadd.f32 %v387_v24, %v373_v48  ;;  %v388_v20 = vadd.f32 %v386_v46, %v372_v45  ;;  %v9623_v48 = vld [vmem:[#allocation8 + $0xa8] sm:$0xff]  ;;  %v1277_v45 = vand.u32 4294901760, %v9621_v2 }
 0x102   : > { %v1280_v24 = vand.u32 4294901760, %v9623_v48 }
 0x103   : > { %v9472_v30 = vand.u32 4294901760, %v389_v19  ;;  %v9474_v27 = vand.u32 4294901760, %v388_v20 }
 0x104   : > { %v9633_v46 = vpack.c.bf16 %v1280_v24, %v1277_v45 }
 0x105   : > { %v9477_v12 = vsub.f32 %v389_v19, %v9472_v30  ;;  %v495_v5 = vsub.f32 %v388_v20, %v9474_v27  ;;  %v9635_v19 = vld [vmem:[#allocation8 + $0xb0] sm:$0xff]  ;;  %v9637_v20 = vld [vmem:[#allocation8 + $0xb8] sm:$0xff] }
 0x107   : > { %v496_v26 = vand.u32 4294901760, %v495_v5  ;;  %v506_v44 = vand.u32 4294901760, %v9477_v12 }
 0x109   : > { %v497_v14 = vsub.f32 %v495_v5, %v496_v26  ;;  %v507_v16 = vsub.f32 %v9477_v12, %v506_v44 }
 0x10b   : > { %v498_v60 = vand.u32 4294901760, %v497_v14  ;;  %v508_v58 = vand.u32 4294901760, %v507_v16  ;;  %v9659_v14 = vld [vmem:[#allocation8 + $0xc8] sm:$0xff] }
 0x10d   : > { %6225 = vmatprep.mubr.f32.mxu0 %v498_v60  ;;  %v1292_v60 = vand.u32 4294901760, %v9659_v14 }
 0x10e   : > { %6226 = vmatmul.mubr.f32.vlgmr.msra.gmra.mrb[0].mxu0 %v508_v58 }
 0x10f   : > { %7488 = vmatpush3.bf16.msra.mxu0 %v9318_v1  ;;  %6260 = vmatprep.mubr.f32.mxu0 %v9474_v27  ;;  %v12141_v1 = vand.u32 4294901760, %v9238_v41  ;;  %v12146_v41 = vand.u32 4294901760, %v9315_v0  ;;  %v12153_v0 = vld [vmem:[#allocation14_spill] sm:$0xff] }
 0x110   : > { %7490 = vmatprep.subr.bf16.mxu0 %v9322_v8 }
 0x113   : > { %7492 = vmatpush3.bf16.msra.mxu0 %v9322_v8  ;;  %v12142_v8 = vand.u32 4294901760, %v9240_v42  ;;  %v12147_v42 = vand.u32 4294901760, %v9330_v10  ;;  %v12155_v10 = vld [vmem:[#allocation15_spill] sm:$0xff] }
 0x114   : > { %7494 = vmatprep.subr.bf16.mxu0 %v9360_v52 }
 0x117   : > { %7496 = vmatpush3.bf16.msra.mxu0 %v9360_v52  ;;  %v7581_v52 = vpack.c.bf16 %v12142_v8, %v12141_v1  ;;  %v9675_v1 = vld [vmem:[#allocation8 + $0xd0] sm:$0xff]  ;;  %v9677_v8 = vld [vmem:[#allocation8 + $0xd8] sm:$0xff] }
 0x118   : > { %7498 = vmatprep.subr.bf16.mxu0 %v9364_v62 }
 0x11b   : > { %7500 = vmatpush3.bf16.msra.mxu0 %v9364_v62  ;;  %v12143_v62 = vand.u32 4294901760, %v9279_v54 }
 0x11c   : > { %7502 = vmatprep.subr.bf16.mxu0 %v9384_v13 }
 0x11f   : > { %7504 = vmatpush3.bf16.msra.mxu0 %v9384_v13  ;;  %v12144_v13 = vand.u32 4294901760, %v9284_v55  ;;  %v12149_v55 = vand.u32 4294901760, %v9353_v22  ;;  %v12159_v22 = vld [vmem:[#allocation17_spill] sm:$0xff] }
 0x120   : > { %7506 = vmatprep.subr.bf16.mxu0 %v9420_v57  ;;  %v12160_v61 = vand.u32 4294901760, %v12159_v22 }
 0x123   : > { %7508 = vmatpush3.bf16.msra.mxu0 %v9420_v57  ;;  %v7585_v57 = vpack.c.bf16 %v12144_v13, %v12143_v62  ;;  %v1298_v62 = vand.u32 4294901760, %v9677_v8 }
 0x124   : > { %7510 = vmatprep.subr.bf16.mxu0 %v9424_v17 }
 0x127   : > { %7512 = vmatpush3.bf16.msra.mxu0 %v9424_v17  ;;  %v12145_v17 = vand.u32 4294901760, %v9309_v63  ;;  %v12151_v63 = vld [vmem:[#allocation13_spill] sm:$0xff] }
 0x128   : > { %7514 = vmatprep.subr.bf16.mxu0 %v9432_v34 }
 0x12b   : > { %7516 = vmatpush3.bf16.msra.mxu0 %v9432_v34  ;;  %v7589_v34 = vpack.c.bf16 %v12146_v41, %v12145_v17  ;;  %v9695_v17 = vld [vmem:[#allocation8 + $0xe8] sm:$0xff] }
 0x12c   : > { %7518 = vmatprep.subr.bf16.mxu0 %v9436_v35 }
 0x12e   : > { %6261 = vmatmul.mubr.f32.vlgmr.msra.gmra.mrb[0].mxu0 %v9472_v30 }
 0x12f   : > { %7520 = vmatpush3.bf16.msra.mxu0 %v9436_v35  ;;  %6295 = vmatprep.mubr.f32.mxu0 %v495_v5  ;;  %v12148_v35 = vand.u32 4294901760, %v9335_v11  ;;  %v12157_v11 = vld [vmem:[#allocation16_spill] sm:$0xff] }
 0x130   : > { %7522 = vmatprep.subr.bf16.mxu0 %v9440_v53 }
 0x131   : > { %v7593_v54 = vpack.c.bf16 %v12148_v35, %v12147_v42 }
 0x133   : > { %7524 = vmatpush3.bf16.msra.mxu0 %v9440_v53  ;;  %v12150_v53 = vand.u32 4294901760, %v9358_v23  ;;  %v12161_v23 = vld [vmem:[#allocation18_spill] sm:$0xff] }
 0x134   : > { %7526 = vmatprep.subr.bf16.mxu0 %v9444_v36  ;;  %v12162_v3 = vand.u32 4294901760, %v12161_v23 }
 0x136   : > { %v7609_v7 = vpack.c.bf16 %v12162_v3, %v12160_v61 }
 0x137   : > { %7528 = vmatpush3.bf16.msra.mxu0 %v9444_v36  ;;  %v7597_v36 = vpack.c.bf16 %v12150_v53, %v12149_v55  ;;  %v9723_v53 = vld [vmem:[#allocation8 + $0xf0] sm:$0xff] }
 0x138   : > { %7530 = vmatprep.subr.bf16.mxu0 %v9448_v39 }
 0x13b   : > { %7532 = vmatpush3.bf16.msra.mxu0 %v9448_v39  ;;  %v12152_v39 = vand.u32 4294901760, %v12151_v63  ;;  %v1307_v63 = vand.u32 4294901760, %v9723_v53 }
 0x13c   : > { %7534 = vmatprep.subr.bf16.mxu0 %v9452_v25 }
 0x13f   : > { %7536 = vmatpush3.bf16.msra.mxu0 %v9452_v25  ;;  %v12154_v25 = vand.u32 4294901760, %v12153_v0 }
 0x140   : > { %7538 = vmatprep.subr.bf16.mxu0 %v9456_v29 }
 0x143   : > { %7540 = vmatpush3.bf16.msra.mxu0 %v9456_v29  ;;  %v7601_v29 = vpack.c.bf16 %v12154_v25, %v12152_v39 }
 0x144   : > { %7542 = vmatprep.subr.bf16.mxu0 %v9460_v43 }
 0x147   : > { %7544 = vmatpush3.bf16.msra.mxu0 %v9460_v43  ;;  %v12156_v43 = vand.u32 4294901760, %v12155_v10 }
 0x148   : > { %7546 = vmatprep.subr.bf16.mxu0 %v9464_v47 }
 0x14b   : > { %7548 = vmatpush3.bf16.msra.mxu0 %v9464_v47  ;;  %v12158_v47 = vand.u32 4294901760, %v12157_v11 }
 0x14c   : > { %7550 = vmatprep.subr.bf16.mxu0 %v9155_v15 }
 0x14d   : > { %v7605_v4 = vpack.c.bf16 %v12158_v47, %v12156_v43  ;;  %v9754_v47 = vsub.f32 %v9599_v6, %v1271_v37 }
 0x14e   : > { %6296 = vmatmul.mubr.f32.vlgmr.msra.gmra.mrb[0].mxu0 %v9477_v12 }
 0x14f   : > { %7552 = vmatpush3.bf16.msra.mxu0 %v9155_v15  ;;  %6330 = vmatprep.mubr.f32.mxu0 %v496_v26  ;;  %v12023_v23 = vand.u32 4294901760, %v9754_v47 }
 0x150   : > { %7554 = vmatprep.subr.bf16.mxu0 %v9163_v18 }
 0x153   : > { %7556 = vmatpush3.bf16.msra.mxu0 %v9163_v18 }
 0x154   : > { %7558 = vmatprep.subr.bf16.mxu0 %v9176_v21 }
 0x157   : > { %7560 = vmatpush3.bf16.msra.mxu0 %v9176_v21 }
 0x158   : > { %7562 = vmatprep.subr.bf16.mxu0 %v9198_v28 }
 0x15b   : > { %7564 = vmatpush3.bf16.msra.mxu0 %v9198_v28 }
 0x15c   : > { %7566 = vmatprep.subr.bf16.mxu0 %v9216_v33 }
 0x15f   : > { %7568 = vmatpush3.bf16.msra.mxu0 %v9216_v33 }
 0x160   : > { %7570 = vmatprep.subr.bf16.mxu0 %v9234_v38 }
 0x163   : > { %7572 = vmatpush3.bf16.msra.mxu0 %v9234_v38 }
 0x164   : > { %7574 = vmatprep.subr.bf16.mxu0 %v9264_v51 }
 0x167   : > { %7576 = vmatpush3.bf16.msra.mxu0 %v9264_v51 }
 0x168   : > { %7578 = vmatprep.subr.bf16.mxu0 %v9291_v56 }
 0x16b   : > { %7580 = vmatpush3.bf16.msra.mxu0 %v9291_v56 }
 0x16c   : > { %7582 = vmatprep.subr.bf16.mxu0 %v7581_v52 }
 0x16e   : > { %6331 = vmatmul.mubr.f32.vlgmr.msra.gmra.mrb[0].mxu0 %v506_v44  ;;  %v9657_v44 = vld [vmem:[#allocation8 + $0xc0] sm:$0xff] }
 0x16f   : > { %7584 = vmatpush3.bf16.msra.mxu0 %v7581_v52  ;;  %6365 = vmatprep.mubr.f32.mxu0 %v9474_v27  ;;  %v1289_v16 = vand.u32 4294901760, %v9657_v44  ;;  %v1295_v52 = vand.u32 4294901760, %v9675_v1 }
 0x170   : > { %7586 = vmatprep.subr.bf16.mxu0 %v7585_v57 }
 0x171   : > { %v9669_v58 = vpack.c.bf16 %v1292_v60, %v1289_v16  ;;  %v9687_v13 = vpack.c.bf16 %v1298_v62, %v1295_v52 }
 0x173   : > { %7588 = vmatpush3.bf16.msra.mxu0 %v7585_v57  ;;  %v9693_v57 = vld [vmem:[#allocation8 + $0xe0] sm:$0xff] }
 0x174   : > { %7590 = vmatprep.subr.bf16.mxu0 %v7589_v34  ;;  %v1301_v41 = vand.u32 4294901760, %v9693_v57 }
 0x177   : > { %7592 = vmatpush3.bf16.msra.mxu0 %v7589_v34  ;;  %v1304_v34 = vand.u32 4294901760, %v9695_v17 }
 0x178   : > { %7594 = vmatprep.subr.bf16.mxu0 %v7593_v54 }
 0x179   : > { %v9707_v35 = vpack.c.bf16 %v1304_v34, %v1301_v41 }
 0x17b   : > { %7596 = vmatpush3.bf16.msra.mxu0 %v7593_v54 }
 0x17c   : > { %7598 = vmatprep.subr.bf16.mxu0 %v7597_v36 }
 0x17f   : > { %7600 = vmatpush3.bf16.msra.mxu0 %v7597_v36  ;;  %v9725_v36 = vld [vmem:[#allocation8 + $0xf8] sm:$0xff] }
 0x180   : > { %7602 = vmatprep.subr.bf16.mxu0 %v7601_v29  ;;  %v1310_v39 = vand.u32 4294901760, %v9725_v36 }
 0x182   : > { %v9739_v10 = vpack.c.bf16 %v1310_v39, %v1307_v63 }
 0x183   : > { %7604 = vmatpush3.bf16.msra.mxu0 %v7601_v29 }
 0x184   : > { %7606 = vmatprep.subr.bf16.mxu0 %v7605_v4 }
 0x187   : > { %7608 = vmatpush3.bf16.msra.mxu0 %v7605_v4  ;;  %v9759_v4 = vsub.f32 %v9601_v59, %v1274_v31 }
 0x188   : > { %7610 = vmatprep.subr.bf16.mxu0 %v7609_v7 }
 0x189   : > { %v12022_v3 = vand.u32 4294901760, %v9759_v4 }
 0x18b   : > { %7612 = vmatpush3.bf16.msra.mxu0 %v7609_v7 }
 0x18c   : > { %7614 = vmatprep.subr.bf16.mxu0 %v9155_v15 }
 0x18e   : > { %6366 = vmatmul.mubr.f32.vlgmr.msra.gmra.mrb[0].mxu0 %v9472_v30 }
 0x18f   : > { %7616 = vmatpush3.bf16.msra.mxu0 %v9155_v15  ;;  %6400 = vmatprep.mubr.f32.mxu0 %v9474_v27  ;;  %v5482_v15 = vld [vmem:[%s11983_s3] ss:$0 sm:$0xff]  ;;  %v1286_v27 = vand.u32 4294901760, %v9637_v20 }
 0x190   : > { %7618 = vmatprep.subr.bf16.mxu0 %v9163_v18 }
 0x191   : > { %v9804_v31 = vsub.f32 %v9637_v20, %v1286_v27  ;;  %v9821_v20 = vsub.f32 %v9659_v14, %v1292_v60  ;;  %v9837_v14 = vsub.f32 %v9675_v1, %v1295_v52  ;;  %v9842_v60 = vsub.f32 %v9677_v8, %v1298_v62 }
 0x192   : > { %v9859_v8 = vsub.f32 %v9693_v57, %v1301_v41  ;;  %v9864_v62 = vsub.f32 %v9695_v17, %v1304_v34  ;;  %v9876_v57 = vsub.f32 %v9723_v53, %v1307_v63  ;;  %v9881_v17 = vsub.f32 %v9725_v36, %v1310_v39 }
 0x193   : > { %7620 = vmatpush3.bf16.msra.mxu0 %v9163_v18  ;;  %v9587_v18 = vld [vmem:[#allocation8 + $0x80] sm:$0xff]  ;;  %12163 = vst [vmem:[#allocation13_spill] sm:$0xff] %v9821_v20  ;;  %12164 = vst [vmem:[#allocation14_spill] sm:$0xff] %v9837_v14 }
 0x194   : > { %7622 = vmatprep.subr.bf16.mxu0 %v9176_v21  ;;  %12165 = vst [vmem:[#allocation15_spill] sm:$0xff] %v9842_v60  ;;  %12166 = vst [vmem:[#allocation16_spill] sm:$0xff] %v9859_v8 }
 0x195   : > { %12167 = vst [vmem:[#allocation17_spill] sm:$0xff] %v9864_v62  ;;  %12168 = vst [vmem:[#allocation18_spill] sm:$0xff] %v9876_v57 }
 0x196   : > { %12169 = vst [vmem:[#allocation19_spill] sm:$0xff] %v9881_v17 }
 0x197   : > { %7624 = vmatpush3.bf16.msra.mxu0 %v9176_v21  ;;  %v9589_v21 = vld [vmem:[#allocation8 + $0x88] sm:$0xff] }
 0x198   : > { %7626 = vmatprep.subr.bf16.mxu0 %v9198_v28 }
 0x19b   : > { %7628 = vmatpush3.bf16.msra.mxu0 %v9198_v28  ;;  %v1265_v28 = vand.u32 4294901760, %v9587_v18 }
 0x19c   : > { %7630 = vmatprep.subr.bf16.mxu0 %v9216_v33 }
 0x19d   : > { %v9712_v54 = vsub.f32 %v9587_v18, %v1265_v28  ;;  %v1390_v18 = vsub.f32 %v9759_v4, %v12022_v3 }
 0x19f   : > { %7632 = vmatpush3.bf16.msra.mxu0 %v9216_v33  ;;  %v1268_v33 = vand.u32 4294901760, %v9589_v21  ;;  %v12025_v0 = vand.u32 4294901760, %v9712_v54 }
 0x1a0   : > { %7634 = vmatprep.subr.bf16.mxu0 %v9234_v38 }
 0x1a1   : > { %v9717_v55 = vsub.f32 %v9589_v21, %v1268_v33  ;;  %v1369_v43 = vsub.f32 %v9712_v54, %v12025_v0  ;;  %v9778_v21 = vsub.f32 %v9621_v2, %v1277_v45  ;;  %v5487_v0 = vld [vmem:[#allocation6 + $0xc] ss:$0 sm:$0xff] }
 0x1a3   : > { %7636 = vmatpush3.bf16.msra.mxu0 %v9234_v38  ;;  %v12024_v25 = vand.u32 4294901760, %v9717_v55  ;;  %v1370_v22 = vand.u32 4294901760, %v1369_v43 }
 0x1a4   : > { %7638 = vmatprep.subr.bf16.mxu0 %v9264_v51 }
 0x1a5   : > { %v1376_v11 = vsub.f32 %v9717_v55, %v12024_v25 }
 0x1a7   : > { %7640 = vmatpush3.bf16.msra.mxu0 %v9264_v51  ;;  %v1377_v61 = vand.u32 4294901760, %v1376_v11 }
 0x1a8   : > { %7642 = vmatprep.subr.bf16.mxu0 %v9291_v56 }
 0x1a9   : > { %v9765_v7 = vpack.c.bf16 %v1377_v61, %v1370_v22  ;;  %v12016_v61 = vand.u32 4294901760, %v9821_v20 }
 0x1ab   : > { %7644 = vmatpush3.bf16.msra.mxu0 %v9291_v56  ;;  %v9597_v56 = vpack.c.bf16 %v1268_v33, %v1265_v28  ;;  %v9783_v28 = vsub.f32 %v9623_v48, %v1280_v24  ;;  %v12018_v24 = vand.u32 4294901760, %v9804_v31 }
 0x1ad   : > { %7646 = vmatprep.subr.bf16.mxu1 %v9597_v56 }
 0x1ae   : > { %6401 = vmatmul.mubr.f32.vlgmr.msra.gmra.mrb[0].mxu0 %v9472_v30  ;;  %7648 = vmatpush3.bf16.msra.mxu1 %v9597_v56  ;;  %v1283_v30 = vand.u32 4294901760, %v9635_v19 }
 0x1af   : > { %7650 = vmatprep.subr.bf16.mxu1 %v9618_v40 }
 0x1b0   : > { %v9651_v26 = vpack.c.bf16 %v1286_v27, %v1283_v30  ;;  %v9799_v37 = vsub.f32 %v9635_v19, %v1283_v30  ;;  %v9816_v19 = vsub.f32 %v9657_v44, %v1289_v16  ;;  %v1418_v30 = vsub.f32 %v9804_v31, %v12018_v24 }
 0x1b1   : > { %v1432_v16 = vsub.f32 %v9821_v20, %v12016_v61 }
 0x1b2   : > { %7652 = vmatpush3.bf16.msra.mxu1 %v9618_v40  ;;  %v12019_v45 = vand.u32 4294901760, %v9799_v37  ;;  %v12017_v22 = vand.u32 4294901760, %v9816_v19 }
 0x1b3   : > { %7654 = vmatprep.subr.bf16.mxu1 %v9633_v46 }
 0x1b4   : > { %v1411_v11 = vsub.f32 %v9799_v37, %v12019_v45  ;;  %v1425_v44 = vsub.f32 %v9816_v19, %v12017_v22  ;;  %v5486_v45 = vld [vmem:[#allocation6 + $0xd] ss:$0 sm:$0xff] }
 0x1b6   : > { %7656 = vmatpush3.bf16.msra.mxu1 %v9633_v46  ;;  %v1412_v27 = vand.u32 4294901760, %v1411_v11 }
 0x1b7   : > { %7658 = vmatprep.subr.bf16.mxu1 %v9651_v26 }
 0x1ba   : > { %7660 = vmatpush3.bf16.msra.mxu1 %v9651_v26 }
 0x1bb   : > { %7662 = vmatprep.subr.bf16.mxu1 %v9669_v58 }
 0x1be   : > { %7664 = vmatpush3.bf16.msra.mxu1 %v9669_v58 }
 0x1bf   : > { %7666 = vmatprep.subr.bf16.mxu1 %v9687_v13 }
 0x1c2   : > { %7668 = vmatpush3.bf16.msra.mxu1 %v9687_v13 }
 0x1c3   : > { %7670 = vmatprep.subr.bf16.mxu1 %v9707_v35 }
 0x1c6   : > { %7672 = vmatpush3.bf16.msra.mxu1 %v9707_v35 }
 0x1c7   : > { %7674 = vmatprep.subr.bf16.mxu1 %v9739_v10 }
 0x1ca   : > { %7676 = vmatpush3.bf16.msra.mxu1 %v9739_v10 }
 0x1cb   : > { %7678 = vmatprep.subr.bf16.mxu1 %v9765_v7 }
 0x281   : > { %v6402_v38 = vpop.f32.mrb[0].mxu0 }
 0x282   : > { %v8605_v51 = vadd.f32 %v6402_v38, %v5482_v15  ;;  %v1087_v9 = vpop.f32.mrb[1].mxu0  ;;  %v1391_v38 = vand.u32 4294901760, %v1390_v18 }
 0x283   : > { %v8606_v49 = vadd.f32 %v5482_v15, %v1087_v9  ;;  %v1383_v15 = vsub.f32 %v9754_v47, %v12023_v23  ;;  %v12020_v9 = vand.u32 4294901760, %v9783_v28 }
 0x284   : > { %v9603_v32 = vmax.f32 %v8605_v51, 0.0  ;;  %v12021_v51 = vand.u32 4294901760, %v9778_v21 }
 0x285   : > { %v9608_v50 = vmax.f32 %v8606_v49, 0.0  ;;  %v1384_v33 = vand.u32 4294901760, %v1383_v15  ;;  %v1404_v59 = vsub.f32 %v9783_v28, %v12020_v9  ;;  %v1419_v15 = vand.u32 4294901760, %v1418_v30 }
 0x286   : > { %1100 = vst [vmem:[#allocation2 + $0x9] sm:$0xff] %v9603_v32  ;;  %1163 = vrot.lane.b32.xlu1 %v9603_v32, %s8919_s23  ;;  %v1397_v6 = vsub.f32 %v9778_v21, %v12021_v51  ;;  %v12013_v30 = vand.u32 4294901760, %v9859_v8 }
 0x287   : > { %1099 = vst [vmem:[#allocation2 + $0x1] sm:$0xff] %v9608_v50  ;;  %v9788_v49 = vpack.c.bf16 %v1391_v38, %v1384_v33  ;;  %v1405_v48 = vand.u32 4294901760, %v1404_v59  ;;  %v9844_v18 = vpack.c.bf16 %v1419_v15, %v1412_v27  ;;  %v1426_v33 = vand.u32 4294901760, %v1425_v44 }
 0x288   : > { %v1398_v2 = vand.u32 4294901760, %v1397_v6  ;;  %v1433_v38 = vand.u32 4294901760, %v1432_v16  ;;  %v12015_v6 = vand.u32 4294901760, %v9837_v14  ;;  %v12014_v59 = vand.u32 4294901760, %v9842_v60 }
 0x289   : > { %v12012_v27 = vand.u32 4294901760, %v9864_v62  ;;  %v1453_v44 = vsub.f32 %v9859_v8, %v12013_v30  ;;  %v12011_v16 = vand.u32 4294901760, %v9876_v57 }
 0x28a   : > { %v9808_v43 = vpack.c.bf16 %v1405_v48, %v1398_v2  ;;  %v9848_v2 = vpack.c.bf16 %v1433_v38, %v1426_v33  ;;  %v1439_v1 = vsub.f32 %v9837_v14, %v12015_v6  ;;  %v1446_v52 = vsub.f32 %v9842_v60, %v12014_v59  ;;  %v5485_v6 = vld [vmem:[#allocation6 + $0xb] ss:$0 sm:$0xff] }
 0x28b   : > { %v1460_v41 = vsub.f32 %v9864_v62, %v12012_v27  ;;  %v1454_v34 = vand.u32 4294901760, %v1453_v44  ;;  %v12010_v33 = vand.u32 4294901760, %v9881_v17  ;;  %v1467_v53 = vsub.f32 %v9876_v57, %v12011_v16 }
 0x28c   : > { %v1440_v48 = vand.u32 4294901760, %v1439_v1  ;;  %v1447_v11 = vand.u32 4294901760, %v1446_v52  ;;  %v9908_v44 = vpack.c.bf16 %v9783_v28, %v9778_v21 }
 0x28d   : > { %v9701_v42 = vld [vmem:[#allocation2 + $0xa] sm:$0xff]  ;;  %v1461_v38 = vand.u32 4294901760, %v1460_v41  ;;  %v1474_v63 = vsub.f32 %v9881_v17, %v12010_v33  ;;  %v1468_v39 = vand.u32 4294901760, %v1467_v53  ;;  %v9912_v41 = vpack.c.bf16 %v9804_v31, %v9799_v37  ;;  %v5483_v33 = vld [vmem:[#allocation6 + $0xa] ss:$0 sm:$0xff] }
 0x28e   : > { %v9643_v12 = vld [vmem:[#allocation2] sm:$0xff]  ;;  %v9645_v5 = vld [vmem:[#allocation2 + $0x8] sm:$0xff]  ;;  %v9868_v15 = vpack.c.bf16 %v1447_v11, %v1440_v48  ;;  %v9900_v48 = vpack.c.bf16 %v9717_v55, %v9712_v54  ;;  %v9904_v11 = vpack.c.bf16 %v9759_v4, %v9754_v47  ;;  %v9924_v53 = vpack.c.bf16 %v9864_v62, %v9859_v8 }
 0x28f   : > { %1115 = vrot.lane.b32.xlu0 %v9643_v12, %s8919_s23  ;;  %1117 = vrot.lane.b32.xlu1 %v9645_v5, %s8919_s23  ;;  %v9733_v29 = vld [vmem:[#allocation2 + $0x2] sm:$0xff]  ;;  %v9894_v36 = vpack.c.bf16 %v1461_v38, %v1454_v34  ;;  %v1475_v1 = vand.u32 4294901760, %v1474_v63  ;;  %v9916_v34 = vpack.c.bf16 %v9821_v20, %v9816_v19  ;;  %v9920_v38 = vpack.c.bf16 %v9842_v60, %v9837_v14 }
 0x290   : > { %v9928_v63 = vpack.c.bf16 %v9881_v17, %v9876_v57  ;;  %v1111_v61 = vmul.f32 %v5483_v33, %v9643_v12  ;;  %v1112_v22 = vmul.f32 %v5483_v33, %v9645_v5  ;;  %v1158_v57 = vmul.f32 %v5486_v45, %v9603_v32  ;;  %v5489_v14 = vld [vmem:[#allocation6 + $0x10] ss:$0 sm:$0xff] }
 0x291   : > { %v9896_v52 = vpack.c.bf16 %v1475_v1, %v1468_v39  ;;  %v5484_v1 = vld [vmem:[#allocation6 + $0x9] ss:$0 sm:$0xff] }
 0x293   : > { %1131 = vrot.lane.b32.xlu0 %v9643_v12, %s8918_s21  ;;  %1133 = vrot.lane.b32.xlu1 %v9645_v5, %s8918_s21 }
 0x297   : > { %1161 = vrot.lane.b32.xlu0 %v9608_v50, %s8919_s23  ;;  %1179 = vrot.lane.b32.xlu1 %v9603_v32, %s8918_s21  ;;  %v1204_v32 = vmul.f32 %v5489_v14, %v9701_v42 }
 0x29b   : > { %1177 = vrot.lane.b32.xlu0 %v9608_v50, %s8918_s21  ;;  %1209 = vrot.lane.b32.xlu1 %v9701_v42, %s8919_s23 }
 0x29f   : > { %1207 = vrot.lane.b32.xlu0 %v9733_v29, %s8919_s23  ;;  %1225 = vrot.lane.b32.xlu1 %v9701_v42, %s8918_s21 }
 0x2a3   : > { %1223 = vrot.lane.b32.xlu0 %v9733_v29, %s8918_s21 }
 0x2f8   : > { %v1164_v39 = vpop.permute.xlu1 %1163 }
 0x2f9   : > { %v1174_v12 = vmul.f32 %v5487_v0, %v1164_v39 }
 0x301   : > { %v1116_v16 = vpop.permute.xlu0 %1115  ;;  %v1118_v27 = vpop.permute.xlu1 %1117 }
 0x302   : > { %v1127_v30 = vmul.f32 %v5484_v1, %v1116_v16  ;;  %v1128_v59 = vmul.f32 %v5484_v1, %v1118_v27  ;;  %v1157_v16 = vmul.f32 %v5486_v45, %v9608_v50  ;;  %v5488_v1 = vld [vmem:[#allocation6 + $0xe] ss:$0 sm:$0xff] }
 0x304   : > { %v1129_v51 = vadd.f32 %v1127_v30, %v1111_v61  ;;  %v1130_v3 = vadd.f32 %v1128_v59, %v1112_v22  ;;  %v1203_v59 = vmul.f32 %v5489_v14, %v9733_v29 }
 0x305   : > { %v1132_v24 = vpop.permute.xlu0 %1131  ;;  %v1134_v9 = vpop.permute.xlu1 %1133 }
 0x306   : > { %v1143_v23 = vmul.f32 %v5485_v6, %v1132_v24  ;;  %v1144_v25 = vmul.f32 %v5485_v6, %v1134_v9  ;;  %v5490_v24 = vld [vmem:[#allocation6 + $0xf] ss:$0 sm:$0xff] }
 0x308   : > { %v1145_v17 = vadd.f32 %v1143_v23, %v1129_v51  ;;  %v1146_v62 = vadd.f32 %v1144_v25, %v1130_v3  ;;  %v5491_v25 = vld [vmem:[#allocation6 + $0x11] ss:$0 sm:$0xff] }
 0x309   : > { %v1162_v27 = vpop.permute.xlu0 %1161  ;;  %v1180_v8 = vpop.permute.xlu1 %1179 }
 0x30a   : > { %v1160_v60 = vadd.f32 %v1158_v57, %v1146_v62  ;;  %v1159_v5 = vadd.f32 %v1157_v16, %v1145_v17  ;;  %v1173_v33 = vmul.f32 %v5487_v0, %v1162_v27  ;;  %v1190_v61 = vmul.f32 %v5488_v1, %v1180_v8 }
 0x30c   : > { %v1176_v20 = vadd.f32 %v1174_v12, %v1160_v60  ;;  %v1175_v6 = vadd.f32 %v1173_v33, %v1159_v5 }
 0x30d   : > { %v1178_v22 = vpop.permute.xlu0 %1177  ;;  %v1210_v9 = vpop.permute.xlu1 %1209 }
 0x30e   : > { %v1192_v23 = vadd.f32 %v1190_v61, %v1176_v20  ;;  %v1189_v51 = vmul.f32 %v5488_v1, %v1178_v22  ;;  %v1220_v45 = vmul.f32 %v5490_v24, %v1210_v9 }
 0x310   : > { %v1191_v50 = vadd.f32 %v1189_v51, %v1175_v6  ;;  %v1206_v3 = vadd.f32 %v1204_v32, %v1192_v23  ;;  %v12191_v51 = vld [vmem:[#allocation19_spill] sm:$0xff] }
 0x311   : > { %v1208_v62 = vpop.permute.xlu0 %1207  ;;  %v1226_v30 = vpop.permute.xlu1 %1225  ;;  %v12192_v32 = vand.u32 4294901760, %v12191_v51 }
 0x312   : > { %v1222_v0 = vadd.f32 %v1220_v45, %v1206_v3  ;;  %v1205_v57 = vadd.f32 %v1203_v59, %v1191_v50  ;;  %v1219_v60 = vmul.f32 %v5490_v24, %v1208_v62  ;;  %v1236_v8 = vmul.f32 %v5491_v25, %v1226_v30  ;;  %v10067_v45 = vld [vmem:[#allocation8 + $0x110] sm:$0xff]  ;;  %v10069_v59 = vld [vmem:[#allocation8 + $0x118] sm:$0xff] }
 0x313   : > { %v2122_v30 = vand.u32 4294901760, %v10067_v45 }
 0x314   : > { %v1238_v17 = vadd.f32 %v1236_v8, %v1222_v0  ;;  %v1221_v16 = vadd.f32 %v1219_v60, %v1205_v57  ;;  %v2125_v0 = vand.u32 4294901760, %v10069_v59  ;;  %v10089_v8 = vld [vmem:[#allocation8 + $0x120] sm:$0xff] }
 0x315   : > { %v1224_v39 = vpop.permute.xlu0 %1223 }
 0x316   : > { %v9936_v27 = vand.u32 4294901760, %v1238_v17  ;;  %v1235_v20 = vmul.f32 %v5491_v25, %v1224_v39  ;;  %v10086_v60 = vpack.c.bf16 %v2125_v0, %v2122_v30  ;;  %v2128_v39 = vand.u32 4294901760, %v10089_v8 }
 0x318   : > { %v9939_v42 = vsub.f32 %v1238_v17, %v9936_v27  ;;  %v1237_v1 = vadd.f32 %v1235_v20, %v1221_v16  ;;  %v10091_v17 = vld [vmem:[#allocation8 + $0x128] sm:$0xff]  ;;  %v10103_v20 = vld [vmem:[#allocation8 + $0x130] sm:$0xff] }
 0x319   : > { %v2131_v16 = vand.u32 4294901760, %v10091_v17 }
 0x31a   : > { %v9941_v12 = vand.u32 4294901760, %v1237_v1  ;;  %v1357_v29 = vand.u32 4294901760, %v9939_v42 }
 0x31c   : > { %v1346_v14 = vsub.f32 %v1237_v1, %v9941_v12  ;;  %v1358_v33 = vsub.f32 %v9939_v42, %v1357_v29  ;;  %v2134_v1 = vand.u32 4294901760, %v10103_v20 }
 0x31e   : > { %v1347_v5 = vand.u32 4294901760, %v1346_v14  ;;  %v1359_v24 = vand.u32 4294901760, %v1358_v33  ;;  %v10125_v33 = vld [vmem:[#allocation8 + $0x140] sm:$0xff] }
 0x320   : > { %v1348_v61 = vsub.f32 %v1346_v14, %v1347_v5 }
 0x322   : > { %v1349_v22 = vand.u32 4294901760, %v1348_v61  ;;  %v10127_v61 = vld [vmem:[#allocation8 + $0x148] sm:$0xff] }
 0x324   : > { %6435 = vmatprep.mubr.f32.mxu1 %v1349_v22  ;;  %v2140_v22 = vand.u32 4294901760, %v10125_v33 }
 0x325   : > { %6436 = vmatmul.mubr.f32.vlgmr.msra.gmra.mrb[0].mxu1 %v1359_v24  ;;  %v2143_v24 = vand.u32 4294901760, %v10127_v61 }
 0x326   : > { %7680 = vmatpush3.bf16.msra.mxu1 %v9765_v7  ;;  %6470 = vmatprep.mubr.f32.mxu1 %v9941_v12  ;;  %v12170_v7 = vand.u32 4294901760, %v9712_v54  ;;  %v12174_v54 = vand.u32 4294901760, %v9778_v21  ;;  %v12181_v21 = vld [vmem:[#allocation14_spill] sm:$0xff] }
 0x327   : > { %7682 = vmatprep.subr.bf16.mxu1 %v9788_v49 }
 0x32a   : > { %7684 = vmatpush3.bf16.msra.mxu1 %v9788_v49  ;;  %v12171_v49 = vand.u32 4294901760, %v9717_v55  ;;  %v12175_v55 = vand.u32 4294901760, %v9783_v28  ;;  %v12183_v28 = vld [vmem:[#allocation15_spill] sm:$0xff] }
 0x32b   : > { %7686 = vmatprep.subr.bf16.mxu1 %v9808_v43 }
 0x32e   : > { %7688 = vmatpush3.bf16.msra.mxu1 %v9808_v43  ;;  %v7773_v43 = vpack.c.bf16 %v12171_v49, %v12170_v7  ;;  %v10137_v7 = vpack.c.bf16 %v2143_v24, %v2140_v22  ;;  %v10143_v49 = vld [vmem:[#allocation8 + $0x150] sm:$0xff] }
 0x32f   : > { %7690 = vmatprep.subr.bf16.mxu1 %v9844_v18 }
 0x332   : > { %7692 = vmatpush3.bf16.msra.mxu1 %v9844_v18  ;;  %v12172_v18 = vand.u32 4294901760, %v9754_v47  ;;  %v12177_v47 = vand.u32 4294901760, %v9804_v31  ;;  %v12187_v31 = vld [vmem:[#allocation17_spill] sm:$0xff] }
 0x333   : > { %7694 = vmatprep.subr.bf16.mxu1 %v9848_v2  ;;  %v12188_v9 = vand.u32 4294901760, %v12187_v31 }
 0x336   : > { %7696 = vmatpush3.bf16.msra.mxu1 %v9848_v2  ;;  %v12173_v2 = vand.u32 4294901760, %v9759_v4 }
 0x337   : > { %7698 = vmatprep.subr.bf16.mxu1 %v9868_v15 }
 0x33a   : > { %7700 = vmatpush3.bf16.msra.mxu1 %v9868_v15  ;;  %v7777_v15 = vpack.c.bf16 %v12173_v2, %v12172_v18  ;;  %v2146_v18 = vand.u32 4294901760, %v10143_v49 }
 0x33b   : > { %7702 = vmatprep.subr.bf16.mxu1 %v9894_v36 }
 0x33e   : > { %7704 = vmatpush3.bf16.msra.mxu1 %v9894_v36  ;;  %v7781_v36 = vpack.c.bf16 %v12175_v55, %v12174_v54  ;;  %v10161_v54 = vld [vmem:[#allocation8 + $0x160] sm:$0xff]  ;;  %v10163_v55 = vld [vmem:[#allocation8 + $0x168] sm:$0xff] }
 0x33f   : > { %7706 = vmatprep.subr.bf16.mxu1 %v9896_v52 }
 0x342   : > { %7708 = vmatpush3.bf16.msra.mxu1 %v9896_v52  ;;  %v12176_v52 = vand.u32 4294901760, %v9799_v37  ;;  %v12185_v37 = vld [vmem:[#allocation16_spill] sm:$0xff] }
 0x343   : > { %7710 = vmatprep.subr.bf16.mxu1 %v9900_v48 }
 0x344   : > { %v7785_v4 = vpack.c.bf16 %v12177_v47, %v12176_v52  ;;  %v2155_v52 = vand.u32 4294901760, %v10163_v55 }
 0x345   : > { %6471 = vmatmul.mubr.f32.vlgmr.msra.gmra.mrb[0].mxu1 %v9936_v27 }
 0x346   : > { %7712 = vmatpush3.bf16.msra.mxu1 %v9900_v48  ;;  %6505 = vmatprep.mubr.f32.mxu1 %v1346_v14  ;;  %v12178_v48 = vand.u32 4294901760, %v9816_v19  ;;  %v12189_v19 = vld [vmem:[#allocation18_spill] sm:$0xff] }
 0x347   : > { %7714 = vmatprep.subr.bf16.mxu1 %v9904_v11  ;;  %v12190_v23 = vand.u32 4294901760, %v12189_v19 }
 0x349   : > { %v7801_v25 = vpack.c.bf16 %v12192_v32, %v12190_v23 }
 0x34a   : > { %7716 = vmatpush3.bf16.msra.mxu1 %v9904_v11  ;;  %v12179_v11 = vld [vmem:[#allocation13_spill] sm:$0xff] }
 0x34b   : > { %7718 = vmatprep.subr.bf16.mxu1 %v9908_v44 }
 0x34e   : > { %7720 = vmatpush3.bf16.msra.mxu1 %v9908_v44  ;;  %v12180_v44 = vand.u32 4294901760, %v12179_v11 }
 0x34f   : > { %7722 = vmatprep.subr.bf16.mxu1 %v9912_v41 }
 0x352   : > { %7724 = vmatpush3.bf16.msra.mxu1 %v9912_v41  ;;  %v7789_v41 = vpack.c.bf16 %v12180_v44, %v12178_v48  ;;  %v10191_v44 = vld [vmem:[#allocation8 + $0x170] sm:$0xff] }
 0x353   : > { %7726 = vmatprep.subr.bf16.mxu1 %v9916_v34 }
 0x356   : > { %7728 = vmatpush3.bf16.msra.mxu1 %v9916_v34  ;;  %v12182_v34 = vand.u32 4294901760, %v12181_v21  ;;  %v2158_v21 = vand.u32 4294901760, %v10191_v44 }
 0x357   : > { %7730 = vmatprep.subr.bf16.mxu1 %v9920_v38 }
 0x35a   : > { %7732 = vmatpush3.bf16.msra.mxu1 %v9920_v38  ;;  %v12184_v38 = vand.u32 4294901760, %v12183_v28 }
 0x35b   : > { %7734 = vmatprep.subr.bf16.mxu1 %v9924_v53 }
 0x35e   : > { %7736 = vmatpush3.bf16.msra.mxu1 %v9924_v53  ;;  %v7793_v53 = vpack.c.bf16 %v12184_v38, %v12182_v34 }
 0x35f   : > { %7738 = vmatprep.subr.bf16.mxu1 %v9928_v63 }
 0x362   : > { %7740 = vmatpush3.bf16.msra.mxu1 %v9928_v63  ;;  %v12186_v63 = vand.u32 4294901760, %v12185_v37 }
 0x363   : > { %7742 = vmatprep.subr.bf16.mxu1 %v9597_v56 }
 0x364   : > { %v7797_v6 = vpack.c.bf16 %v12188_v9, %v12186_v63  ;;  %v10222_v9 = vsub.f32 %v10067_v45, %v2122_v30  ;;  %v10267_v30 = vsub.f32 %v10103_v20, %v2134_v1  ;;  %v10284_v20 = vsub.f32 %v10125_v33, %v2140_v22 }
 0x365   : > { %6506 = vmatmul.mubr.f32.vlgmr.msra.gmra.mrb[0].mxu1 %v9939_v42  ;;  %v10105_v42 = vld [vmem:[#allocation8 + $0x138] sm:$0xff] }
 0x366   : > { %7744 = vmatpush3.bf16.msra.mxu1 %v9597_v56  ;;  %6540 = vmatprep.mubr.f32.mxu1 %v1347_v5  ;;  %v12046_v51 = vand.u32 4294901760, %v10222_v9 }
 0x367   : > { %7746 = vmatprep.subr.bf16.mxu1 %v9618_v40 }
 0x36a   : > { %7748 = vmatpush3.bf16.msra.mxu1 %v9618_v40 }
 0x36b   : > { %7750 = vmatprep.subr.bf16.mxu1 %v9633_v46 }
 0x36e   : > { %7752 = vmatpush3.bf16.msra.mxu1 %v9633_v46 }
 0x36f   : > { %7754 = vmatprep.subr.bf16.mxu1 %v9651_v26 }
 0x372   : > { %7756 = vmatpush3.bf16.msra.mxu1 %v9651_v26 }
 0x373   : > { %7758 = vmatprep.subr.bf16.mxu1 %v9669_v58 }
 0x376   : > { %7760 = vmatpush3.bf16.msra.mxu1 %v9669_v58 }
 0x377   : > { %7762 = vmatprep.subr.bf16.mxu1 %v9687_v13 }
 0x37a   : > { %7764 = vmatpush3.bf16.msra.mxu1 %v9687_v13 }
 0x37b   : > { %7766 = vmatprep.subr.bf16.mxu1 %v9707_v35 }
 0x37e   : > { %7768 = vmatpush3.bf16.msra.mxu1 %v9707_v35 }
 0x37f   : > { %7770 = vmatprep.subr.bf16.mxu1 %v9739_v10 }
 0x382   : > { %7772 = vmatpush3.bf16.msra.mxu1 %v9739_v10 }
 0x383   : > { %7774 = vmatprep.subr.bf16.mxu1 %v7773_v43 }
 0x385   : > { %6541 = vmatmul.mubr.f32.vlgmr.msra.gmra.mrb[0].mxu1 %v1357_v29 }
 0x386   : > { %7776 = vmatpush3.bf16.msra.mxu1 %v7773_v43  ;;  %6575 = vmatprep.mubr.f32.mxu1 %v9941_v12  ;;  %v10145_v43 = vld [vmem:[#allocation8 + $0x158] sm:$0xff] }
 0x387   : > { %7778 = vmatprep.subr.bf16.mxu1 %v7777_v15  ;;  %v2149_v2 = vand.u32 4294901760, %v10145_v43 }
 0x38a   : > { %7780 = vmatpush3.bf16.msra.mxu1 %v7777_v15  ;;  %v10155_v15 = vpack.c.bf16 %v2149_v2, %v2146_v18 }
 0x38b   : > { %7782 = vmatprep.subr.bf16.mxu1 %v7781_v36 }
 0x38e   : > { %7784 = vmatpush3.bf16.msra.mxu1 %v7781_v36  ;;  %v2152_v36 = vand.u32 4294901760, %v10161_v54 }
 0x38f   : > { %7786 = vmatprep.subr.bf16.mxu1 %v7785_v4 }
 0x392   : > { %7788 = vmatpush3.bf16.msra.mxu1 %v7785_v4  ;;  %v10175_v4 = vpack.c.bf16 %v2155_v52, %v2152_v36 }
 0x393   : > { %7790 = vmatprep.subr.bf16.mxu1 %v7789_v41 }
 0x396   : > { %7792 = vmatpush3.bf16.msra.mxu1 %v7789_v41  ;;  %v10193_v41 = vld [vmem:[#allocation8 + $0x178] sm:$0xff] }
 0x397   : > { %7794 = vmatprep.subr.bf16.mxu1 %v7793_v53  ;;  %v2161_v34 = vand.u32 4294901760, %v10193_v41 }
 0x399   : > { %v10207_v37 = vpack.c.bf16 %v2161_v34, %v2158_v21 }
 0x39a   : > { %7796 = vmatpush3.bf16.msra.mxu1 %v7793_v53 }
 0x39b   : > { %7798 = vmatprep.subr.bf16.mxu1 %v7797_v6 }
 0x39e   : > { %7800 = vmatpush3.bf16.msra.mxu1 %v7797_v6  ;;  %v10227_v6 = vsub.f32 %v10069_v59, %v2125_v0 }
 0x39f   : > { %7802 = vmatprep.subr.bf16.mxu1 %v7801_v25 }
 0x3a0   : > { %v12045_v32 = vand.u32 4294901760, %v10227_v6 }
 0x3a2   : > { %7804 = vmatpush3.bf16.msra.mxu1 %v7801_v25 }
 0x3a3   : > { %7806 = vmatprep.subr.bf16.mxu1 %v9597_v56 }
 0x3a5   : > { %6576 = vmatmul.mubr.f32.vlgmr.msra.gmra.mrb[0].mxu1 %v9936_v27 }
 0x3a6   : > { %7808 = vmatpush3.bf16.msra.mxu1 %v9597_v56  ;;  %6610 = vmatprep.mubr.f32.mxu1 %v9941_v12  ;;  %v5493_v56 = vld [vmem:[%s11983_s3 + $0x1] ss:$0 sm:$0xff]  ;;  %v2137_v12 = vand.u32 4294901760, %v10105_v42 }
 0x3a7   : > { %7810 = vmatprep.subr.bf16.mxu1 %v9618_v40 }
 0x3a8   : > { %v10119_v5 = vpack.c.bf16 %v2137_v12, %v2134_v1  ;;  %v10272_v0 = vsub.f32 %v10105_v42, %v2137_v12  ;;  %v10289_v42 = vsub.f32 %v10127_v61, %v2143_v24  ;;  %v10305_v61 = vsub.f32 %v10143_v49, %v2146_v18 }
 0x3a9   : > { %v10310_v24 = vsub.f32 %v10145_v43, %v2149_v2  ;;  %v10327_v43 = vsub.f32 %v10161_v54, %v2152_v36  ;;  %v10332_v2 = vsub.f32 %v10163_v55, %v2155_v52  ;;  %v10344_v54 = vsub.f32 %v10191_v44, %v2158_v21 }
 0x3aa   : > { %7812 = vmatpush3.bf16.msra.mxu1 %v9618_v40  ;;  %v10055_v40 = vld [vmem:[#allocation8 + $0x100] sm:$0xff]  ;;  %12193 = vst [vmem:[#allocation13_spill] sm:$0xff] %v10289_v42  ;;  %12194 = vst [vmem:[#allocation14_spill] sm:$0xff] %v10305_v61  ;;  %v10349_v55 = vsub.f32 %v10193_v41, %v2161_v34 }
 0x3ab   : > { %7814 = vmatprep.subr.bf16.mxu1 %v9633_v46  ;;  %12195 = vst [vmem:[#allocation15_spill] sm:$0xff] %v10310_v24  ;;  %12196 = vst [vmem:[#allocation16_spill] sm:$0xff] %v10327_v43 }
 0x3ac   : > { %12197 = vst [vmem:[#allocation17_spill] sm:$0xff] %v10332_v2  ;;  %12198 = vst [vmem:[#allocation18_spill] sm:$0xff] %v10344_v54 }
 0x3ad   : > { %12199 = vst [vmem:[#allocation19_spill] sm:$0xff] %v10349_v55 }
 0x3ae   : > { %7816 = vmatpush3.bf16.msra.mxu1 %v9633_v46  ;;  %v10057_v46 = vld [vmem:[#allocation8 + $0x108] sm:$0xff] }
 0x3af   : > { %7818 = vmatprep.subr.bf16.mxu1 %v9651_v26 }
 0x3b2   : > { %7820 = vmatpush3.bf16.msra.mxu1 %v9651_v26  ;;  %v2116_v26 = vand.u32 4294901760, %v10055_v40 }
 0x3b3   : > { %7822 = vmatprep.subr.bf16.mxu1 %v9669_v58 }
 0x3b4   : > { %v10180_v48 = vsub.f32 %v10055_v40, %v2116_v26  ;;  %v2241_v40 = vsub.f32 %v10227_v6, %v12045_v32 }
 0x3b6   : > { %7824 = vmatpush3.bf16.msra.mxu1 %v9669_v58  ;;  %v2119_v58 = vand.u32 4294901760, %v10057_v46  ;;  %v12048_v28 = vand.u32 4294901760, %v10180_v48 }
 0x3b7   : > { %7826 = vmatprep.subr.bf16.mxu1 %v9687_v13 }
 0x3b8   : > { %v10185_v11 = vsub.f32 %v10057_v46, %v2119_v58  ;;  %v2220_v63 = vsub.f32 %v10180_v48, %v12048_v28  ;;  %v10246_v46 = vsub.f32 %v10089_v8, %v2128_v39  ;;  %v5498_v28 = vld [vmem:[#allocation6 + $0x15] ss:$0 sm:$0xff] }
 0x3ba   : > { %7828 = vmatpush3.bf16.msra.mxu1 %v9687_v13  ;;  %v12047_v38 = vand.u32 4294901760, %v10185_v11  ;;  %v2221_v19 = vand.u32 4294901760, %v2220_v63 }
 0x3bb   : > { %7830 = vmatprep.subr.bf16.mxu1 %v9707_v35 }
 0x3bc   : > { %v2227_v31 = vsub.f32 %v10185_v11, %v12047_v38 }
 0x3be   : > { %7832 = vmatpush3.bf16.msra.mxu1 %v9707_v35  ;;  %v2228_v23 = vand.u32 4294901760, %v2227_v31 }
 0x3bf   : > { %7834 = vmatprep.subr.bf16.mxu1 %v9739_v10 }
 0x3c0   : > { %v10233_v25 = vpack.c.bf16 %v2228_v23, %v2221_v19  ;;  %v12040_v19 = vand.u32 4294901760, %v10284_v20  ;;  %v12039_v23 = vand.u32 4294901760, %v10289_v42 }
 0x3c2   : > { %7836 = vmatpush3.bf16.msra.mxu1 %v9739_v10  ;;  %v10065_v10 = vpack.c.bf16 %v2119_v58, %v2116_v26  ;;  %v10251_v26 = vsub.f32 %v10091_v17, %v2131_v16  ;;  %v2276_v33 = vsub.f32 %v10284_v20, %v12040_v19  ;;  %v2283_v22 = vsub.f32 %v10289_v42, %v12039_v23 }
 0x3c4   : > { %7838 = vmatprep.subr.bf16.mxu0 %v10065_v10 }
 0x3c5   : > { %6611 = vmatmul.mubr.f32.vlgmr.msra.gmra.mrb[0].mxu1 %v9936_v27  ;;  %7840 = vmatpush3.bf16.msra.mxu0 %v10065_v10  ;;  %v10101_v27 = vpack.c.bf16 %v2131_v16, %v2128_v39  ;;  %v12042_v39 = vand.u32 4294901760, %v10267_v30  ;;  %v12041_v16 = vand.u32 4294901760, %v10272_v0 }
 0x3c6   : > { %7842 = vmatprep.subr.bf16.mxu0 %v10086_v60 }
 0x3c7   : > { %v2262_v31 = vsub.f32 %v10267_v30, %v12042_v39  ;;  %v2269_v1 = vsub.f32 %v10272_v0, %v12041_v16  ;;  %v5497_v39 = vld [vmem:[#allocation6 + $0x16] ss:$0 sm:$0xff] }
 0x3c9   : > { %7844 = vmatpush3.bf16.msra.mxu0 %v10086_v60  ;;  %v2263_v12 = vand.u32 4294901760, %v2262_v31 }
 0x3ca   : > { %7846 = vmatprep.subr.bf16.mxu0 %v10101_v27 }
 0x3cd   : > { %7848 = vmatpush3.bf16.msra.mxu0 %v10101_v27 }
 0x3ce   : > { %7850 = vmatprep.subr.bf16.mxu0 %v10119_v5 }
 0x3d1   : > { %7852 = vmatpush3.bf16.msra.mxu0 %v10119_v5 }
 0x3d2   : > { %7854 = vmatprep.subr.bf16.mxu0 %v10137_v7 }
 0x3d5   : > { %7856 = vmatpush3.bf16.msra.mxu0 %v10137_v7 }
 0x3d6   : > { %7858 = vmatprep.subr.bf16.mxu0 %v10155_v15 }
 0x3d9   : > { %7860 = vmatpush3.bf16.msra.mxu0 %v10155_v15 }
 0x3da   : > { %7862 = vmatprep.subr.bf16.mxu0 %v10175_v4 }
 0x3dd   : > { %7864 = vmatpush3.bf16.msra.mxu0 %v10175_v4 }
 0x3de   : > { %7866 = vmatprep.subr.bf16.mxu0 %v10207_v37 }
 0x3e1   : > { %7868 = vmatpush3.bf16.msra.mxu0 %v10207_v37 }
 0x3e2   : > { %7870 = vmatprep.subr.bf16.mxu0 %v10233_v25 }
 0x498   : > { %v6612_v13 = vpop.f32.mrb[0].mxu1 }
 0x499   : > { %v8607_v35 = vadd.f32 %v6612_v13, %v5493_v56  ;;  %v1938_v50 = vpop.f32.mrb[1].mxu1  ;;  %v2242_v13 = vand.u32 4294901760, %v2241_v40 }
 0x49a   : > { %v8608_v3 = vadd.f32 %v5493_v56, %v1938_v50  ;;  %v2234_v56 = vsub.f32 %v10222_v9, %v12046_v51  ;;  %v12043_v50 = vand.u32 4294901760, %v10251_v26 }
 0x49b   : > { %v10071_v62 = vmax.f32 %v8607_v35, 0.0  ;;  %v12044_v35 = vand.u32 4294901760, %v10246_v46 }
 0x49c   : > { %v10076_v57 = vmax.f32 %v8608_v3, 0.0  ;;  %v2235_v58 = vand.u32 4294901760, %v2234_v56  ;;  %v2255_v59 = vsub.f32 %v10251_v26, %v12043_v50  ;;  %v2270_v56 = vand.u32 4294901760, %v2269_v1 }
 0x49d   : > { %1951 = vst [vmem:[#allocation2 + $0x9] sm:$0xff] %v10071_v62  ;;  %2014 = vrot.lane.b32.xlu1 %v10071_v62, %s8919_s23  ;;  %v2248_v45 = vsub.f32 %v10246_v46, %v12044_v35  ;;  %v12036_v1 = vand.u32 4294901760, %v10327_v43 }
 0x49e   : > { %1950 = vst [vmem:[#allocation2 + $0x1] sm:$0xff] %v10076_v57  ;;  %v10256_v3 = vpack.c.bf16 %v2242_v13, %v2235_v58  ;;  %v2256_v17 = vand.u32 4294901760, %v2255_v59  ;;  %v10312_v40 = vpack.c.bf16 %v2270_v56, %v2263_v12  ;;  %v2277_v58 = vand.u32 4294901760, %v2276_v33 }
 0x49f   : > { %v2249_v8 = vand.u32 4294901760, %v2248_v45  ;;  %v2284_v13 = vand.u32 4294901760, %v2283_v22  ;;  %v12038_v45 = vand.u32 4294901760, %v10305_v61  ;;  %v12037_v59 = vand.u32 4294901760, %v10310_v24 }
 0x4a0   : > { %v12035_v12 = vand.u32 4294901760, %v10332_v2  ;;  %v2304_v33 = vsub.f32 %v10327_v43, %v12036_v1  ;;  %v12034_v22 = vand.u32 4294901760, %v10344_v54 }
 0x4a1   : > { %v10276_v63 = vpack.c.bf16 %v2256_v17, %v2249_v8  ;;  %v10316_v8 = vpack.c.bf16 %v2284_v13, %v2277_v58  ;;  %v2290_v49 = vsub.f32 %v10305_v61, %v12038_v45  ;;  %v2297_v18 = vsub.f32 %v10310_v24, %v12037_v59  ;;  %v5496_v45 = vld [vmem:[#allocation6 + $0x14] ss:$0 sm:$0xff] }
 0x4a2   : > { %v2311_v36 = vsub.f32 %v10332_v2, %v12035_v12  ;;  %v2305_v52 = vand.u32 4294901760, %v2304_v33  ;;  %v12033_v58 = vand.u32 4294901760, %v10349_v55  ;;  %v2318_v44 = vsub.f32 %v10344_v54, %v12034_v22 }
 0x4a3   : > { %v2291_v17 = vand.u32 4294901760, %v2290_v49  ;;  %v2298_v31 = vand.u32 4294901760, %v2297_v18  ;;  %v10376_v33 = vpack.c.bf16 %v10251_v26, %v10246_v46 }
 0x4a4   : > { %v10169_v47 = vld [vmem:[#allocation2 + $0xa] sm:$0xff]  ;;  %v2312_v13 = vand.u32 4294901760, %v2311_v36  ;;  %v2325_v21 = vsub.f32 %v10349_v55, %v12033_v58  ;;  %v2319_v34 = vand.u32 4294901760, %v2318_v44  ;;  %v10380_v36 = vpack.c.bf16 %v10272_v0, %v10267_v30 }
 0x4a5   : > { %v10111_v29 = vld [vmem:[#allocation2] sm:$0xff]  ;;  %v10113_v14 = vld [vmem:[#allocation2 + $0x8] sm:$0xff]  ;;  %v10336_v56 = vpack.c.bf16 %v2298_v31, %v2291_v17  ;;  %v10368_v17 = vpack.c.bf16 %v10185_v11, %v10180_v48  ;;  %v10372_v31 = vpack.c.bf16 %v10227_v6, %v10222_v9  ;;  %v10392_v44 = vpack.c.bf16 %v10332_v2, %v10327_v43 }
 0x4a6   : > { %1966 = vrot.lane.b32.xlu0 %v10111_v29, %s8919_s23  ;;  %1968 = vrot.lane.b32.xlu1 %v10113_v14, %s8919_s23  ;;  %v10201_v53 = vld [vmem:[#allocation2 + $0x2] sm:$0xff]  ;;  %v10362_v41 = vpack.c.bf16 %v2312_v13, %v2305_v52  ;;  %v2326_v49 = vand.u32 4294901760, %v2325_v21  ;;  %v10384_v52 = vpack.c.bf16 %v10289_v42, %v10284_v20  ;;  %v10388_v13 = vpack.c.bf16 %v10310_v24, %v10305_v61  ;;  %v5494_v58 = vld [vmem:[#allocation6 + $0x13] ss:$0 sm:$0xff]  ;;  %v5500_v61 = vld [vmem:[#allocation6 + $0x19] ss:$0 sm:$0xff] }
 0x4a7   : > { %v10396_v21 = vpack.c.bf16 %v10349_v55, %v10344_v54  ;;  %v1962_v23 = vmul.f32 %v5494_v58, %v10111_v29  ;;  %v1963_v19 = vmul.f32 %v5494_v58, %v10113_v14  ;;  %v2009_v54 = vmul.f32 %v5497_v39, %v10071_v62 }
 0x4a8   : > { %v10364_v18 = vpack.c.bf16 %v2326_v49, %v2319_v34  ;;  %v5495_v49 = vld [vmem:[#allocation6 + $0x12] ss:$0 sm:$0xff] }
 0x4aa   : > { %1982 = vrot.lane.b32.xlu0 %v10111_v29, %s8918_s21  ;;  %1984 = vrot.lane.b32.xlu1 %v10113_v14, %s8918_s21 }
 0x4ae   : > { %2012 = vrot.lane.b32.xlu0 %v10076_v57, %s8919_s23  ;;  %2030 = vrot.lane.b32.xlu1 %v10071_v62, %s8918_s21  ;;  %v2055_v62 = vmul.f32 %v5500_v61, %v10169_v47 }
 0x4b2   : > { %2028 = vrot.lane.b32.xlu0 %v10076_v57, %s8918_s21  ;;  %2060 = vrot.lane.b32.xlu1 %v10169_v47, %s8919_s23 }
 0x4b6   : > { %2058 = vrot.lane.b32.xlu0 %v10201_v53, %s8919_s23  ;;  %2076 = vrot.lane.b32.xlu1 %v10169_v47, %s8918_s21 }
 0x4ba   : > { %2074 = vrot.lane.b32.xlu0 %v10201_v53, %s8918_s21 }
 0x50f   : > { %v2015_v34 = vpop.permute.xlu1 %2014 }
 0x510   : > { %v2025_v29 = vmul.f32 %v5498_v28, %v2015_v34 }
 0x518   : > { %v1967_v22 = vpop.permute.xlu0 %1966  ;;  %v1969_v12 = vpop.permute.xlu1 %1968 }
 0x519   : > { %v1978_v1 = vmul.f32 %v5495_v49, %v1967_v22  ;;  %v1979_v59 = vmul.f32 %v5495_v49, %v1969_v12  ;;  %v2008_v22 = vmul.f32 %v5497_v39, %v10076_v57  ;;  %v5499_v49 = vld [vmem:[#allocation6 + $0x17] ss:$0 sm:$0xff] }
 0x51b   : > { %v1980_v35 = vadd.f32 %v1978_v1, %v1962_v23  ;;  %v1981_v32 = vadd.f32 %v1979_v59, %v1963_v19  ;;  %v2054_v59 = vmul.f32 %v5500_v61, %v10201_v53 }
 0x51c   : > { %v1983_v16 = vpop.permute.xlu0 %1982  ;;  %v1985_v50 = vpop.permute.xlu1 %1984 }
 0x51d   : > { %v1994_v51 = vmul.f32 %v5496_v45, %v1983_v16  ;;  %v1995_v38 = vmul.f32 %v5496_v45, %v1985_v50  ;;  %v5501_v16 = vld [vmem:[#allocation6 + $0x18] ss:$0 sm:$0xff] }
 0x51f   : > { %v1996_v55 = vadd.f32 %v1994_v51, %v1980_v35  ;;  %v1997_v2 = vadd.f32 %v1995_v38, %v1981_v32  ;;  %v5502_v38 = vld [vmem:[#allocation6 + $0x1a] ss:$0 sm:$0xff] }
 0x520   : > { %v2013_v12 = vpop.permute.xlu0 %2012  ;;  %v2031_v43 = vpop.permute.xlu1 %2030 }
 0x521   : > { %v2011_v24 = vadd.f32 %v2009_v54, %v1997_v2  ;;  %v2010_v14 = vadd.f32 %v2008_v22, %v1996_v55  ;;  %v2024_v58 = vmul.f32 %v5498_v28, %v2013_v12  ;;  %v2041_v23 = vmul.f32 %v5499_v49, %v2031_v43 }
 0x523   : > { %v2027_v42 = vadd.f32 %v2025_v29, %v2011_v24  ;;  %v2026_v45 = vadd.f32 %v2024_v58, %v2010_v14 }
 0x524   : > { %v2029_v19 = vpop.permute.xlu0 %2028  ;;  %v2061_v50 = vpop.permute.xlu1 %2060 }
 0x525   : > { %v2043_v51 = vadd.f32 %v2041_v23, %v2027_v42  ;;  %v2040_v35 = vmul.f32 %v5499_v49, %v2029_v19  ;;  %v2071_v39 = vmul.f32 %v5501_v16, %v2061_v50 }
 0x527   : > { %v2042_v57 = vadd.f32 %v2040_v35, %v2026_v45  ;;  %v2057_v32 = vadd.f32 %v2055_v62, %v2043_v51  ;;  %v12221_v35 = vld [vmem:[#allocation19_spill] sm:$0xff] }
 0x528   : > { %v2059_v2 = vpop.permute.xlu0 %2058  ;;  %v2077_v1 = vpop.permute.xlu1 %2076  ;;  %v12222_v62 = vand.u32 4294901760, %v12221_v35 }
 0x529   : > { %v2073_v28 = vadd.f32 %v2071_v39, %v2057_v32  ;;  %v2056_v54 = vadd.f32 %v2054_v59, %v2042_v57  ;;  %v2070_v24 = vmul.f32 %v5501_v16, %v2059_v2  ;;  %v2087_v43 = vmul.f32 %v5502_v38, %v2077_v1  ;;  %v10535_v39 = vld [vmem:[#allocation8 + $0x190] sm:$0xff]  ;;  %v10537_v59 = vld [vmem:[#allocation8 + $0x198] sm:$0xff] }
 0x52a   : > { %v2973_v1 = vand.u32 4294901760, %v10535_v39 }
 0x52b   : > { %v2089_v55 = vadd.f32 %v2087_v43, %v2073_v28  ;;  %v2072_v22 = vadd.f32 %v2070_v24, %v2056_v54  ;;  %v2976_v28 = vand.u32 4294901760, %v10537_v59  ;;  %v10557_v43 = vld [vmem:[#allocation8 + $0x1a0] sm:$0xff] }
 0x52c   : > { %v2075_v34 = vpop.permute.xlu0 %2074 }
 0x52d   : > { %v10404_v12 = vand.u32 4294901760, %v2089_v55  ;;  %v2086_v42 = vmul.f32 %v5502_v38, %v2075_v34  ;;  %v10554_v24 = vpack.c.bf16 %v2976_v28, %v2973_v1  ;;  %v2979_v34 = vand.u32 4294901760, %v10557_v43 }
 0x52f   : > { %v10407_v47 = vsub.f32 %v2089_v55, %v10404_v12  ;;  %v2088_v49 = vadd.f32 %v2086_v42, %v2072_v22  ;;  %v10559_v55 = vld [vmem:[#allocation8 + $0x1a8] sm:$0xff]  ;;  %v10571_v42 = vld [vmem:[#allocation8 + $0x1b0] sm:$0xff] }
 0x530   : > { %v2982_v22 = vand.u32 4294901760, %v10559_v55 }
 0x531   : > { %v10409_v29 = vand.u32 4294901760, %v2088_v49  ;;  %v2208_v53 = vand.u32 4294901760, %v10407_v47 }
 0x533   : > { %v2197_v61 = vsub.f32 %v2088_v49, %v10409_v29  ;;  %v2209_v58 = vsub.f32 %v10407_v47, %v2208_v53  ;;  %v2985_v49 = vand.u32 4294901760, %v10571_v42 }
 0x535   : > { %v2198_v14 = vand.u32 4294901760, %v2197_v61  ;;  %v2210_v16 = vand.u32 4294901760, %v2209_v58  ;;  %v10593_v58 = vld [vmem:[#allocation8 + $0x1c0] sm:$0xff] }
 0x537   : > { %v2199_v23 = vsub.f32 %v2197_v61, %v2198_v14 }
 0x539   : > { %v2200_v19 = vand.u32 4294901760, %v2199_v23  ;;  %v10595_v23 = vld [vmem:[#allocation8 + $0x1c8] sm:$0xff] }
 0x53b   : > { %6645 = vmatprep.mubr.f32.mxu0 %v2200_v19  ;;  %v2991_v19 = vand.u32 4294901760, %v10593_v58 }
 0x53c   : > { %6646 = vmatmul.mubr.f32.vlgmr.msra.gmra.mrb[2].mxu0 %v2210_v16  ;;  %v2994_v16 = vand.u32 4294901760, %v10595_v23 }
 0x53d   : > { %7872 = vmatpush3.bf16.msra.mxu0 %v10233_v25  ;;  %6680 = vmatprep.mubr.f32.mxu0 %v10409_v29  ;;  %v12200_v25 = vand.u32 4294901760, %v10180_v48  ;;  %v12204_v48 = vand.u32 4294901760, %v10246_v46  ;;  %v12211_v46 = vld [vmem:[#allocation14_spill] sm:$0xff] }
 0x53e   : > { %7874 = vmatprep.subr.bf16.mxu0 %v10256_v3 }
 0x541   : > { %7876 = vmatpush3.bf16.msra.mxu0 %v10256_v3  ;;  %v12201_v3 = vand.u32 4294901760, %v10185_v11  ;;  %v12205_v11 = vand.u32 4294901760, %v10251_v26  ;;  %v12213_v26 = vld [vmem:[#allocation15_spill] sm:$0xff] }
 0x542   : > { %7878 = vmatprep.subr.bf16.mxu0 %v10276_v63 }
 0x545   : > { %7880 = vmatpush3.bf16.msra.mxu0 %v10276_v63  ;;  %v7965_v63 = vpack.c.bf16 %v12201_v3, %v12200_v25  ;;  %v10605_v25 = vpack.c.bf16 %v2994_v16, %v2991_v19  ;;  %v10611_v3 = vld [vmem:[#allocation8 + $0x1d0] sm:$0xff] }
 0x546   : > { %7882 = vmatprep.subr.bf16.mxu0 %v10312_v40 }
 0x549   : > { %7884 = vmatpush3.bf16.msra.mxu0 %v10312_v40  ;;  %v12202_v40 = vand.u32 4294901760, %v10222_v9  ;;  %v12207_v9 = vand.u32 4294901760, %v10272_v0  ;;  %v12217_v0 = vld [vmem:[#allocation17_spill] sm:$0xff] }
 0x54a   : > { %7886 = vmatprep.subr.bf16.mxu0 %v10316_v8  ;;  %v12218_v50 = vand.u32 4294901760, %v12217_v0 }
 0x54d   : > { %7888 = vmatpush3.bf16.msra.mxu0 %v10316_v8  ;;  %v12203_v8 = vand.u32 4294901760, %v10227_v6 }
 0x54e   : > { %7890 = vmatprep.subr.bf16.mxu0 %v10336_v56 }
 0x551   : > { %7892 = vmatpush3.bf16.msra.mxu0 %v10336_v56  ;;  %v7969_v56 = vpack.c.bf16 %v12203_v8, %v12202_v40  ;;  %v2997_v40 = vand.u32 4294901760, %v10611_v3 }
 0x552   : > { %7894 = vmatprep.subr.bf16.mxu0 %v10362_v41 }
 0x555   : > { %7896 = vmatpush3.bf16.msra.mxu0 %v10362_v41  ;;  %v7973_v41 = vpack.c.bf16 %v12205_v11, %v12204_v48  ;;  %v10629_v48 = vld [vmem:[#allocation8 + $0x1e0] sm:$0xff]  ;;  %v10631_v11 = vld [vmem:[#allocation8 + $0x1e8] sm:$0xff] }
 0x556   : > { %7898 = vmatprep.subr.bf16.mxu0 %v10364_v18 }
 0x559   : > { %7900 = vmatpush3.bf16.msra.mxu0 %v10364_v18  ;;  %v12206_v18 = vand.u32 4294901760, %v10267_v30  ;;  %v12215_v30 = vld [vmem:[#allocation16_spill] sm:$0xff] }
 0x55a   : > { %7902 = vmatprep.subr.bf16.mxu0 %v10368_v17 }
 0x55b   : > { %v7977_v6 = vpack.c.bf16 %v12207_v9, %v12206_v18  ;;  %v3006_v18 = vand.u32 4294901760, %v10631_v11 }
 0x55c   : > { %6681 = vmatmul.mubr.f32.vlgmr.msra.gmra.mrb[2].mxu0 %v10404_v12 }
 0x55d   : > { %7904 = vmatpush3.bf16.msra.mxu0 %v10368_v17  ;;  %6715 = vmatprep.mubr.f32.mxu0 %v2197_v61  ;;  %v12208_v17 = vand.u32 4294901760, %v10284_v20  ;;  %v12219_v20 = vld [vmem:[#allocation18_spill] sm:$0xff] }
 0x55e   : > { %7906 = vmatprep.subr.bf16.mxu0 %v10372_v31  ;;  %v12220_v51 = vand.u32 4294901760, %v12219_v20 }
 0x560   : > { %v7993_v38 = vpack.c.bf16 %v12222_v62, %v12220_v51 }
 0x561   : > { %7908 = vmatpush3.bf16.msra.mxu0 %v10372_v31  ;;  %v12209_v31 = vld [vmem:[#allocation13_spill] sm:$0xff] }
 0x562   : > { %7910 = vmatprep.subr.bf16.mxu0 %v10376_v33 }
 0x565   : > { %7912 = vmatpush3.bf16.msra.mxu0 %v10376_v33  ;;  %v12210_v33 = vand.u32 4294901760, %v12209_v31 }
 0x566   : > { %7914 = vmatprep.subr.bf16.mxu0 %v10380_v36 }
 0x569   : > { %7916 = vmatpush3.bf16.msra.mxu0 %v10380_v36  ;;  %v7981_v36 = vpack.c.bf16 %v12210_v33, %v12208_v17  ;;  %v10659_v33 = vld [vmem:[#allocation8 + $0x1f0] sm:$0xff] }
 0x56a   : > { %7918 = vmatprep.subr.bf16.mxu0 %v10384_v52 }
 0x56d   : > { %7920 = vmatpush3.bf16.msra.mxu0 %v10384_v52  ;;  %v12212_v52 = vand.u32 4294901760, %v12211_v46  ;;  %v3009_v46 = vand.u32 4294901760, %v10659_v33 }
 0x56e   : > { %7922 = vmatprep.subr.bf16.mxu0 %v10388_v13 }
 0x571   : > { %7924 = vmatpush3.bf16.msra.mxu0 %v10388_v13  ;;  %v12214_v13 = vand.u32 4294901760, %v12213_v26 }
 0x572   : > { %7926 = vmatprep.subr.bf16.mxu0 %v10392_v44 }
 0x575   : > { %7928 = vmatpush3.bf16.msra.mxu0 %v10392_v44  ;;  %v7985_v44 = vpack.c.bf16 %v12214_v13, %v12212_v52 }
 0x576   : > { %7930 = vmatprep.subr.bf16.mxu0 %v10396_v21 }
 0x579   : > { %7932 = vmatpush3.bf16.msra.mxu0 %v10396_v21  ;;  %v12216_v21 = vand.u32 4294901760, %v12215_v30 }
 0x57a   : > { %7934 = vmatprep.subr.bf16.mxu0 %v10065_v10 }
 0x57b   : > { %v7989_v45 = vpack.c.bf16 %v12218_v50, %v12216_v21  ;;  %v10690_v50 = vsub.f32 %v10535_v39, %v2973_v1  ;;  %v10735_v1 = vsub.f32 %v10571_v42, %v2985_v49  ;;  %v10752_v42 = vsub.f32 %v10593_v58, %v2991_v19 }
 0x57c   : > { %6716 = vmatmul.mubr.f32.vlgmr.msra.gmra.mrb[2].mxu0 %v10407_v47  ;;  %v10573_v47 = vld [vmem:[#allocation8 + $0x1b8] sm:$0xff] }
 0x57d   : > { %7936 = vmatpush3.bf16.msra.mxu0 %v10065_v10  ;;  %6750 = vmatprep.mubr.f32.mxu0 %v2198_v14  ;;  %v12069_v35 = vand.u32 4294901760, %v10690_v50 }
 0x57e   : > { %7938 = vmatprep.subr.bf16.mxu0 %v10086_v60 }
 0x581   : > { %7940 = vmatpush3.bf16.msra.mxu0 %v10086_v60 }
 0x582   : > { %7942 = vmatprep.subr.bf16.mxu0 %v10101_v27 }
 0x585   : > { %7944 = vmatpush3.bf16.msra.mxu0 %v10101_v27 }
 0x586   : > { %7946 = vmatprep.subr.bf16.mxu0 %v10119_v5 }
 0x589   : > { %7948 = vmatpush3.bf16.msra.mxu0 %v10119_v5 }
 0x58a   : > { %7950 = vmatprep.subr.bf16.mxu0 %v10137_v7 }
 0x58d   : > { %7952 = vmatpush3.bf16.msra.mxu0 %v10137_v7 }
 0x58e   : > { %7954 = vmatprep.subr.bf16.mxu0 %v10155_v15 }
 0x591   : > { %7956 = vmatpush3.bf16.msra.mxu0 %v10155_v15 }
 0x592   : > { %7958 = vmatprep.subr.bf16.mxu0 %v10175_v4 }
 0x595   : > { %7960 = vmatpush3.bf16.msra.mxu0 %v10175_v4 }
 0x596   : > { %7962 = vmatprep.subr.bf16.mxu0 %v10207_v37 }
 0x599   : > { %7964 = vmatpush3.bf16.msra.mxu0 %v10207_v37 }
 0x59a   : > { %7966 = vmatprep.subr.bf16.mxu0 %v7965_v63 }
 0x59c   : > { %6751 = vmatmul.mubr.f32.vlgmr.msra.gmra.mrb[2].mxu0 %v2208_v53 }
 0x59d   : > { %7968 = vmatpush3.bf16.msra.mxu0 %v7965_v63  ;;  %6785 = vmatprep.mubr.f32.mxu0 %v10409_v29  ;;  %v10613_v63 = vld [vmem:[#allocation8 + $0x1d8] sm:$0xff] }
 0x59e   : > { %7970 = vmatprep.subr.bf16.mxu0 %v7969_v56  ;;  %v3000_v8 = vand.u32 4294901760, %v10613_v63 }
 0x5a1   : > { %7972 = vmatpush3.bf16.msra.mxu0 %v7969_v56  ;;  %v10623_v56 = vpack.c.bf16 %v3000_v8, %v2997_v40 }
 0x5a2   : > { %7974 = vmatprep.subr.bf16.mxu0 %v7973_v41 }
 0x5a5   : > { %7976 = vmatpush3.bf16.msra.mxu0 %v7973_v41  ;;  %v3003_v41 = vand.u32 4294901760, %v10629_v48 }
 0x5a6   : > { %7978 = vmatprep.subr.bf16.mxu0 %v7977_v6 }
 0x5a9   : > { %7980 = vmatpush3.bf16.msra.mxu0 %v7977_v6  ;;  %v10643_v6 = vpack.c.bf16 %v3006_v18, %v3003_v41 }
 0x5aa   : > { %7982 = vmatprep.subr.bf16.mxu0 %v7981_v36 }
 0x5ad   : > { %7984 = vmatpush3.bf16.msra.mxu0 %v7981_v36  ;;  %v10661_v36 = vld [vmem:[#allocation8 + $0x1f8] sm:$0xff] }
 0x5ae   : > { %7986 = vmatprep.subr.bf16.mxu0 %v7985_v44  ;;  %v3012_v52 = vand.u32 4294901760, %v10661_v36 }
 0x5b0   : > { %v10675_v30 = vpack.c.bf16 %v3012_v52, %v3009_v46 }
 0x5b1   : > { %7988 = vmatpush3.bf16.msra.mxu0 %v7985_v44 }
 0x5b2   : > { %7990 = vmatprep.subr.bf16.mxu0 %v7989_v45 }
 0x5b5   : > { %7992 = vmatpush3.bf16.msra.mxu0 %v7989_v45  ;;  %v10695_v45 = vsub.f32 %v10537_v59, %v2976_v28 }
 0x5b6   : > { %7994 = vmatprep.subr.bf16.mxu0 %v7993_v38 }
 0x5b7   : > { %v12068_v62 = vand.u32 4294901760, %v10695_v45 }
 0x5b9   : > { %7996 = vmatpush3.bf16.msra.mxu0 %v7993_v38 }
 0x5ba   : > { %7998 = vmatprep.subr.bf16.mxu0 %v10065_v10 }
 0x5bc   : > { %6786 = vmatmul.mubr.f32.vlgmr.msra.gmra.mrb[2].mxu0 %v10404_v12 }
 0x5bd   : > { %8000 = vmatpush3.bf16.msra.mxu0 %v10065_v10  ;;  %6820 = vmatprep.mubr.f32.mxu0 %v10409_v29  ;;  %v5504_v10 = vld [vmem:[%s11983_s3 + $0x2] ss:$0 sm:$0xff]  ;;  %v2988_v29 = vand.u32 4294901760, %v10573_v47 }
 0x5be   : > { %8002 = vmatprep.subr.bf16.mxu0 %v10086_v60 }
 0x5bf   : > { %v10587_v14 = vpack.c.bf16 %v2988_v29, %v2985_v49  ;;  %v10740_v28 = vsub.f32 %v10573_v47, %v2988_v29  ;;  %v10757_v47 = vsub.f32 %v10595_v23, %v2994_v16  ;;  %v10773_v23 = vsub.f32 %v10611_v3, %v2997_v40 }
 0x5c0   : > { %v10778_v16 = vsub.f32 %v10613_v63, %v3000_v8  ;;  %v10795_v63 = vsub.f32 %v10629_v48, %v3003_v41  ;;  %v10800_v8 = vsub.f32 %v10631_v11, %v3006_v18  ;;  %v10812_v48 = vsub.f32 %v10659_v33, %v3009_v46 }
 0x5c1   : > { %8004 = vmatpush3.bf16.msra.mxu0 %v10086_v60  ;;  %v10523_v60 = vld [vmem:[#allocation8 + $0x180] sm:$0xff]  ;;  %12223 = vst [vmem:[#allocation13_spill] sm:$0xff] %v10757_v47  ;;  %12224 = vst [vmem:[#allocation14_spill] sm:$0xff] %v10773_v23  ;;  %v10817_v11 = vsub.f32 %v10661_v36, %v3012_v52 }
 0x5c2   : > { %8006 = vmatprep.subr.bf16.mxu0 %v10101_v27  ;;  %12225 = vst [vmem:[#allocation15_spill] sm:$0xff] %v10778_v16  ;;  %12226 = vst [vmem:[#allocation16_spill] sm:$0xff] %v10795_v63 }
 0x5c3   : > { %12227 = vst [vmem:[#allocation17_spill] sm:$0xff] %v10800_v8  ;;  %12228 = vst [vmem:[#allocation18_spill] sm:$0xff] %v10812_v48 }
 0x5c4   : > { %12229 = vst [vmem:[#allocation19_spill] sm:$0xff] %v10817_v11 }
 0x5c5   : > { %8008 = vmatpush3.bf16.msra.mxu0 %v10101_v27  ;;  %v10525_v27 = vld [vmem:[#allocation8 + $0x188] sm:$0xff] }
 0x5c6   : > { %8010 = vmatprep.subr.bf16.mxu0 %v10119_v5 }
 0x5c9   : > { %8012 = vmatpush3.bf16.msra.mxu0 %v10119_v5  ;;  %v2967_v5 = vand.u32 4294901760, %v10523_v60 }
 0x5ca   : > { %8014 = vmatprep.subr.bf16.mxu0 %v10137_v7 }
 0x5cb   : > { %v10648_v17 = vsub.f32 %v10523_v60, %v2967_v5  ;;  %v3092_v60 = vsub.f32 %v10695_v45, %v12068_v62 }
 0x5cd   : > { %8016 = vmatpush3.bf16.msra.mxu0 %v10137_v7  ;;  %v2970_v7 = vand.u32 4294901760, %v10525_v27  ;;  %v12071_v26 = vand.u32 4294901760, %v10648_v17 }
 0x5ce   : > { %8018 = vmatprep.subr.bf16.mxu0 %v10155_v15 }
 0x5cf   : > { %v10653_v31 = vsub.f32 %v10525_v27, %v2970_v7  ;;  %v3071_v21 = vsub.f32 %v10648_v17, %v12071_v26  ;;  %v10714_v27 = vsub.f32 %v10557_v43, %v2979_v34  ;;  %v5509_v26 = vld [vmem:[#allocation6 + $0x1e] ss:$0 sm:$0xff] }
 0x5d1   : > { %8020 = vmatpush3.bf16.msra.mxu0 %v10155_v15  ;;  %v12070_v13 = vand.u32 4294901760, %v10653_v31  ;;  %v3072_v20 = vand.u32 4294901760, %v3071_v21 }
 0x5d2   : > { %8022 = vmatprep.subr.bf16.mxu0 %v10175_v4 }
 0x5d3   : > { %v3078_v0 = vsub.f32 %v10653_v31, %v12070_v13 }
 0x5d5   : > { %8024 = vmatpush3.bf16.msra.mxu0 %v10175_v4  ;;  %v3079_v51 = vand.u32 4294901760, %v3078_v0 }
 0x5d6   : > { %8026 = vmatprep.subr.bf16.mxu0 %v10207_v37 }
 0x5d7   : > { %v10701_v38 = vpack.c.bf16 %v3079_v51, %v3072_v20  ;;  %v12063_v20 = vand.u32 4294901760, %v10752_v42  ;;  %v12062_v51 = vand.u32 4294901760, %v10757_v47 }
 0x5d9   : > { %8028 = vmatpush3.bf16.msra.mxu0 %v10207_v37  ;;  %v10533_v37 = vpack.c.bf16 %v2970_v7, %v2967_v5  ;;  %v10719_v5 = vsub.f32 %v10559_v55, %v2982_v22  ;;  %v3127_v58 = vsub.f32 %v10752_v42, %v12063_v20  ;;  %v3134_v19 = vsub.f32 %v10757_v47, %v12062_v51 }
 0x5db   : > { %8030 = vmatprep.subr.bf16.mxu1 %v10533_v37 }
 0x5dc   : > { %6821 = vmatmul.mubr.f32.vlgmr.msra.gmra.mrb[2].mxu0 %v10404_v12  ;;  %8032 = vmatpush3.bf16.msra.mxu1 %v10533_v37  ;;  %v10569_v12 = vpack.c.bf16 %v2982_v22, %v2979_v34  ;;  %v12065_v34 = vand.u32 4294901760, %v10735_v1  ;;  %v12064_v22 = vand.u32 4294901760, %v10740_v28 }
 0x5dd   : > { %8034 = vmatprep.subr.bf16.mxu1 %v10554_v24 }
 0x5de   : > { %v3113_v0 = vsub.f32 %v10735_v1, %v12065_v34  ;;  %v3120_v49 = vsub.f32 %v10740_v28, %v12064_v22  ;;  %v5508_v34 = vld [vmem:[#allocation6 + $0x1f] ss:$0 sm:$0xff] }
 0x5e0   : > { %8036 = vmatpush3.bf16.msra.mxu1 %v10554_v24  ;;  %v3114_v29 = vand.u32 4294901760, %v3113_v0 }
 0x5e1   : > { %8038 = vmatprep.subr.bf16.mxu1 %v10569_v12 }
 0x5e4   : > { %8040 = vmatpush3.bf16.msra.mxu1 %v10569_v12 }
 0x5e5   : > { %8042 = vmatprep.subr.bf16.mxu1 %v10587_v14 }
 0x5e8   : > { %8044 = vmatpush3.bf16.msra.mxu1 %v10587_v14 }
 0x5e9   : > { %8046 = vmatprep.subr.bf16.mxu1 %v10605_v25 }
 0x5ec   : > { %8048 = vmatpush3.bf16.msra.mxu1 %v10605_v25 }
 0x5ed   : > { %8050 = vmatprep.subr.bf16.mxu1 %v10623_v56 }
 0x5f0   : > { %8052 = vmatpush3.bf16.msra.mxu1 %v10623_v56 }
 0x5f1   : > { %8054 = vmatprep.subr.bf16.mxu1 %v10643_v6 }
 0x5f4   : > { %8056 = vmatpush3.bf16.msra.mxu1 %v10643_v6 }
 0x5f5   : > { %8058 = vmatprep.subr.bf16.mxu1 %v10675_v30 }
 0x5f8   : > { %8060 = vmatpush3.bf16.msra.mxu1 %v10675_v30 }
 0x5f9   : > { %8062 = vmatprep.subr.bf16.mxu1 %v10701_v38 }
 0x6af   : > { %v6822_v15 = vpop.f32.mrb[2].mxu0 }
 0x6b0   : > { %v8609_v4 = vadd.f32 %v6822_v15, %v5504_v10  ;;  %v2789_v57 = vpop.f32.mrb[3].mxu0  ;;  %v3093_v15 = vand.u32 4294901760, %v3092_v60 }
 0x6b1   : > { %v8610_v32 = vadd.f32 %v5504_v10, %v2789_v57  ;;  %v3085_v10 = vsub.f32 %v10690_v50, %v12069_v35  ;;  %v12066_v57 = vand.u32 4294901760, %v10719_v5 }
 0x6b2   : > { %v10539_v2 = vmax.f32 %v8609_v4, 0.0  ;;  %v12067_v4 = vand.u32 4294901760, %v10714_v27 }
 0x6b3   : > { %v10544_v54 = vmax.f32 %v8610_v32, 0.0  ;;  %v3086_v7 = vand.u32 4294901760, %v3085_v10  ;;  %v3106_v59 = vsub.f32 %v10719_v5, %v12066_v57  ;;  %v3121_v10 = vand.u32 4294901760, %v3120_v49 }
 0x6b4   : > { %2802 = vst [vmem:[#allocation2 + $0x9] sm:$0xff] %v10539_v2  ;;  %2865 = vrot.lane.b32.xlu1 %v10539_v2, %s8919_s23  ;;  %v3099_v39 = vsub.f32 %v10714_v27, %v12067_v4  ;;  %v12059_v49 = vand.u32 4294901760, %v10795_v63 }
 0x6b5   : > { %2801 = vst [vmem:[#allocation2 + $0x1] sm:$0xff] %v10544_v54  ;;  %v10724_v32 = vpack.c.bf16 %v3093_v15, %v3086_v7  ;;  %v3107_v55 = vand.u32 4294901760, %v3106_v59  ;;  %v10780_v60 = vpack.c.bf16 %v3121_v10, %v3114_v29  ;;  %v3128_v7 = vand.u32 4294901760, %v3127_v58 }
 0x6b6   : > { %v3100_v43 = vand.u32 4294901760, %v3099_v39  ;;  %v3135_v15 = vand.u32 4294901760, %v3134_v19  ;;  %v12061_v39 = vand.u32 4294901760, %v10773_v23  ;;  %v12060_v59 = vand.u32 4294901760, %v10778_v16 }
 0x6b7   : > { %v12058_v29 = vand.u32 4294901760, %v10800_v8  ;;  %v3155_v58 = vsub.f32 %v10795_v63, %v12059_v49  ;;  %v12057_v19 = vand.u32 4294901760, %v10812_v48 }
 0x6b8   : > { %v10744_v21 = vpack.c.bf16 %v3107_v55, %v3100_v43  ;;  %v10784_v43 = vpack.c.bf16 %v3135_v15, %v3128_v7  ;;  %v3141_v3 = vsub.f32 %v10773_v23, %v12061_v39  ;;  %v3148_v40 = vsub.f32 %v10778_v16, %v12060_v59  ;;  %v5507_v39 = vld [vmem:[#allocation6 + $0x1d] ss:$0 sm:$0xff] }
 0x6b9   : > { %v3162_v41 = vsub.f32 %v10800_v8, %v12058_v29  ;;  %v3156_v18 = vand.u32 4294901760, %v3155_v58  ;;  %v12056_v7 = vand.u32 4294901760, %v10817_v11  ;;  %v3169_v33 = vsub.f32 %v10812_v48, %v12057_v19 }
 0x6ba   : > { %v3142_v55 = vand.u32 4294901760, %v3141_v3  ;;  %v3149_v0 = vand.u32 4294901760, %v3148_v40  ;;  %v10844_v58 = vpack.c.bf16 %v10719_v5, %v10714_v27 }
 0x6bb   : > { %v10637_v9 = vld [vmem:[#allocation2 + $0xa] sm:$0xff]  ;;  %v3163_v15 = vand.u32 4294901760, %v3162_v41  ;;  %v3176_v46 = vsub.f32 %v10817_v11, %v12056_v7  ;;  %v3170_v52 = vand.u32 4294901760, %v3169_v33  ;;  %v10848_v41 = vpack.c.bf16 %v10740_v28, %v10735_v1  ;;  %v5505_v7 = vld [vmem:[#allocation6 + $0x1c] ss:$0 sm:$0xff] }
 0x6bc   : > { %v10579_v53 = vld [vmem:[#allocation2] sm:$0xff]  ;;  %v10581_v61 = vld [vmem:[#allocation2 + $0x8] sm:$0xff]  ;;  %v10804_v10 = vpack.c.bf16 %v3149_v0, %v3142_v55  ;;  %v10836_v55 = vpack.c.bf16 %v10653_v31, %v10648_v17  ;;  %v10840_v0 = vpack.c.bf16 %v10695_v45, %v10690_v50  ;;  %v10860_v33 = vpack.c.bf16 %v10800_v8, %v10795_v63 }
 0x6bd   : > { %2817 = vrot.lane.b32.xlu0 %v10579_v53, %s8919_s23  ;;  %2819 = vrot.lane.b32.xlu1 %v10581_v61, %s8919_s23  ;;  %v10669_v44 = vld [vmem:[#allocation2 + $0x2] sm:$0xff]  ;;  %v10830_v36 = vpack.c.bf16 %v3163_v15, %v3156_v18  ;;  %v3177_v3 = vand.u32 4294901760, %v3176_v46  ;;  %v10852_v18 = vpack.c.bf16 %v10757_v47, %v10752_v42  ;;  %v10856_v15 = vpack.c.bf16 %v10778_v16, %v10773_v23  ;;  %v5511_v23 = vld [vmem:[#allocation6 + $0x22] ss:$0 sm:$0xff] }
 0x6be   : > { %v10864_v46 = vpack.c.bf16 %v10817_v11, %v10812_v48  ;;  %v2813_v51 = vmul.f32 %v5505_v7, %v10579_v53  ;;  %v2814_v20 = vmul.f32 %v5505_v7, %v10581_v61  ;;  %v2860_v48 = vmul.f32 %v5508_v34, %v10539_v2 }
 0x6bf   : > { %v10832_v40 = vpack.c.bf16 %v3177_v3, %v3170_v52  ;;  %v5506_v3 = vld [vmem:[#allocation6 + $0x1b] ss:$0 sm:$0xff] }
 0x6c1   : > { %2833 = vrot.lane.b32.xlu0 %v10579_v53, %s8918_s21  ;;  %2835 = vrot.lane.b32.xlu1 %v10581_v61, %s8918_s21 }
 0x6c5   : > { %2863 = vrot.lane.b32.xlu0 %v10544_v54, %s8919_s23  ;;  %2881 = vrot.lane.b32.xlu1 %v10539_v2, %s8918_s21  ;;  %v2906_v2 = vmul.f32 %v5511_v23, %v10637_v9 }
 0x6c9   : > { %2879 = vrot.lane.b32.xlu0 %v10544_v54, %s8918_s21  ;;  %2911 = vrot.lane.b32.xlu1 %v10637_v9, %s8919_s23 }
 0x6cd   : > { %2909 = vrot.lane.b32.xlu0 %v10669_v44, %s8919_s23  ;;  %2927 = vrot.lane.b32.xlu1 %v10637_v9, %s8918_s21 }
 0x6d1   : > { %2925 = vrot.lane.b32.xlu0 %v10669_v44, %s8918_s21 }
 0x726   : > { %v2866_v52 = vpop.permute.xlu1 %2865 }
 0x727   : > { %v2876_v53 = vmul.f32 %v5509_v26, %v2866_v52 }
 0x72f   : > { %v2818_v19 = vpop.permute.xlu0 %2817  ;;  %v2820_v29 = vpop.permute.xlu1 %2819 }
 0x730   : > { %v2829_v49 = vmul.f32 %v5506_v3, %v2818_v19  ;;  %v2830_v59 = vmul.f32 %v5506_v3, %v2820_v29  ;;  %v2859_v19 = vmul.f32 %v5508_v34, %v10544_v54  ;;  %v5510_v3 = vld [vmem:[#allocation6 + $0x20] ss:$0 sm:$0xff] }
 0x732   : > { %v2831_v4 = vadd.f32 %v2829_v49, %v2813_v51  ;;  %v2832_v62 = vadd.f32 %v2830_v59, %v2814_v20  ;;  %v2905_v59 = vmul.f32 %v5511_v23, %v10669_v44 }
 0x733   : > { %v2834_v22 = vpop.permute.xlu0 %2833  ;;  %v2836_v57 = vpop.permute.xlu1 %2835 }
 0x734   : > { %v2845_v35 = vmul.f32 %v5507_v39, %v2834_v22  ;;  %v2846_v13 = vmul.f32 %v5507_v39, %v2836_v57  ;;  %v5512_v22 = vld [vmem:[#allocation6 + $0x21] ss:$0 sm:$0xff] }
 0x736   : > { %v2847_v11 = vadd.f32 %v2845_v35, %v2831_v4  ;;  %v2848_v8 = vadd.f32 %v2846_v13, %v2832_v62  ;;  %v5513_v13 = vld [vmem:[#allocation6 + $0x23] ss:$0 sm:$0xff] }
 0x737   : > { %v2864_v29 = vpop.permute.xlu0 %2863  ;;  %v2882_v63 = vpop.permute.xlu1 %2881 }
 0x738   : > { %v2862_v16 = vadd.f32 %v2860_v48, %v2848_v8  ;;  %v2861_v61 = vadd.f32 %v2859_v19, %v2847_v11  ;;  %v2875_v7 = vmul.f32 %v5509_v26, %v2864_v29  ;;  %v2892_v51 = vmul.f32 %v5510_v3, %v2882_v63 }
 0x73a   : > { %v2878_v47 = vadd.f32 %v2876_v53, %v2862_v16  ;;  %v2877_v39 = vadd.f32 %v2875_v7, %v2861_v61 }
 0x73b   : > { %v2880_v20 = vpop.permute.xlu0 %2879  ;;  %v2912_v57 = vpop.permute.xlu1 %2911 }
 0x73c   : > { %v2894_v35 = vadd.f32 %v2892_v51, %v2878_v47  ;;  %v2891_v4 = vmul.f32 %v5510_v3, %v2880_v20  ;;  %v2922_v34 = vmul.f32 %v5512_v22, %v2912_v57 }
 0x73e   : > { %v2893_v54 = vadd.f32 %v2891_v4, %v2877_v39  ;;  %v2908_v62 = vadd.f32 %v2906_v2, %v2894_v35  ;;  %v12251_v4 = vld [vmem:[#allocation19_spill] sm:$0xff] }
 0x73f   : > { %v2910_v8 = vpop.permute.xlu0 %2909  ;;  %v2928_v49 = vpop.permute.xlu1 %2927  ;;  %v12252_v2 = vand.u32 4294901760, %v12251_v4 }
 0x740   : > { %v2924_v26 = vadd.f32 %v2922_v34, %v2908_v62  ;;  %v2907_v48 = vadd.f32 %v2905_v59, %v2893_v54  ;;  %v2921_v16 = vmul.f32 %v5512_v22, %v2910_v8  ;;  %v2938_v63 = vmul.f32 %v5513_v13, %v2928_v49  ;;  %v11003_v34 = vld [vmem:[#allocation8 + $0x210] sm:$0xff]  ;;  %v11005_v59 = vld [vmem:[#allocation8 + $0x218] sm:$0xff] }
 0x741   : > { %v3824_v49 = vand.u32 4294901760, %v11003_v34 }
 0x742   : > { %v2940_v11 = vadd.f32 %v2938_v63, %v2924_v26  ;;  %v2923_v19 = vadd.f32 %v2921_v16, %v2907_v48  ;;  %v3827_v26 = vand.u32 4294901760, %v11005_v59  ;;  %v11025_v63 = vld [vmem:[#allocation8 + $0x220] sm:$0xff] }
 0x743   : > { %v2926_v52 = vpop.permute.xlu0 %2925 }
 0x744   : > { %v10872_v29 = vand.u32 4294901760, %v2940_v11  ;;  %v2937_v47 = vmul.f32 %v5513_v13, %v2926_v52  ;;  %v11022_v16 = vpack.c.bf16 %v3827_v26, %v3824_v49  ;;  %v3830_v52 = vand.u32 4294901760, %v11025_v63 }
 0x746   : > { %v10875_v9 = vsub.f32 %v2940_v11, %v10872_v29  ;;  %v2939_v3 = vadd.f32 %v2937_v47, %v2923_v19  ;;  %v11027_v11 = vld [vmem:[#allocation8 + $0x228] sm:$0xff]  ;;  %v11039_v47 = vld [vmem:[#allocation8 + $0x230] sm:$0xff] }
 0x747   : > { %v3833_v19 = vand.u32 4294901760, %v11027_v11 }
 0x748   : > { %v10877_v53 = vand.u32 4294901760, %v2939_v3  ;;  %v3059_v44 = vand.u32 4294901760, %v10875_v9 }
 0x74a   : > { %v3048_v23 = vsub.f32 %v2939_v3, %v10877_v53  ;;  %v3060_v7 = vsub.f32 %v10875_v9, %v3059_v44  ;;  %v3836_v3 = vand.u32 4294901760, %v11039_v47 }
 0x74c   : > { %v3049_v61 = vand.u32 4294901760, %v3048_v23  ;;  %v3061_v22 = vand.u32 4294901760, %v3060_v7  ;;  %v11061_v7 = vld [vmem:[#allocation8 + $0x240] sm:$0xff] }
 0x74e   : > { %v3050_v51 = vsub.f32 %v3048_v23, %v3049_v61 }
 0x750   : > { %v3051_v20 = vand.u32 4294901760, %v3050_v51  ;;  %v11063_v51 = vld [vmem:[#allocation8 + $0x248] sm:$0xff] }
 0x752   : > { %6855 = vmatprep.mubr.f32.mxu1 %v3051_v20  ;;  %v3842_v20 = vand.u32 4294901760, %v11061_v7 }
 0x753   : > { %6856 = vmatmul.mubr.f32.vlgmr.msra.gmra.mrb[2].mxu1 %v3061_v22  ;;  %v3845_v22 = vand.u32 4294901760, %v11063_v51 }
 0x754   : > { %8064 = vmatpush3.bf16.msra.mxu1 %v10701_v38  ;;  %6890 = vmatprep.mubr.f32.mxu1 %v10877_v53  ;;  %v12230_v38 = vand.u32 4294901760, %v10648_v17  ;;  %v12234_v17 = vand.u32 4294901760, %v10714_v27  ;;  %v12241_v27 = vld [vmem:[#allocation14_spill] sm:$0xff] }
 0x755   : > { %8066 = vmatprep.subr.bf16.mxu1 %v10724_v32 }
 0x758   : > { %8068 = vmatpush3.bf16.msra.mxu1 %v10724_v32  ;;  %v12231_v32 = vand.u32 4294901760, %v10653_v31  ;;  %v12235_v31 = vand.u32 4294901760, %v10719_v5  ;;  %v12243_v5 = vld [vmem:[#allocation15_spill] sm:$0xff] }
 0x759   : > { %8070 = vmatprep.subr.bf16.mxu1 %v10744_v21 }
 0x75c   : > { %8072 = vmatpush3.bf16.msra.mxu1 %v10744_v21  ;;  %v8157_v21 = vpack.c.bf16 %v12231_v32, %v12230_v38  ;;  %v11073_v38 = vpack.c.bf16 %v3845_v22, %v3842_v20  ;;  %v11079_v32 = vld [vmem:[#allocation8 + $0x250] sm:$0xff] }
 0x75d   : > { %8074 = vmatprep.subr.bf16.mxu1 %v10780_v60 }
 0x760   : > { %8076 = vmatpush3.bf16.msra.mxu1 %v10780_v60  ;;  %v12232_v60 = vand.u32 4294901760, %v10690_v50  ;;  %v12237_v50 = vand.u32 4294901760, %v10740_v28  ;;  %v12247_v28 = vld [vmem:[#allocation17_spill] sm:$0xff] }
 0x761   : > { %8078 = vmatprep.subr.bf16.mxu1 %v10784_v43  ;;  %v12248_v57 = vand.u32 4294901760, %v12247_v28 }
 0x764   : > { %8080 = vmatpush3.bf16.msra.mxu1 %v10784_v43  ;;  %v12233_v43 = vand.u32 4294901760, %v10695_v45 }
 0x765   : > { %8082 = vmatprep.subr.bf16.mxu1 %v10804_v10 }
 0x768   : > { %8084 = vmatpush3.bf16.msra.mxu1 %v10804_v10  ;;  %v8161_v10 = vpack.c.bf16 %v12233_v43, %v12232_v60  ;;  %v3848_v60 = vand.u32 4294901760, %v11079_v32 }
 0x769   : > { %8086 = vmatprep.subr.bf16.mxu1 %v10830_v36 }
 0x76c   : > { %8088 = vmatpush3.bf16.msra.mxu1 %v10830_v36  ;;  %v8165_v36 = vpack.c.bf16 %v12235_v31, %v12234_v17  ;;  %v11097_v17 = vld [vmem:[#allocation8 + $0x260] sm:$0xff]  ;;  %v11099_v31 = vld [vmem:[#allocation8 + $0x268] sm:$0xff] }
 0x76d   : > { %8090 = vmatprep.subr.bf16.mxu1 %v10832_v40 }
 0x770   : > { %8092 = vmatpush3.bf16.msra.mxu1 %v10832_v40  ;;  %v12236_v40 = vand.u32 4294901760, %v10735_v1  ;;  %v12245_v1 = vld [vmem:[#allocation16_spill] sm:$0xff] }
 0x771   : > { %8094 = vmatprep.subr.bf16.mxu1 %v10836_v55 }
 0x772   : > { %v8169_v45 = vpack.c.bf16 %v12237_v50, %v12236_v40  ;;  %v3857_v40 = vand.u32 4294901760, %v11099_v31 }
 0x773   : > { %6891 = vmatmul.mubr.f32.vlgmr.msra.gmra.mrb[2].mxu1 %v10872_v29 }
 0x774   : > { %8096 = vmatpush3.bf16.msra.mxu1 %v10836_v55  ;;  %6925 = vmatprep.mubr.f32.mxu1 %v3048_v23  ;;  %v12238_v55 = vand.u32 4294901760, %v10752_v42  ;;  %v12249_v42 = vld [vmem:[#allocation18_spill] sm:$0xff] }
 0x775   : > { %8098 = vmatprep.subr.bf16.mxu1 %v10840_v0  ;;  %v12250_v35 = vand.u32 4294901760, %v12249_v42 }
 0x777   : > { %v8185_v13 = vpack.c.bf16 %v12252_v2, %v12250_v35 }
 0x778   : > { %8100 = vmatpush3.bf16.msra.mxu1 %v10840_v0  ;;  %v12239_v0 = vld [vmem:[#allocation13_spill] sm:$0xff] }
 0x779   : > { %8102 = vmatprep.subr.bf16.mxu1 %v10844_v58 }
 0x77c   : > { %8104 = vmatpush3.bf16.msra.mxu1 %v10844_v58  ;;  %v12240_v58 = vand.u32 4294901760, %v12239_v0 }
 0x77d   : > { %8106 = vmatprep.subr.bf16.mxu1 %v10848_v41 }
 0x780   : > { %8108 = vmatpush3.bf16.msra.mxu1 %v10848_v41  ;;  %v8173_v41 = vpack.c.bf16 %v12240_v58, %v12238_v55  ;;  %v11127_v58 = vld [vmem:[#allocation8 + $0x270] sm:$0xff] }
 0x781   : > { %8110 = vmatprep.subr.bf16.mxu1 %v10852_v18 }
 0x784   : > { %8112 = vmatpush3.bf16.msra.mxu1 %v10852_v18  ;;  %v12242_v18 = vand.u32 4294901760, %v12241_v27  ;;  %v3860_v27 = vand.u32 4294901760, %v11127_v58 }
 0x785   : > { %8114 = vmatprep.subr.bf16.mxu1 %v10856_v15 }
 0x788   : > { %8116 = vmatpush3.bf16.msra.mxu1 %v10856_v15  ;;  %v12244_v15 = vand.u32 4294901760, %v12243_v5 }
 0x789   : > { %8118 = vmatprep.subr.bf16.mxu1 %v10860_v33 }
 0x78c   : > { %8120 = vmatpush3.bf16.msra.mxu1 %v10860_v33  ;;  %v8177_v33 = vpack.c.bf16 %v12244_v15, %v12242_v18 }
 0x78d   : > { %8122 = vmatprep.subr.bf16.mxu1 %v10864_v46 }
 0x790   : > { %8124 = vmatpush3.bf16.msra.mxu1 %v10864_v46  ;;  %v12246_v46 = vand.u32 4294901760, %v12245_v1 }
 0x791   : > { %8126 = vmatprep.subr.bf16.mxu1 %v10533_v37 }
 0x792   : > { %v8181_v39 = vpack.c.bf16 %v12248_v57, %v12246_v46  ;;  %v11158_v57 = vsub.f32 %v11003_v34, %v3824_v49  ;;  %v11203_v49 = vsub.f32 %v11039_v47, %v3836_v3  ;;  %v11220_v47 = vsub.f32 %v11061_v7, %v3842_v20 }
 0x793   : > { %6926 = vmatmul.mubr.f32.vlgmr.msra.gmra.mrb[2].mxu1 %v10875_v9  ;;  %v11041_v9 = vld [vmem:[#allocation8 + $0x238] sm:$0xff] }
 0x794   : > { %8128 = vmatpush3.bf16.msra.mxu1 %v10533_v37  ;;  %6960 = vmatprep.mubr.f32.mxu1 %v3049_v61  ;;  %v12092_v4 = vand.u32 4294901760, %v11158_v57 }
 0x795   : > { %8130 = vmatprep.subr.bf16.mxu1 %v10554_v24 }
 0x798   : > { %8132 = vmatpush3.bf16.msra.mxu1 %v10554_v24 }
 0x799   : > { %8134 = vmatprep.subr.bf16.mxu1 %v10569_v12 }
 0x79c   : > { %8136 = vmatpush3.bf16.msra.mxu1 %v10569_v12 }
 0x79d   : > { %8138 = vmatprep.subr.bf16.mxu1 %v10587_v14 }
 0x7a0   : > { %8140 = vmatpush3.bf16.msra.mxu1 %v10587_v14 }
 0x7a1   : > { %8142 = vmatprep.subr.bf16.mxu1 %v10605_v25 }
 0x7a4   : > { %8144 = vmatpush3.bf16.msra.mxu1 %v10605_v25 }
 0x7a5   : > { %8146 = vmatprep.subr.bf16.mxu1 %v10623_v56 }
 0x7a8   : > { %8148 = vmatpush3.bf16.msra.mxu1 %v10623_v56 }
 0x7a9   : > { %8150 = vmatprep.subr.bf16.mxu1 %v10643_v6 }
 0x7ac   : > { %8152 = vmatpush3.bf16.msra.mxu1 %v10643_v6 }
 0x7ad   : > { %8154 = vmatprep.subr.bf16.mxu1 %v10675_v30 }
 0x7b0   : > { %8156 = vmatpush3.bf16.msra.mxu1 %v10675_v30 }
 0x7b1   : > { %8158 = vmatprep.subr.bf16.mxu1 %v8157_v21 }
 0x7b3   : > { %6961 = vmatmul.mubr.f32.vlgmr.msra.gmra.mrb[2].mxu1 %v3059_v44 }
 0x7b4   : > { %8160 = vmatpush3.bf16.msra.mxu1 %v8157_v21  ;;  %6995 = vmatprep.mubr.f32.mxu1 %v10877_v53  ;;  %v11081_v21 = vld [vmem:[#allocation8 + $0x258] sm:$0xff] }
 0x7b5   : > { %8162 = vmatprep.subr.bf16.mxu1 %v8161_v10  ;;  %v3851_v43 = vand.u32 4294901760, %v11081_v21 }
 0x7b8   : > { %8164 = vmatpush3.bf16.msra.mxu1 %v8161_v10  ;;  %v11091_v10 = vpack.c.bf16 %v3851_v43, %v3848_v60 }
 0x7b9   : > { %8166 = vmatprep.subr.bf16.mxu1 %v8165_v36 }
 0x7bc   : > { %8168 = vmatpush3.bf16.msra.mxu1 %v8165_v36  ;;  %v3854_v36 = vand.u32 4294901760, %v11097_v17 }
 0x7bd   : > { %8170 = vmatprep.subr.bf16.mxu1 %v8169_v45 }
 0x7c0   : > { %8172 = vmatpush3.bf16.msra.mxu1 %v8169_v45  ;;  %v11111_v45 = vpack.c.bf16 %v3857_v40, %v3854_v36 }
 0x7c1   : > { %8174 = vmatprep.subr.bf16.mxu1 %v8173_v41 }
 0x7c4   : > { %8176 = vmatpush3.bf16.msra.mxu1 %v8173_v41  ;;  %v11129_v41 = vld [vmem:[#allocation8 + $0x278] sm:$0xff] }
 0x7c5   : > { %8178 = vmatprep.subr.bf16.mxu1 %v8177_v33  ;;  %v3863_v18 = vand.u32 4294901760, %v11129_v41 }
 0x7c7   : > { %v11143_v1 = vpack.c.bf16 %v3863_v18, %v3860_v27 }
 0x7c8   : > { %8180 = vmatpush3.bf16.msra.mxu1 %v8177_v33 }
 0x7c9   : > { %8182 = vmatprep.subr.bf16.mxu1 %v8181_v39 }
 0x7cc   : > { %8184 = vmatpush3.bf16.msra.mxu1 %v8181_v39  ;;  %v11163_v39 = vsub.f32 %v11005_v59, %v3827_v26 }
 0x7cd   : > { %8186 = vmatprep.subr.bf16.mxu1 %v8185_v13 }
 0x7ce   : > { %v12091_v2 = vand.u32 4294901760, %v11163_v39 }
 0x7d0   : > { %8188 = vmatpush3.bf16.msra.mxu1 %v8185_v13 }
 0x7d1   : > { %8190 = vmatprep.subr.bf16.mxu1 %v10533_v37 }
 0x7d3   : > { %6996 = vmatmul.mubr.f32.vlgmr.msra.gmra.mrb[2].mxu1 %v10872_v29 }
 0x7d4   : > { %8192 = vmatpush3.bf16.msra.mxu1 %v10533_v37  ;;  %7030 = vmatprep.mubr.f32.mxu1 %v10877_v53  ;;  %v5515_v37 = vld [vmem:[%s11983_s3 + $0x3] ss:$0 sm:$0xff]  ;;  %v3839_v53 = vand.u32 4294901760, %v11041_v9 }
 0x7d5   : > { %8194 = vmatprep.subr.bf16.mxu1 %v10554_v24 }
 0x7d6   : > { %v11055_v61 = vpack.c.bf16 %v3839_v53, %v3836_v3  ;;  %v11208_v26 = vsub.f32 %v11041_v9, %v3839_v53  ;;  %v11225_v9 = vsub.f32 %v11063_v51, %v3845_v22  ;;  %v11241_v51 = vsub.f32 %v11079_v32, %v3848_v60 }
 0x7d7   : > { %v11246_v22 = vsub.f32 %v11081_v21, %v3851_v43  ;;  %v11263_v21 = vsub.f32 %v11097_v17, %v3854_v36  ;;  %v11268_v43 = vsub.f32 %v11099_v31, %v3857_v40  ;;  %v11280_v17 = vsub.f32 %v11127_v58, %v3860_v27 }
 0x7d8   : > { %8196 = vmatpush3.bf16.msra.mxu1 %v10554_v24  ;;  %v10991_v24 = vld [vmem:[#allocation8 + $0x200] sm:$0xff]  ;;  %12253 = vst [vmem:[#allocation13_spill] sm:$0xff] %v11225_v9  ;;  %12254 = vst [vmem:[#allocation14_spill] sm:$0xff] %v11241_v51  ;;  %v11285_v31 = vsub.f32 %v11129_v41, %v3863_v18 }
 0x7d9   : > { %8198 = vmatprep.subr.bf16.mxu1 %v10569_v12  ;;  %12255 = vst [vmem:[#allocation15_spill] sm:$0xff] %v11246_v22  ;;  %12256 = vst [vmem:[#allocation16_spill] sm:$0xff] %v11263_v21 }
 0x7da   : > { %12257 = vst [vmem:[#allocation17_spill] sm:$0xff] %v11268_v43  ;;  %12258 = vst [vmem:[#allocation18_spill] sm:$0xff] %v11280_v17 }
 0x7db   : > { %12259 = vst [vmem:[#allocation19_spill] sm:$0xff] %v11285_v31 }
 0x7dc   : > { %8200 = vmatpush3.bf16.msra.mxu1 %v10569_v12  ;;  %v10993_v12 = vld [vmem:[#allocation8 + $0x208] sm:$0xff] }
 0x7dd   : > { %8202 = vmatprep.subr.bf16.mxu1 %v10587_v14 }
 0x7e0   : > { %8204 = vmatpush3.bf16.msra.mxu1 %v10587_v14  ;;  %v3818_v14 = vand.u32 4294901760, %v10991_v24 }
 0x7e1   : > { %8206 = vmatprep.subr.bf16.mxu1 %v10605_v25 }
 0x7e2   : > { %v11116_v55 = vsub.f32 %v10991_v24, %v3818_v14  ;;  %v3943_v24 = vsub.f32 %v11163_v39, %v12091_v2 }
 0x7e4   : > { %8208 = vmatpush3.bf16.msra.mxu1 %v10605_v25  ;;  %v3821_v25 = vand.u32 4294901760, %v10993_v12  ;;  %v12094_v5 = vand.u32 4294901760, %v11116_v55 }
 0x7e5   : > { %8210 = vmatprep.subr.bf16.mxu1 %v10623_v56 }
 0x7e6   : > { %v11121_v0 = vsub.f32 %v10993_v12, %v3821_v25  ;;  %v3922_v46 = vsub.f32 %v11116_v55, %v12094_v5  ;;  %v11182_v12 = vsub.f32 %v11025_v63, %v3830_v52  ;;  %v5520_v5 = vld [vmem:[#allocation6 + $0x27] ss:$0 sm:$0xff] }
 0x7e8   : > { %8212 = vmatpush3.bf16.msra.mxu1 %v10623_v56  ;;  %v12093_v15 = vand.u32 4294901760, %v11121_v0  ;;  %v3923_v42 = vand.u32 4294901760, %v3922_v46 }
 0x7e9   : > { %8214 = vmatprep.subr.bf16.mxu1 %v10643_v6 }
 0x7ea   : > { %v3929_v28 = vsub.f32 %v11121_v0, %v12093_v15 }
 0x7ec   : > { %8216 = vmatpush3.bf16.msra.mxu1 %v10643_v6  ;;  %v3930_v35 = vand.u32 4294901760, %v3929_v28 }
 0x7ed   : > { %8218 = vmatprep.subr.bf16.mxu1 %v10675_v30 }
 0x7ee   : > { %v11169_v13 = vpack.c.bf16 %v3930_v35, %v3923_v42  ;;  %v12086_v42 = vand.u32 4294901760, %v11220_v47  ;;  %v12085_v35 = vand.u32 4294901760, %v11225_v9 }
 0x7f0   : > { %8220 = vmatpush3.bf16.msra.mxu1 %v10675_v30  ;;  %v11001_v30 = vpack.c.bf16 %v3821_v25, %v3818_v14  ;;  %v11187_v14 = vsub.f32 %v11027_v11, %v3833_v19  ;;  %v3978_v7 = vsub.f32 %v11220_v47, %v12086_v42  ;;  %v3985_v20 = vsub.f32 %v11225_v9, %v12085_v35 }
 0x7f2   : > { %8222 = vmatprep.subr.bf16.mxu0 %v11001_v30 }
 0x7f3   : > { %7031 = vmatmul.mubr.f32.vlgmr.msra.gmra.mrb[2].mxu1 %v10872_v29  ;;  %8224 = vmatpush3.bf16.msra.mxu0 %v11001_v30  ;;  %v11037_v29 = vpack.c.bf16 %v3833_v19, %v3830_v52  ;;  %v12088_v52 = vand.u32 4294901760, %v11203_v49  ;;  %v12087_v19 = vand.u32 4294901760, %v11208_v26 }
 0x7f4   : > { %8226 = vmatprep.subr.bf16.mxu0 %v11022_v16 }
 0x7f5   : > { %v3964_v28 = vsub.f32 %v11203_v49, %v12088_v52  ;;  %v3971_v3 = vsub.f32 %v11208_v26, %v12087_v19  ;;  %v5519_v52 = vld [vmem:[#allocation6 + $0x28] ss:$0 sm:$0xff] }
 0x7f7   : > { %8228 = vmatpush3.bf16.msra.mxu0 %v11022_v16  ;;  %v3965_v53 = vand.u32 4294901760, %v3964_v28 }
 0x7f8   : > { %8230 = vmatprep.subr.bf16.mxu0 %v11037_v29 }
 0x7fb   : > { %8232 = vmatpush3.bf16.msra.mxu0 %v11037_v29 }
 0x7fc   : > { %8234 = vmatprep.subr.bf16.mxu0 %v11055_v61 }
 0x7ff   : > { %8236 = vmatpush3.bf16.msra.mxu0 %v11055_v61 }
 0x800   : > { %8238 = vmatprep.subr.bf16.mxu0 %v11073_v38 }
 0x803   : > { %8240 = vmatpush3.bf16.msra.mxu0 %v11073_v38 }
 0x804   : > { %8242 = vmatprep.subr.bf16.mxu0 %v11091_v10 }
 0x807   : > { %8244 = vmatpush3.bf16.msra.mxu0 %v11091_v10 }
 0x808   : > { %8246 = vmatprep.subr.bf16.mxu0 %v11111_v45 }
 0x80b   : > { %8248 = vmatpush3.bf16.msra.mxu0 %v11111_v45 }
 0x80c   : > { %8250 = vmatprep.subr.bf16.mxu0 %v11143_v1 }
 0x80f   : > { %8252 = vmatpush3.bf16.msra.mxu0 %v11143_v1 }
 0x810   : > { %8254 = vmatprep.subr.bf16.mxu0 %v11169_v13 }
 0x8c6   : > { %v7032_v56 = vpop.f32.mrb[2].mxu1 }
 0x8c7   : > { %v8611_v6 = vadd.f32 %v7032_v56, %v5515_v37  ;;  %v3640_v54 = vpop.f32.mrb[3].mxu1  ;;  %v3944_v56 = vand.u32 4294901760, %v3943_v24 }
 0x8c8   : > { %v8612_v62 = vadd.f32 %v5515_v37, %v3640_v54  ;;  %v3936_v37 = vsub.f32 %v11158_v57, %v12092_v4  ;;  %v12089_v54 = vand.u32 4294901760, %v11187_v14 }
 0x8c9   : > { %v11007_v8 = vmax.f32 %v8611_v6, 0.0  ;;  %v12090_v6 = vand.u32 4294901760, %v11182_v12 }
 0x8ca   : > { %v11012_v48 = vmax.f32 %v8612_v62, 0.0  ;;  %v3937_v25 = vand.u32 4294901760, %v3936_v37  ;;  %v3957_v59 = vsub.f32 %v11187_v14, %v12089_v54  ;;  %v3972_v37 = vand.u32 4294901760, %v3971_v3 }
 0x8cb   : > { %3653 = vst [vmem:[#allocation2 + $0x9] sm:$0xff] %v11007_v8  ;;  %3716 = vrot.lane.b32.xlu1 %v11007_v8, %s8919_s23  ;;  %v3950_v34 = vsub.f32 %v11182_v12, %v12090_v6  ;;  %v12082_v3 = vand.u32 4294901760, %v11263_v21 }
 0x8cc   : > { %3652 = vst [vmem:[#allocation2 + $0x1] sm:$0xff] %v11012_v48  ;;  %v11192_v62 = vpack.c.bf16 %v3944_v56, %v3937_v25  ;;  %v3958_v11 = vand.u32 4294901760, %v3957_v59  ;;  %v11248_v24 = vpack.c.bf16 %v3972_v37, %v3965_v53  ;;  %v3979_v25 = vand.u32 4294901760, %v3978_v7 }
 0x8cd   : > { %v3951_v63 = vand.u32 4294901760, %v3950_v34  ;;  %v3986_v56 = vand.u32 4294901760, %v3985_v20  ;;  %v12084_v34 = vand.u32 4294901760, %v11241_v51  ;;  %v12083_v59 = vand.u32 4294901760, %v11246_v22 }
 0x8ce   : > { %v12081_v53 = vand.u32 4294901760, %v11268_v43  ;;  %v4006_v7 = vsub.f32 %v11263_v21, %v12082_v3  ;;  %v12080_v20 = vand.u32 4294901760, %v11280_v17 }
 0x8cf   : > { %v11212_v46 = vpack.c.bf16 %v3958_v11, %v3951_v63  ;;  %v11252_v63 = vpack.c.bf16 %v3986_v56, %v3979_v25  ;;  %v3992_v32 = vsub.f32 %v11241_v51, %v12084_v34  ;;  %v3999_v60 = vsub.f32 %v11246_v22, %v12083_v59  ;;  %v5518_v34 = vld [vmem:[#allocation6 + $0x26] ss:$0 sm:$0xff] }
 0x8d0   : > { %v4013_v36 = vsub.f32 %v11268_v43, %v12081_v53  ;;  %v4007_v40 = vand.u32 4294901760, %v4006_v7  ;;  %v12079_v25 = vand.u32 4294901760, %v11285_v31  ;;  %v4020_v58 = vsub.f32 %v11280_v17, %v12080_v20 }
 0x8d1   : > { %v3993_v11 = vand.u32 4294901760, %v3992_v32  ;;  %v4000_v28 = vand.u32 4294901760, %v3999_v60  ;;  %v11312_v7 = vpack.c.bf16 %v11187_v14, %v11182_v12 }
 0x8d2   : > { %v11105_v50 = vld [vmem:[#allocation2 + $0xa] sm:$0xff]  ;;  %v4014_v56 = vand.u32 4294901760, %v4013_v36  ;;  %v4027_v27 = vsub.f32 %v11285_v31, %v12079_v25  ;;  %v4021_v18 = vand.u32 4294901760, %v4020_v58  ;;  %v11316_v36 = vpack.c.bf16 %v11208_v26, %v11203_v49  ;;  %v5516_v25 = vld [vmem:[#allocation6 + $0x25] ss:$0 sm:$0xff] }
 0x8d3   : > { %v11047_v44 = vld [vmem:[#allocation2] sm:$0xff]  ;;  %v11049_v23 = vld [vmem:[#allocation2 + $0x8] sm:$0xff]  ;;  %v11272_v37 = vpack.c.bf16 %v4000_v28, %v3993_v11  ;;  %v11304_v11 = vpack.c.bf16 %v11121_v0, %v11116_v55  ;;  %v11308_v28 = vpack.c.bf16 %v11163_v39, %v11158_v57  ;;  %v11328_v58 = vpack.c.bf16 %v11268_v43, %v11263_v21 }
 0x8d4   : > { %3668 = vrot.lane.b32.xlu0 %v11047_v44, %s8919_s23  ;;  %3670 = vrot.lane.b32.xlu1 %v11049_v23, %s8919_s23  ;;  %v11137_v33 = vld [vmem:[#allocation2 + $0x2] sm:$0xff]  ;;  %v11298_v41 = vpack.c.bf16 %v4014_v56, %v4007_v40  ;;  %v4028_v32 = vand.u32 4294901760, %v4027_v27  ;;  %v11320_v40 = vpack.c.bf16 %v11225_v9, %v11220_v47  ;;  %v11324_v56 = vpack.c.bf16 %v11246_v22, %v11241_v51 }
 0x8d5   : > { %v11332_v27 = vpack.c.bf16 %v11285_v31, %v11280_v17  ;;  %v3664_v35 = vmul.f32 %v5516_v25, %v11047_v44  ;;  %v3665_v42 = vmul.f32 %v5516_v25, %v11049_v23  ;;  %v3711_v17 = vmul.f32 %v5519_v52, %v11007_v8  ;;  %v5522_v51 = vld [vmem:[#allocation6 + $0x2b] ss:$0 sm:$0xff] }
 0x8d6   : > { %v11300_v60 = vpack.c.bf16 %v4028_v32, %v4021_v18  ;;  %v5517_v32 = vld [vmem:[#allocation6 + $0x24] ss:$0 sm:$0xff] }
 0x8d8   : > { %3684 = vrot.lane.b32.xlu0 %v11047_v44, %s8918_s21  ;;  %3686 = vrot.lane.b32.xlu1 %v11049_v23, %s8918_s21 }
 0x8dc   : > { %3714 = vrot.lane.b32.xlu0 %v11012_v48, %s8919_s23  ;;  %3732 = vrot.lane.b32.xlu1 %v11007_v8, %s8918_s21  ;;  %v3757_v8 = vmul.f32 %v5522_v51, %v11105_v50 }
 0x8e0   : > { %3730 = vrot.lane.b32.xlu0 %v11012_v48, %s8918_s21  ;;  %3762 = vrot.lane.b32.xlu1 %v11105_v50, %s8919_s23 }
 0x8e4   : > { %3760 = vrot.lane.b32.xlu0 %v11137_v33, %s8919_s23  ;;  %3778 = vrot.lane.b32.xlu1 %v11105_v50, %s8918_s21 }
 0x8e8   : > { %3776 = vrot.lane.b32.xlu0 %v11137_v33, %s8918_s21 }
 0x93d   : > { %v3717_v18 = vpop.permute.xlu1 %3716 }
 0x93e   : > { %v3727_v44 = vmul.f32 %v5520_v5, %v3717_v18 }
 0x946   : > { %v3669_v20 = vpop.permute.xlu0 %3668  ;;  %v3671_v53 = vpop.permute.xlu1 %3670 }
 0x947   : > { %v3680_v3 = vmul.f32 %v5517_v32, %v3669_v20  ;;  %v3681_v59 = vmul.f32 %v5517_v32, %v3671_v53  ;;  %v3710_v20 = vmul.f32 %v5519_v52, %v11012_v48  ;;  %v5521_v32 = vld [vmem:[#allocation6 + $0x29] ss:$0 sm:$0xff] }
 0x949   : > { %v3682_v6 = vadd.f32 %v3680_v3, %v3664_v35  ;;  %v3683_v2 = vadd.f32 %v3681_v59, %v3665_v42  ;;  %v3756_v59 = vmul.f32 %v5522_v51, %v11137_v33 }
 0x94a   : > { %v3685_v19 = vpop.permute.xlu0 %3684  ;;  %v3687_v54 = vpop.permute.xlu1 %3686 }
 0x94b   : > { %v3696_v4 = vmul.f32 %v5518_v34, %v3685_v19  ;;  %v3697_v15 = vmul.f32 %v5518_v34, %v3687_v54  ;;  %v5523_v19 = vld [vmem:[#allocation6 + $0x2a] ss:$0 sm:$0xff] }
 0x94d   : > { %v3698_v31 = vadd.f32 %v3696_v4, %v3682_v6  ;;  %v3699_v43 = vadd.f32 %v3697_v15, %v3683_v2  ;;  %v5524_v15 = vld [vmem:[#allocation6 + $0x2c] ss:$0 sm:$0xff] }
 0x94e   : > { %v3715_v53 = vpop.permute.xlu0 %3714  ;;  %v3733_v21 = vpop.permute.xlu1 %3732 }
 0x94f   : > { %v3713_v22 = vadd.f32 %v3711_v17, %v3699_v43  ;;  %v3712_v23 = vadd.f32 %v3710_v20, %v3698_v31  ;;  %v3726_v25 = vmul.f32 %v5520_v5, %v3715_v53  ;;  %v3743_v35 = vmul.f32 %v5521_v32, %v3733_v21 }
 0x951   : > { %v3729_v9 = vadd.f32 %v3727_v44, %v3713_v22  ;;  %v3728_v34 = vadd.f32 %v3726_v25, %v3712_v23 }
 0x952   : > { %v3731_v42 = vpop.permute.xlu0 %3730  ;;  %v3763_v54 = vpop.permute.xlu1 %3762 }
 0x953   : > { %v3745_v4 = vadd.f32 %v3743_v35, %v3729_v9  ;;  %v3742_v6 = vmul.f32 %v5521_v32, %v3731_v42  ;;  %v3773_v52 = vmul.f32 %v5523_v19, %v3763_v54 }
 0x955   : > { %v3744_v48 = vadd.f32 %v3742_v6, %v3728_v34  ;;  %v3759_v2 = vadd.f32 %v3757_v8, %v3745_v4  ;;  %v12281_v6 = vld [vmem:[#allocation19_spill] sm:$0xff] }
 0x956   : > { %v3761_v43 = vpop.permute.xlu0 %3760  ;;  %v3779_v3 = vpop.permute.xlu1 %3778  ;;  %v12282_v8 = vand.u32 4294901760, %v12281_v6 }
 0x957   : > { %v3775_v5 = vadd.f32 %v3773_v52, %v3759_v2  ;;  %v3758_v17 = vadd.f32 %v3756_v59, %v3744_v48  ;;  %v3772_v22 = vmul.f32 %v5523_v19, %v3761_v43  ;;  %v3789_v21 = vmul.f32 %v5524_v15, %v3779_v3  ;;  %v11471_v52 = vld [vmem:[#allocation8 + $0x290] sm:$0xff]  ;;  %v11473_v59 = vld [vmem:[#allocation8 + $0x298] sm:$0xff] }
 0x958   : > { %v4675_v3 = vand.u32 4294901760, %v11471_v52 }
 0x959   : > { %v3791_v31 = vadd.f32 %v3789_v21, %v3775_v5  ;;  %v3774_v20 = vadd.f32 %v3772_v22, %v3758_v17  ;;  %v4678_v5 = vand.u32 4294901760, %v11473_v59  ;;  %v11493_v21 = vld [vmem:[#allocation8 + $0x2a0] sm:$0xff] }
 0x95a   : > { %v3777_v18 = vpop.permute.xlu0 %3776 }
 0x95b   : > { %v11340_v53 = vand.u32 4294901760, %v3791_v31  ;;  %v3788_v9 = vmul.f32 %v5524_v15, %v3777_v18  ;;  %v11490_v22 = vpack.c.bf16 %v4678_v5, %v4675_v3  ;;  %v4681_v18 = vand.u32 4294901760, %v11493_v21 }
 0x95d   : > { %v11343_v50 = vsub.f32 %v3791_v31, %v11340_v53  ;;  %v3790_v32 = vadd.f32 %v3788_v9, %v3774_v20  ;;  %v11495_v31 = vld [vmem:[#allocation8 + $0x2a8] sm:$0xff]  ;;  %v11507_v9 = vld [vmem:[#allocation8 + $0x2b0] sm:$0xff] }
 0x95e   : > { %v4684_v20 = vand.u32 4294901760, %v11495_v31 }
 0x95f   : > { %v11345_v44 = vand.u32 4294901760, %v3790_v32  ;;  %v3910_v33 = vand.u32 4294901760, %v11343_v50 }
 0x961   : > { %v3899_v51 = vsub.f32 %v3790_v32, %v11345_v44  ;;  %v3911_v25 = vsub.f32 %v11343_v50, %v3910_v33  ;;  %v4687_v32 = vand.u32 4294901760, %v11507_v9 }
 0x963   : > { %v3900_v23 = vand.u32 4294901760, %v3899_v51  ;;  %v3912_v19 = vand.u32 4294901760, %v3911_v25  ;;  %v11529_v25 = vld [vmem:[#allocation8 + $0x2c0] sm:$0xff] }
 0x965   : > { %v3901_v35 = vsub.f32 %v3899_v51, %v3900_v23 }
 0x967   : > { %v3902_v42 = vand.u32 4294901760, %v3901_v35  ;;  %v11531_v35 = vld [vmem:[#allocation8 + $0x2c8] sm:$0xff] }
 0x969   : > { %7065 = vmatprep.mubr.f32.mxu0 %v3902_v42  ;;  %v4693_v42 = vand.u32 4294901760, %v11529_v25 }
 0x96a   : > { %7066 = vmatmul.mubr.f32.vlgmr.msra.gmra.mrb[4].mxu0 %v3912_v19  ;;  %v4696_v19 = vand.u32 4294901760, %v11531_v35 }
 0x96b   : > { %8256 = vmatpush3.bf16.msra.mxu0 %v11169_v13  ;;  %7100 = vmatprep.mubr.f32.mxu0 %v11345_v44  ;;  %v12260_v13 = vand.u32 4294901760, %v11116_v55  ;;  %v12264_v55 = vand.u32 4294901760, %v11182_v12  ;;  %v12271_v12 = vld [vmem:[#allocation14_spill] sm:$0xff] }
 0x96c   : > { %8258 = vmatprep.subr.bf16.mxu0 %v11192_v62 }
 0x96f   : > { %8260 = vmatpush3.bf16.msra.mxu0 %v11192_v62  ;;  %v12261_v62 = vand.u32 4294901760, %v11121_v0  ;;  %v12265_v0 = vand.u32 4294901760, %v11187_v14  ;;  %v12273_v14 = vld [vmem:[#allocation15_spill] sm:$0xff] }
 0x970   : > { %8262 = vmatprep.subr.bf16.mxu0 %v11212_v46 }
 0x973   : > { %8264 = vmatpush3.bf16.msra.mxu0 %v11212_v46  ;;  %v8349_v46 = vpack.c.bf16 %v12261_v62, %v12260_v13  ;;  %v11541_v13 = vpack.c.bf16 %v4696_v19, %v4693_v42  ;;  %v11547_v62 = vld [vmem:[#allocation8 + $0x2d0] sm:$0xff] }
 0x974   : > { %8266 = vmatprep.subr.bf16.mxu0 %v11248_v24 }
 0x977   : > { %8268 = vmatpush3.bf16.msra.mxu0 %v11248_v24  ;;  %v12262_v24 = vand.u32 4294901760, %v11158_v57  ;;  %v12267_v57 = vand.u32 4294901760, %v11208_v26  ;;  %v12277_v26 = vld [vmem:[#allocation17_spill] sm:$0xff] }
 0x978   : > { %8270 = vmatprep.subr.bf16.mxu0 %v11252_v63  ;;  %v12278_v54 = vand.u32 4294901760, %v12277_v26 }
 0x97b   : > { %8272 = vmatpush3.bf16.msra.mxu0 %v11252_v63  ;;  %v12263_v63 = vand.u32 4294901760, %v11163_v39 }
 0x97c   : > { %8274 = vmatprep.subr.bf16.mxu0 %v11272_v37 }
 0x97f   : > { %8276 = vmatpush3.bf16.msra.mxu0 %v11272_v37  ;;  %v8353_v37 = vpack.c.bf16 %v12263_v63, %v12262_v24  ;;  %v4699_v24 = vand.u32 4294901760, %v11547_v62 }
 0x980   : > { %8278 = vmatprep.subr.bf16.mxu0 %v11298_v41 }
 0x983   : > { %8280 = vmatpush3.bf16.msra.mxu0 %v11298_v41  ;;  %v8357_v41 = vpack.c.bf16 %v12265_v0, %v12264_v55  ;;  %v11565_v55 = vld [vmem:[#allocation8 + $0x2e0] sm:$0xff]  ;;  %v11567_v0 = vld [vmem:[#allocation8 + $0x2e8] sm:$0xff] }
 0x984   : > { %8282 = vmatprep.subr.bf16.mxu0 %v11300_v60 }
 0x987   : > { %8284 = vmatpush3.bf16.msra.mxu0 %v11300_v60  ;;  %v12266_v60 = vand.u32 4294901760, %v11203_v49  ;;  %v12275_v49 = vld [vmem:[#allocation16_spill] sm:$0xff] }
 0x988   : > { %8286 = vmatprep.subr.bf16.mxu0 %v11304_v11 }
 0x989   : > { %v8361_v39 = vpack.c.bf16 %v12267_v57, %v12266_v60  ;;  %v4708_v60 = vand.u32 4294901760, %v11567_v0 }
 0x98a   : > { %7101 = vmatmul.mubr.f32.vlgmr.msra.gmra.mrb[4].mxu0 %v11340_v53 }
 0x98b   : > { %8288 = vmatpush3.bf16.msra.mxu0 %v11304_v11  ;;  %7135 = vmatprep.mubr.f32.mxu0 %v3899_v51  ;;  %v12268_v11 = vand.u32 4294901760, %v11220_v47  ;;  %v12279_v47 = vld [vmem:[#allocation18_spill] sm:$0xff] }
 0x98c   : > { %8290 = vmatprep.subr.bf16.mxu0 %v11308_v28  ;;  %v12280_v4 = vand.u32 4294901760, %v12279_v47 }
 0x98e   : > { %v8377_v15 = vpack.c.bf16 %v12282_v8, %v12280_v4 }
 0x98f   : > { %8292 = vmatpush3.bf16.msra.mxu0 %v11308_v28  ;;  %v12269_v28 = vld [vmem:[#allocation13_spill] sm:$0xff] }
 0x990   : > { %8294 = vmatprep.subr.bf16.mxu0 %v11312_v7 }
 0x993   : > { %8296 = vmatpush3.bf16.msra.mxu0 %v11312_v7  ;;  %v12270_v7 = vand.u32 4294901760, %v12269_v28 }
 0x994   : > { %8298 = vmatprep.subr.bf16.mxu0 %v11316_v36 }
 0x997   : > { %8300 = vmatpush3.bf16.msra.mxu0 %v11316_v36  ;;  %v8365_v36 = vpack.c.bf16 %v12270_v7, %v12268_v11  ;;  %v11595_v7 = vld [vmem:[#allocation8 + $0x2f0] sm:$0xff] }
 0x998   : > { %8302 = vmatprep.subr.bf16.mxu0 %v11320_v40 }
 0x99b   : > { %8304 = vmatpush3.bf16.msra.mxu0 %v11320_v40  ;;  %v12272_v40 = vand.u32 4294901760, %v12271_v12  ;;  %v4711_v12 = vand.u32 4294901760, %v11595_v7 }
 0x99c   : > { %8306 = vmatprep.subr.bf16.mxu0 %v11324_v56 }
 0x99f   : > { %8308 = vmatpush3.bf16.msra.mxu0 %v11324_v56  ;;  %v12274_v56 = vand.u32 4294901760, %v12273_v14 }
 0x9a0   : > { %8310 = vmatprep.subr.bf16.mxu0 %v11328_v58 }
 0x9a3   : > { %8312 = vmatpush3.bf16.msra.mxu0 %v11328_v58  ;;  %v8369_v58 = vpack.c.bf16 %v12274_v56, %v12272_v40 }
 0x9a4   : > { %8314 = vmatprep.subr.bf16.mxu0 %v11332_v27 }
 0x9a7   : > { %8316 = vmatpush3.bf16.msra.mxu0 %v11332_v27  ;;  %v12276_v27 = vand.u32 4294901760, %v12275_v49 }
 0x9a8   : > { %8318 = vmatprep.subr.bf16.mxu0 %v11001_v30 }
 0x9a9   : > { %v8373_v34 = vpack.c.bf16 %v12278_v54, %v12276_v27  ;;  %v11626_v54 = vsub.f32 %v11471_v52, %v4675_v3  ;;  %v11671_v3 = vsub.f32 %v11507_v9, %v4687_v32  ;;  %v11688_v9 = vsub.f32 %v11529_v25, %v4693_v42 }
 0x9aa   : > { %7136 = vmatmul.mubr.f32.vlgmr.msra.gmra.mrb[4].mxu0 %v11343_v50  ;;  %v11509_v50 = vld [vmem:[#allocation8 + $0x2b8] sm:$0xff] }
 0x9ab   : > { %8320 = vmatpush3.bf16.msra.mxu0 %v11001_v30  ;;  %7170 = vmatprep.mubr.f32.mxu0 %v3900_v23  ;;  %v12115_v6 = vand.u32 4294901760, %v11626_v54 }
 0x9ac   : > { %8322 = vmatprep.subr.bf16.mxu0 %v11022_v16 }
 0x9af   : > { %8324 = vmatpush3.bf16.msra.mxu0 %v11022_v16 }
 0x9b0   : > { %8326 = vmatprep.subr.bf16.mxu0 %v11037_v29 }
 0x9b3   : > { %8328 = vmatpush3.bf16.msra.mxu0 %v11037_v29 }
 0x9b4   : > { %8330 = vmatprep.subr.bf16.mxu0 %v11055_v61 }
 0x9b7   : > { %8332 = vmatpush3.bf16.msra.mxu0 %v11055_v61 }
 0x9b8   : > { %8334 = vmatprep.subr.bf16.mxu0 %v11073_v38 }
 0x9bb   : > { %8336 = vmatpush3.bf16.msra.mxu0 %v11073_v38 }
 0x9bc   : > { %8338 = vmatprep.subr.bf16.mxu0 %v11091_v10 }
 0x9bf   : > { %8340 = vmatpush3.bf16.msra.mxu0 %v11091_v10 }
 0x9c0   : > { %8342 = vmatprep.subr.bf16.mxu0 %v11111_v45 }
 0x9c3   : > { %8344 = vmatpush3.bf16.msra.mxu0 %v11111_v45 }
 0x9c4   : > { %8346 = vmatprep.subr.bf16.mxu0 %v11143_v1 }
 0x9c7   : > { %8348 = vmatpush3.bf16.msra.mxu0 %v11143_v1 }
 0x9c8   : > { %8350 = vmatprep.subr.bf16.mxu0 %v8349_v46 }
 0x9ca   : > { %7171 = vmatmul.mubr.f32.vlgmr.msra.gmra.mrb[4].mxu0 %v3910_v33 }
 0x9cb   : > { %8352 = vmatpush3.bf16.msra.mxu0 %v8349_v46  ;;  %7205 = vmatprep.mubr.f32.mxu0 %v11345_v44  ;;  %v11549_v46 = vld [vmem:[#allocation8 + $0x2d8] sm:$0xff] }
 0x9cc   : > { %8354 = vmatprep.subr.bf16.mxu0 %v8353_v37  ;;  %v4702_v63 = vand.u32 4294901760, %v11549_v46 }
 0x9cf   : > { %8356 = vmatpush3.bf16.msra.mxu0 %v8353_v37  ;;  %v11559_v37 = vpack.c.bf16 %v4702_v63, %v4699_v24 }
 0x9d0   : > { %8358 = vmatprep.subr.bf16.mxu0 %v8357_v41 }
 0x9d3   : > { %8360 = vmatpush3.bf16.msra.mxu0 %v8357_v41  ;;  %v4705_v41 = vand.u32 4294901760, %v11565_v55 }
 0x9d4   : > { %8362 = vmatprep.subr.bf16.mxu0 %v8361_v39 }
 0x9d7   : > { %8364 = vmatpush3.bf16.msra.mxu0 %v8361_v39  ;;  %v11579_v39 = vpack.c.bf16 %v4708_v60, %v4705_v41 }
 0x9d8   : > { %8366 = vmatprep.subr.bf16.mxu0 %v8365_v36 }
 0x9db   : > { %8368 = vmatpush3.bf16.msra.mxu0 %v8365_v36  ;;  %v11597_v36 = vld [vmem:[#allocation8 + $0x2f8] sm:$0xff] }
 0x9dc   : > { %8370 = vmatprep.subr.bf16.mxu0 %v8369_v58  ;;  %v4714_v40 = vand.u32 4294901760, %v11597_v36 }
 0x9de   : > { %v11611_v49 = vpack.c.bf16 %v4714_v40, %v4711_v12 }
 0x9df   : > { %8372 = vmatpush3.bf16.msra.mxu0 %v8369_v58 }
 0x9e0   : > { %8374 = vmatprep.subr.bf16.mxu0 %v8373_v34 }
 0x9e3   : > { %8376 = vmatpush3.bf16.msra.mxu0 %v8373_v34  ;;  %v11631_v34 = vsub.f32 %v11473_v59, %v4678_v5 }
 0x9e4   : > { %8378 = vmatprep.subr.bf16.mxu0 %v8377_v15 }
 0x9e5   : > { %v12114_v8 = vand.u32 4294901760, %v11631_v34 }
 0x9e7   : > { %8380 = vmatpush3.bf16.msra.mxu0 %v8377_v15 }
 0x9e8   : > { %8382 = vmatprep.subr.bf16.mxu0 %v11001_v30 }
 0x9ea   : > { %7206 = vmatmul.mubr.f32.vlgmr.msra.gmra.mrb[4].mxu0 %v11340_v53 }
 0x9eb   : > { %8384 = vmatpush3.bf16.msra.mxu0 %v11001_v30  ;;  %7240 = vmatprep.mubr.f32.mxu0 %v11345_v44  ;;  %v5526_v30 = vld [vmem:[%s11983_s3 + $0x4] ss:$0 sm:$0xff]  ;;  %v4690_v44 = vand.u32 4294901760, %v11509_v50 }
 0x9ec   : > { %8386 = vmatprep.subr.bf16.mxu0 %v11022_v16 }
 0x9ed   : > { %v11523_v23 = vpack.c.bf16 %v4690_v44, %v4687_v32  ;;  %v11676_v5 = vsub.f32 %v11509_v50, %v4690_v44  ;;  %v11693_v50 = vsub.f32 %v11531_v35, %v4696_v19  ;;  %v11709_v35 = vsub.f32 %v11547_v62, %v4699_v24 }
 0x9ee   : > { %v11714_v19 = vsub.f32 %v11549_v46, %v4702_v63  ;;  %v11731_v46 = vsub.f32 %v11565_v55, %v4705_v41  ;;  %v11736_v63 = vsub.f32 %v11567_v0, %v4708_v60  ;;  %v11748_v55 = vsub.f32 %v11595_v7, %v4711_v12 }
 0x9ef   : > { %8388 = vmatpush3.bf16.msra.mxu0 %v11022_v16  ;;  %v11459_v16 = vld [vmem:[#allocation8 + $0x280] sm:$0xff]  ;;  %12283 = vst [vmem:[#allocation13_spill] sm:$0xff] %v11693_v50  ;;  %12284 = vst [vmem:[#allocation14_spill] sm:$0xff] %v11709_v35  ;;  %v11753_v0 = vsub.f32 %v11597_v36, %v4714_v40 }
 0x9f0   : > { %8390 = vmatprep.subr.bf16.mxu0 %v11037_v29  ;;  %12285 = vst [vmem:[#allocation15_spill] sm:$0xff] %v11714_v19  ;;  %12286 = vst [vmem:[#allocation16_spill] sm:$0xff] %v11731_v46 }
 0x9f1   : > { %12287 = vst [vmem:[#allocation17_spill] sm:$0xff] %v11736_v63  ;;  %12288 = vst [vmem:[#allocation18_spill] sm:$0xff] %v11748_v55 }
 0x9f2   : > { %12289 = vst [vmem:[#allocation19_spill] sm:$0xff] %v11753_v0 }
 0x9f3   : > { %8392 = vmatpush3.bf16.msra.mxu0 %v11037_v29  ;;  %v11461_v29 = vld [vmem:[#allocation8 + $0x288] sm:$0xff] }
 0x9f4   : > { %8394 = vmatprep.subr.bf16.mxu0 %v11055_v61 }
 0x9f7   : > { %8396 = vmatpush3.bf16.msra.mxu0 %v11055_v61  ;;  %v4669_v61 = vand.u32 4294901760, %v11459_v16 }
 0x9f8   : > { %8398 = vmatprep.subr.bf16.mxu0 %v11073_v38 }
 0x9f9   : > { %v11584_v11 = vsub.f32 %v11459_v16, %v4669_v61  ;;  %v4794_v16 = vsub.f32 %v11631_v34, %v12114_v8 }
 0x9fb   : > { %8400 = vmatpush3.bf16.msra.mxu0 %v11073_v38  ;;  %v4672_v38 = vand.u32 4294901760, %v11461_v29  ;;  %v12117_v14 = vand.u32 4294901760, %v11584_v11 }
 0x9fc   : > { %8402 = vmatprep.subr.bf16.mxu0 %v11091_v10 }
 0x9fd   : > { %v11589_v28 = vsub.f32 %v11461_v29, %v4672_v38  ;;  %v4773_v27 = vsub.f32 %v11584_v11, %v12117_v14  ;;  %v11650_v29 = vsub.f32 %v11493_v21, %v4681_v18  ;;  %v5531_v14 = vld [vmem:[#allocation6 + $0x30] ss:$0 sm:$0xff] }
 0x9ff   : > { %8404 = vmatpush3.bf16.msra.mxu0 %v11091_v10  ;;  %v12116_v56 = vand.u32 4294901760, %v11589_v28  ;;  %v4774_v47 = vand.u32 4294901760, %v4773_v27 }
 0xa00   : > { %8406 = vmatprep.subr.bf16.mxu0 %v11111_v45 }
 0xa01   : > { %v4780_v26 = vsub.f32 %v11589_v28, %v12116_v56 }
 0xa03   : > { %8408 = vmatpush3.bf16.msra.mxu0 %v11111_v45  ;;  %v4781_v4 = vand.u32 4294901760, %v4780_v26 }
 0xa04   : > { %8410 = vmatprep.subr.bf16.mxu0 %v11143_v1 }
 0xa05   : > { %v11637_v15 = vpack.c.bf16 %v4781_v4, %v4774_v47  ;;  %v12109_v47 = vand.u32 4294901760, %v11688_v9  ;;  %v12108_v4 = vand.u32 4294901760, %v11693_v50 }
 0xa07   : > { %8412 = vmatpush3.bf16.msra.mxu0 %v11143_v1  ;;  %v11469_v1 = vpack.c.bf16 %v4672_v38, %v4669_v61  ;;  %v11655_v61 = vsub.f32 %v11495_v31, %v4684_v20  ;;  %v4829_v25 = vsub.f32 %v11688_v9, %v12109_v47  ;;  %v4836_v42 = vsub.f32 %v11693_v50, %v12108_v4 }
 0xa09   : > { %8414 = vmatprep.subr.bf16.mxu1 %v11469_v1 }
 0xa0a   : > { %7241 = vmatmul.mubr.f32.vlgmr.msra.gmra.mrb[4].mxu0 %v11340_v53  ;;  %8416 = vmatpush3.bf16.msra.mxu1 %v11469_v1  ;;  %v11505_v53 = vpack.c.bf16 %v4684_v20, %v4681_v18  ;;  %v12111_v18 = vand.u32 4294901760, %v11671_v3  ;;  %v12110_v20 = vand.u32 4294901760, %v11676_v5 }
 0xa0b   : > { %8418 = vmatprep.subr.bf16.mxu1 %v11490_v22 }
 0xa0c   : > { %v4815_v26 = vsub.f32 %v11671_v3, %v12111_v18  ;;  %v4822_v32 = vsub.f32 %v11676_v5, %v12110_v20  ;;  %v5530_v20 = vld [vmem:[#allocation6 + $0x31] ss:$0 sm:$0xff] }
 0xa0e   : > { %8420 = vmatpush3.bf16.msra.mxu1 %v11490_v22  ;;  %v4816_v44 = vand.u32 4294901760, %v4815_v26 }
 0xa0f   : > { %8422 = vmatprep.subr.bf16.mxu1 %v11505_v53 }
 0xa12   : > { %8424 = vmatpush3.bf16.msra.mxu1 %v11505_v53 }
 0xa13   : > { %8426 = vmatprep.subr.bf16.mxu1 %v11523_v23 }
 0xa16   : > { %8428 = vmatpush3.bf16.msra.mxu1 %v11523_v23 }
 0xa17   : > { %8430 = vmatprep.subr.bf16.mxu1 %v11541_v13 }
 0xa1a   : > { %8432 = vmatpush3.bf16.msra.mxu1 %v11541_v13 }
 0xa1b   : > { %8434 = vmatprep.subr.bf16.mxu1 %v11559_v37 }
 0xa1e   : > { %8436 = vmatpush3.bf16.msra.mxu1 %v11559_v37 }
 0xa1f   : > { %8438 = vmatprep.subr.bf16.mxu1 %v11579_v39 }
 0xa22   : > { %8440 = vmatpush3.bf16.msra.mxu1 %v11579_v39 }
 0xa23   : > { %8442 = vmatprep.subr.bf16.mxu1 %v11611_v49 }
 0xa26   : > { %8444 = vmatpush3.bf16.msra.mxu1 %v11611_v49 }
 0xa27   : > { %8446 = vmatprep.subr.bf16.mxu1 %v11637_v15 }
 0xadd   : > { %v7242_v10 = vpop.f32.mrb[4].mxu0 }
 0xade   : > { %v8613_v45 = vadd.f32 %v7242_v10, %v5526_v30  ;;  %v4491_v48 = vpop.f32.mrb[5].mxu0  ;;  %v4795_v10 = vand.u32 4294901760, %v4794_v16 }
 0xadf   : > { %v8614_v2 = vadd.f32 %v5526_v30, %v4491_v48  ;;  %v4787_v30 = vsub.f32 %v11626_v54, %v12115_v6  ;;  %v12112_v48 = vand.u32 4294901760, %v11655_v61 }
 0xae0   : > { %v11475_v43 = vmax.f32 %v8613_v45, 0.0  ;;  %v12113_v45 = vand.u32 4294901760, %v11650_v29 }
 0xae1   : > { %v11480_v17 = vmax.f32 %v8614_v2, 0.0  ;;  %v4788_v38 = vand.u32 4294901760, %v4787_v30  ;;  %v4808_v59 = vsub.f32 %v11655_v61, %v12112_v48  ;;  %v4823_v30 = vand.u32 4294901760, %v4822_v32 }
 0xae2   : > { %4504 = vst [vmem:[#allocation2 + $0x9] sm:$0xff] %v11475_v43  ;;  %4567 = vrot.lane.b32.xlu1 %v11475_v43, %s8919_s23  ;;  %v4801_v52 = vsub.f32 %v11650_v29, %v12113_v45  ;;  %v12105_v32 = vand.u32 4294901760, %v11731_v46 }
 0xae3   : > { %4503 = vst [vmem:[#allocation2 + $0x1] sm:$0xff] %v11480_v17  ;;  %v11660_v2 = vpack.c.bf16 %v4795_v10, %v4788_v38  ;;  %v4809_v31 = vand.u32 4294901760, %v4808_v59  ;;  %v11716_v16 = vpack.c.bf16 %v4823_v30, %v4816_v44  ;;  %v4830_v38 = vand.u32 4294901760, %v4829_v25 }
 0xae4   : > { %v4802_v21 = vand.u32 4294901760, %v4801_v52  ;;  %v4837_v10 = vand.u32 4294901760, %v4836_v42  ;;  %v12107_v52 = vand.u32 4294901760, %v11709_v35  ;;  %v12106_v59 = vand.u32 4294901760, %v11714_v19 }
 0xae5   : > { %v12104_v44 = vand.u32 4294901760, %v11736_v63  ;;  %v4857_v25 = vsub.f32 %v11731_v46, %v12105_v32  ;;  %v12103_v42 = vand.u32 4294901760, %v11748_v55 }
 0xae6   : > { %v11680_v27 = vpack.c.bf16 %v4809_v31, %v4802_v21  ;;  %v11720_v21 = vpack.c.bf16 %v4837_v10, %v4830_v38  ;;  %v4843_v62 = vsub.f32 %v11709_v35, %v12107_v52  ;;  %v4850_v24 = vsub.f32 %v11714_v19, %v12106_v59  ;;  %v5529_v52 = vld [vmem:[#allocation6 + $0x2f] ss:$0 sm:$0xff] }
 0xae7   : > { %v4864_v41 = vsub.f32 %v11736_v63, %v12104_v44  ;;  %v4858_v60 = vand.u32 4294901760, %v4857_v25  ;;  %v12102_v38 = vand.u32 4294901760, %v11753_v0  ;;  %v4871_v7 = vsub.f32 %v11748_v55, %v12103_v42 }
 0xae8   : > { %v4844_v31 = vand.u32 4294901760, %v4843_v62  ;;  %v4851_v26 = vand.u32 4294901760, %v4850_v24  ;;  %v11780_v25 = vpack.c.bf16 %v11655_v61, %v11650_v29 }
 0xae9   : > { %v11573_v57 = vld [vmem:[#allocation2 + $0xa] sm:$0xff]  ;;  %v4865_v10 = vand.u32 4294901760, %v4864_v41  ;;  %v4878_v12 = vsub.f32 %v11753_v0, %v12102_v38  ;;  %v4872_v40 = vand.u32 4294901760, %v4871_v7  ;;  %v11784_v41 = vpack.c.bf16 %v11676_v5, %v11671_v3  ;;  %v5527_v38 = vld [vmem:[#allocation6 + $0x2e] ss:$0 sm:$0xff] }
 0xaea   : > { %v11515_v33 = vld [vmem:[#allocation2] sm:$0xff]  ;;  %v11517_v51 = vld [vmem:[#allocation2 + $0x8] sm:$0xff]  ;;  %v11740_v30 = vpack.c.bf16 %v4851_v26, %v4844_v31  ;;  %v11772_v31 = vpack.c.bf16 %v11589_v28, %v11584_v11  ;;  %v11776_v26 = vpack.c.bf16 %v11631_v34, %v11626_v54  ;;  %v11796_v7 = vpack.c.bf16 %v11736_v63, %v11731_v46 }
 0xaeb   : > { %4519 = vrot.lane.b32.xlu0 %v11515_v33, %s8919_s23  ;;  %4521 = vrot.lane.b32.xlu1 %v11517_v51, %s8919_s23  ;;  %v11605_v58 = vld [vmem:[#allocation2 + $0x2] sm:$0xff]  ;;  %v11766_v36 = vpack.c.bf16 %v4865_v10, %v4858_v60  ;;  %v4879_v62 = vand.u32 4294901760, %v4878_v12  ;;  %v11788_v60 = vpack.c.bf16 %v11693_v50, %v11688_v9  ;;  %v11792_v10 = vpack.c.bf16 %v11714_v19, %v11709_v35  ;;  %v5533_v35 = vld [vmem:[#allocation6 + $0x34] ss:$0 sm:$0xff] }
 0xaec   : > { %v11800_v12 = vpack.c.bf16 %v11753_v0, %v11748_v55  ;;  %v4515_v4 = vmul.f32 %v5527_v38, %v11515_v33  ;;  %v4516_v47 = vmul.f32 %v5527_v38, %v11517_v51  ;;  %v4562_v0 = vmul.f32 %v5530_v20, %v11475_v43 }
 0xaed   : > { %v11768_v24 = vpack.c.bf16 %v4879_v62, %v4872_v40  ;;  %v5528_v62 = vld [vmem:[#allocation6 + $0x2d] ss:$0 sm:$0xff]  ;;  %v4561_v55 = vmul.f32 %v5530_v20, %v11480_v17 }
 0xaef   : > { %4535 = vrot.lane.b32.xlu0 %v11515_v33, %s8918_s21  ;;  %4537 = vrot.lane.b32.xlu1 %v11517_v51, %s8918_s21 }
 0xaf3   : > { %4565 = vrot.lane.b32.xlu0 %v11480_v17, %s8919_s23  ;;  %4583 = vrot.lane.b32.xlu1 %v11475_v43, %s8918_s21 }
 0xaf7   : > { %4581 = vrot.lane.b32.xlu0 %v11480_v17, %s8918_s21  ;;  %4613 = vrot.lane.b32.xlu1 %v11573_v57, %s8919_s23 }
 0xafb   : > { %4611 = vrot.lane.b32.xlu0 %v11605_v58, %s8919_s23  ;;  %4629 = vrot.lane.b32.xlu1 %v11573_v57, %s8918_s21 }
 0xaff   : > { %4627 = vrot.lane.b32.xlu0 %v11605_v58, %s8918_s21  ;;  %s5368_s21 = sshll.u32 %s244_s25, 4  ;;  %s11930_s21 = int_to_ptr.vmem [resolvable:$true] %s5368_s21 }
 0xb00   : > { %s8838_s13 = scalar_lea.vmem %s11930_s21, 256  ;;  %p8845_p5 = scmp.lt.s32.totalorder %s11930_s21, %s8843_s28 }
 0xb01   : > { %p8839_p11 = scmp.ne.s32.totalorder %s11930_s21, %s8838_s13  ;;  %p8846_p9 = scmp.lt.s32.totalorder %s8844_s27, %s8838_s13 }
 0xb03   : > { %p8840_p1 = pnand %p8839_p11, %p12313_p0  ;;  %p8847_p12 = por %p8846_p9, %p8845_p5 }
 0xb05   : > { %p8841_p3 = pneg %p8840_p1 }
 0xb07   : > { %p8848_p2 = pnand %p8847_p12, %p8841_p3 }
 0xb54   : > { %v4568_v40 = vpop.permute.xlu1 %4567 }
 0xb55   : > { %v4578_v33 = vmul.f32 %v5531_v14, %v4568_v40 }
 0xb5d   : > { %v4520_v42 = vpop.permute.xlu0 %4519  ;;  %v4522_v44 = vpop.permute.xlu1 %4521 }
 0xb5e   : > { %v4531_v32 = vmul.f32 %v5528_v62, %v4520_v42  ;;  %v4532_v59 = vmul.f32 %v5528_v62, %v4522_v44  ;;  %v5532_v62 = vld [vmem:[#allocation6 + $0x32] ss:$0 sm:$0xff] }
 0xb60   : > { %v4533_v45 = vadd.f32 %v4531_v32, %v4515_v4  ;;  %v4534_v8 = vadd.f32 %v4532_v59, %v4516_v47 }
 0xb61   : > { %v4536_v18 = vpop.permute.xlu0 %4535  ;;  %v4538_v48 = vpop.permute.xlu1 %4537 }
 0xb62   : > { %v4547_v6 = vmul.f32 %v5529_v52, %v4536_v18  ;;  %v4548_v56 = vmul.f32 %v5529_v52, %v4538_v48  ;;  %v5534_v18 = vld [vmem:[#allocation6 + $0x33] ss:$0 sm:$0xff]  ;;  %v4608_v52 = vmul.f32 %v5533_v35, %v11573_v57 }
 0xb64   : > { %v4549_v63 = vadd.f32 %v4547_v6, %v4533_v45  ;;  %v4550_v42 = vadd.f32 %v4548_v56, %v4534_v8  ;;  %v5535_v6 = vld [vmem:[#allocation6 + $0x35] ss:$0 sm:$0xff]  ;;  %v4607_v56 = vmul.f32 %v5533_v35, %v11605_v58 }
 0xb65   : > { %v4566_v44 = vpop.permute.xlu0 %4565  ;;  %v4584_v46 = vpop.permute.xlu1 %4583 }
 0xb66   : > { %v4564_v19 = vadd.f32 %v4562_v0, %v4550_v42  ;;  %v4563_v51 = vadd.f32 %v4561_v55, %v4549_v63  ;;  %v4577_v38 = vmul.f32 %v5531_v14, %v4566_v44  ;;  %v4594_v4 = vmul.f32 %v5532_v62, %v4584_v46 }
 0xb68   : > { %v4580_v50 = vadd.f32 %v4578_v33, %v4564_v19  ;;  %v4579_v43 = vadd.f32 %v4577_v38, %v4563_v51 }
 0xb69   : > { %v4582_v47 = vpop.permute.xlu0 %4581  ;;  %v4614_v48 = vpop.permute.xlu1 %4613 }
 0xb6a   : > { %v4596_v59 = vadd.f32 %v4594_v4, %v4580_v50  ;;  %v4593_v17 = vmul.f32 %v5532_v62, %v4582_v47  ;;  %v4624_v20 = vmul.f32 %v5534_v18, %v4614_v48 }
 0xb6c   : > { %v4595_v8 = vadd.f32 %v4593_v17, %v4579_v43  ;;  %v4610_v45 = vadd.f32 %v4608_v52, %v4596_v59  ;;  %v12311_v59 = vld [vmem:[#allocation19_spill] sm:$0xff] }
 0xb6d   : > { %v4612_v32 = vpop.permute.xlu0 %4611  ;;  %v4630_v63 = vpop.permute.xlu1 %4629  ;;  %v12312_v17 = vand.u32 4294901760, %v12311_v59 }
 0xb6e   : > { %v4626_v14 = vadd.f32 %v4624_v20, %v4610_v45  ;;  %v4609_v55 = vadd.f32 %v4607_v56, %v4595_v8  ;;  %v4623_v19 = vmul.f32 %v5534_v18, %v4612_v32  ;;  %v4640_v46 = vmul.f32 %v5535_v6, %v4630_v63 }
 0xb70   : > { %v4642_v0 = vadd.f32 %v4640_v46, %v4626_v14  ;;  %v4625_v42 = vadd.f32 %v4623_v19, %v4609_v55 }
 0xb71   : > { %v4628_v40 = vpop.permute.xlu0 %4627 }
 0xb72   : > { %v11808_v44 = vand.u32 4294901760, %v4642_v0  ;;  %v4639_v57 = vmul.f32 %v5535_v6, %v4628_v40 }
 0xb74   : > { %v11811_v50 = vsub.f32 %v4642_v0, %v11808_v44  ;;  %v4641_v62 = vadd.f32 %v4639_v57, %v4625_v42 }
 0xb76   : > { %v11813_v58 = vand.u32 4294901760, %v4641_v62  ;;  %v4761_v35 = vand.u32 4294901760, %v11811_v50 }
 0xb78   : > { %v4750_v33 = vsub.f32 %v4641_v62, %v11813_v58  ;;  %v4762_v38 = vsub.f32 %v11811_v50, %v4761_v35 }
 0xb7a   : > { %v4751_v51 = vand.u32 4294901760, %v4750_v33  ;;  %v4763_v18 = vand.u32 4294901760, %v4762_v38 }
 0xb7c   : > { %v4752_v4 = vsub.f32 %v4750_v33, %v4751_v51 }
 0xb7e   : > { %v4753_v47 = vand.u32 4294901760, %v4752_v4 }
 0xb80   : > { %7275 = vmatprep.mubr.f32.mxu1 %v4753_v47 }
 0xb81   : > { %7276 = vmatmul.mubr.f32.vlgmr.msra.gmra.mrb[4].mxu1 %v4763_v18 }
 0xb82   : > { %8448 = vmatpush3.bf16.msra.mxu1 %v11637_v15  ;;  %7310 = vmatprep.mubr.f32.mxu1 %v11813_v58  ;;  %v12290_v15 = vand.u32 4294901760, %v11584_v11  ;;  %v12294_v11 = vand.u32 4294901760, %v11650_v29  ;;  %v12301_v29 = vld [vmem:[#allocation14_spill] sm:$0xff] }
 0xb83   : > { %8450 = vmatprep.subr.bf16.mxu1 %v11660_v2 }
 0xb86   : > { %8452 = vmatpush3.bf16.msra.mxu1 %v11660_v2  ;;  %v12291_v2 = vand.u32 4294901760, %v11589_v28  ;;  %v12295_v28 = vand.u32 4294901760, %v11655_v61  ;;  %v12303_v61 = vld [vmem:[#allocation15_spill] sm:$0xff] }
 0xb87   : > { %8454 = vmatprep.subr.bf16.mxu1 %v11680_v27 }
 0xb8a   : > { %8456 = vmatpush3.bf16.msra.mxu1 %v11680_v27  ;;  %v8541_v27 = vpack.c.bf16 %v12291_v2, %v12290_v15 }
 0xb8b   : > { %8458 = vmatprep.subr.bf16.mxu1 %v11716_v16 }
 0xb8e   : > { %8460 = vmatpush3.bf16.msra.mxu1 %v11716_v16  ;;  %v12292_v16 = vand.u32 4294901760, %v11626_v54  ;;  %v12297_v54 = vand.u32 4294901760, %v11676_v5  ;;  %v12307_v5 = vld [vmem:[#allocation17_spill] sm:$0xff] }
 0xb8f   : > { %8462 = vmatprep.subr.bf16.mxu1 %v11720_v21  ;;  %v12308_v48 = vand.u32 4294901760, %v12307_v5 }
 0xb92   : > { %8464 = vmatpush3.bf16.msra.mxu1 %v11720_v21  ;;  %v12293_v21 = vand.u32 4294901760, %v11631_v34 }
 0xb93   : > { %8466 = vmatprep.subr.bf16.mxu1 %v11740_v30 }
 0xb96   : > { %8468 = vmatpush3.bf16.msra.mxu1 %v11740_v30  ;;  %v8545_v30 = vpack.c.bf16 %v12293_v21, %v12292_v16 }
 0xb97   : > { %8470 = vmatprep.subr.bf16.mxu1 %v11766_v36 }
 0xb9a   : > { %8472 = vmatpush3.bf16.msra.mxu1 %v11766_v36  ;;  %v8549_v36 = vpack.c.bf16 %v12295_v28, %v12294_v11 }
 0xb9b   : > { %8474 = vmatprep.subr.bf16.mxu1 %v11768_v24 }
 0xb9e   : > { %8476 = vmatpush3.bf16.msra.mxu1 %v11768_v24  ;;  %v12296_v24 = vand.u32 4294901760, %v11671_v3  ;;  %v12305_v3 = vld [vmem:[#allocation16_spill] sm:$0xff] }
 0xb9f   : > { %8478 = vmatprep.subr.bf16.mxu1 %v11772_v31 }
 0xba0   : > { %v8553_v34 = vpack.c.bf16 %v12297_v54, %v12296_v24 }
 0xba1   : > { %7311 = vmatmul.mubr.f32.vlgmr.msra.gmra.mrb[4].mxu1 %v11808_v44 }
 0xba2   : > { %8480 = vmatpush3.bf16.msra.mxu1 %v11772_v31  ;;  %7345 = vmatprep.mubr.f32.mxu1 %v4750_v33  ;;  %v12298_v31 = vand.u32 4294901760, %v11688_v9  ;;  %v12309_v9 = vld [vmem:[#allocation18_spill] sm:$0xff] }
 0xba3   : > { %8482 = vmatprep.subr.bf16.mxu1 %v11776_v26  ;;  %v12310_v43 = vand.u32 4294901760, %v12309_v9 }
 0xba5   : > { %v8569_v6 = vpack.c.bf16 %v12312_v17, %v12310_v43 }
 0xba6   : > { %8484 = vmatpush3.bf16.msra.mxu1 %v11776_v26  ;;  %v12299_v26 = vld [vmem:[#allocation13_spill] sm:$0xff] }
 0xba7   : > { %8486 = vmatprep.subr.bf16.mxu1 %v11780_v25 }
 0xbaa   : > { %8488 = vmatpush3.bf16.msra.mxu1 %v11780_v25  ;;  %v12300_v25 = vand.u32 4294901760, %v12299_v26 }
 0xbab   : > { %8490 = vmatprep.subr.bf16.mxu1 %v11784_v41 }
 0xbae   : > { %8492 = vmatpush3.bf16.msra.mxu1 %v11784_v41  ;;  %v8557_v41 = vpack.c.bf16 %v12300_v25, %v12298_v31 }
 0xbaf   : > { %8494 = vmatprep.subr.bf16.mxu1 %v11788_v60 }
 0xbb2   : > { %8496 = vmatpush3.bf16.msra.mxu1 %v11788_v60  ;;  %v12302_v60 = vand.u32 4294901760, %v12301_v29 }
 0xbb3   : > { %8498 = vmatprep.subr.bf16.mxu1 %v11792_v10 }
 0xbb6   : > { %8500 = vmatpush3.bf16.msra.mxu1 %v11792_v10  ;;  %v12304_v10 = vand.u32 4294901760, %v12303_v61 }
 0xbb7   : > { %8502 = vmatprep.subr.bf16.mxu1 %v11796_v7 }
 0xbba   : > { %8504 = vmatpush3.bf16.msra.mxu1 %v11796_v7  ;;  %v8561_v7 = vpack.c.bf16 %v12304_v10, %v12302_v60 }
 0xbbb   : > { %8506 = vmatprep.subr.bf16.mxu1 %v11800_v12 }
 0xbbe   : > { %8508 = vmatpush3.bf16.msra.mxu1 %v11800_v12  ;;  %v12306_v12 = vand.u32 4294901760, %v12305_v3 }
 0xbbf   : > { %8510 = vmatprep.subr.bf16.mxu1 %v11469_v1 }
 0xbc0   : > { %v8565_v52 = vpack.c.bf16 %v12308_v48, %v12306_v12 }
 0xbc1   : > { %7346 = vmatmul.mubr.f32.vlgmr.msra.gmra.mrb[4].mxu1 %v11811_v50 }
 0xbc2   : > { %8512 = vmatpush3.bf16.msra.mxu1 %v11469_v1  ;;  %7380 = vmatprep.mubr.f32.mxu1 %v4751_v51 }
 0xbc3   : > { %8514 = vmatprep.subr.bf16.mxu1 %v11490_v22 }
 0xbc6   : > { %8516 = vmatpush3.bf16.msra.mxu1 %v11490_v22 }
 0xbc7   : > { %8518 = vmatprep.subr.bf16.mxu1 %v11505_v53 }
 0xbca   : > { %8520 = vmatpush3.bf16.msra.mxu1 %v11505_v53 }
 0xbcb   : > { %8522 = vmatprep.subr.bf16.mxu1 %v11523_v23 }
 0xbce   : > { %8524 = vmatpush3.bf16.msra.mxu1 %v11523_v23 }
 0xbcf   : > { %8526 = vmatprep.subr.bf16.mxu1 %v11541_v13 }
 0xbd2   : > { %8528 = vmatpush3.bf16.msra.mxu1 %v11541_v13 }
 0xbd3   : > { %8530 = vmatprep.subr.bf16.mxu1 %v11559_v37 }
 0xbd6   : > { %8532 = vmatpush3.bf16.msra.mxu1 %v11559_v37 }
 0xbd7   : > { %8534 = vmatprep.subr.bf16.mxu1 %v11579_v39 }
 0xbda   : > { %8536 = vmatpush3.bf16.msra.mxu1 %v11579_v39 }
 0xbdb   : > { %8538 = vmatprep.subr.bf16.mxu1 %v11611_v49 }
 0xbde   : > { %8540 = vmatpush3.bf16.msra.mxu1 %v11611_v49 }
 0xbdf   : > { %8542 = vmatprep.subr.bf16.mxu1 %v8541_v27 }
 0xbe1   : > { %7381 = vmatmul.mubr.f32.vlgmr.msra.gmra.mrb[4].mxu1 %v4761_v35 }
 0xbe2   : > { %8544 = vmatpush3.bf16.msra.mxu1 %v8541_v27  ;;  %7415 = vmatprep.mubr.f32.mxu1 %v11813_v58 }
 0xbe3   : > { %8546 = vmatprep.subr.bf16.mxu1 %v8545_v30 }
 0xbe6   : > { %8548 = vmatpush3.bf16.msra.mxu1 %v8545_v30 }
 0xbe7   : > { %8550 = vmatprep.subr.bf16.mxu1 %v8549_v36 }
 0xbea   : > { %8552 = vmatpush3.bf16.msra.mxu1 %v8549_v36 }
 0xbeb   : > { %8554 = vmatprep.subr.bf16.mxu1 %v8553_v34 }
 0xbee   : > { %8556 = vmatpush3.bf16.msra.mxu1 %v8553_v34 }
 0xbef   : > { %8558 = vmatprep.subr.bf16.mxu1 %v8557_v41 }
 0xbf2   : > { %8560 = vmatpush3.bf16.msra.mxu1 %v8557_v41 }
 0xbf3   : > { %8562 = vmatprep.subr.bf16.mxu1 %v8561_v7 }
 0xbf6   : > { %8564 = vmatpush3.bf16.msra.mxu1 %v8561_v7 }
 0xbf7   : > { %8566 = vmatprep.subr.bf16.mxu1 %v8565_v52 }
 0xbfa   : > { %8568 = vmatpush3.bf16.msra.mxu1 %v8565_v52 }
 0xbfb   : > { %8570 = vmatprep.subr.bf16.mxu1 %v8569_v6 }
 0xbfe   : > { %8572 = vmatpush3.bf16.msra.mxu1 %v8569_v6 }
 0xbff   : > { %8574 = vmatprep.subr.bf16.mxu1 %v11469_v1 }
 0xc01   : > { %7416 = vmatmul.mubr.f32.vlgmr.msra.gmra.mrb[4].mxu1 %v11808_v44 }
 0xc02   : > { %8576 = vmatpush3.bf16.msra.mxu1 %v11469_v1  ;;  %7450 = vmatprep.mubr.f32.mxu1 %v11813_v58  ;;  %v5537_v1 = vld [vmem:[%s11983_s3 + $0x5] ss:$0 sm:$0xff] }
 0xc03   : > { %8578 = vmatprep.subr.bf16.mxu1 %v11490_v22 }
 0xc06   : > { %8580 = vmatpush3.bf16.msra.mxu1 %v11490_v22 }
 0xc07   : > { %8582 = vmatprep.subr.bf16.mxu1 %v11505_v53 }
 0xc0a   : > { %8584 = vmatpush3.bf16.msra.mxu1 %v11505_v53 }
 0xc0b   : > { %8586 = vmatprep.subr.bf16.mxu1 %v11523_v23 }
 0xc0e   : > { %8588 = vmatpush3.bf16.msra.mxu1 %v11523_v23 }
 0xc0f   : > { %8590 = vmatprep.subr.bf16.mxu1 %v11541_v13 }
 0xc12   : > { %8592 = vmatpush3.bf16.msra.mxu1 %v11541_v13 }
 0xc13   : > { %8594 = vmatprep.subr.bf16.mxu1 %v11559_v37 }
 0xc16   : > { %8596 = vmatpush3.bf16.msra.mxu1 %v11559_v37 }
 0xc17   : > { %8598 = vmatprep.subr.bf16.mxu1 %v11579_v39 }
 0xc1a   : > { %8600 = vmatpush3.bf16.msra.mxu1 %v11579_v39 }
 0xc1b   : > { %8602 = vmatprep.subr.bf16.mxu1 %v11611_v49 }
 0xc1e   : > { %8604 = vmatpush3.bf16.msra.mxu1 %v11611_v49 }
 0xc21   : > { %7451 = vmatmul.mubr.f32.vlgmr.msra.gmra.mrb[4].mxu1 %v11808_v44 }
 0xcf4   : > { %v7452_v22 = vpop.f32.mrb[4].mxu1 }
 0xcf5   : > { %v8615_v53 = vadd.f32 %v7452_v22, %v5537_v1  ;;  %v5342_v23 = vpop.f32.mrb[5].mxu1 }
 0xcf6   : > { %v8616_v13 = vadd.f32 %v5537_v1, %v5342_v23 }
 0xcf7   : > { %5353 = vst [vmem:[%s244_s25 + $0x8] sm:$0xff] %v8615_v53 }
 0xcf8   : > { %5352 = vst [vmem:[%s244_s25] sm:$0xff] %v8616_v13 }
 0xcf9   : > { %8851 = shalt.err (!%p8848_p2)
}
 0xcfa   : > { %s8852_s20 = scalar_lea.hbm %s11935_s6, 256  ;;  %s8856_s12 = scalar_lea.hbm %s11984_s4, 512 }
 0xcfb   : > { %p8853_p13 = scmp.ne.s32.totalorder %s11935_s6, %s8852_s20  ;;  %p8857_p4 = scmp.lt.u32.totalorder %s11935_s6, %s11984_s4 }
 0xcfc   : > { %p8858_p7 = scmp.lt.u32.totalorder %s8856_s12, %s8852_s20  ;;  %p8860_p11 = scmp.lt.u32.totalorder %s8852_s20, %s11935_s6 }
 0xcfd   : > { %p8854_p6 = pnand %p8853_p13, %p12313_p0 }
 0xcfe   : > { %p8859_p8 = por %p8858_p7, %p8857_p4 }
 0xcff   : > { %p8855_p10 = pneg %p8854_p6 }
 0xd00   : > { %p8861_p1 = por %p8860_p11, %p8859_p8 }
 0xd02   : > { %p8862_p3 = pnand %p8861_p1, %p8855_p10 }
 0xd04   : > { %8865 = shalt.err (!%p8862_p3)
}
 0xd05   : > { %s8921_s7 = smov 128  }
 0xd06   : > { %8687 = dma.vmem_to_hbm [thread:$0]  (%p12313_p0), %s11930_s21, 256, %s11935_s6, %s5355_s9, %s8921_s7, %s8921_s7, %s8919_s23  }
 0xd07 PF: > { %s5383_s8 = sand.u32 1, %s8896_s15   ;;  %p12314_p5 = scmp.ne.s32.totalorder %s12126_s22, 0 }
 0xd08   : > { %p12315_p9 = scmp.ge.s32.totalorder %s8908_s18, 2  ;;  %s5384_s30 = scalar_lea.sflag [#allocation5], %s5383_s8 }
 0xd0a   : > { %p8701_p12 = pnand %p12315_p9, %p12314_p5 }
 0xd0c   : > { %8891 = dma.done.wait (!%p8701_p12), %s5384_s30, 256  }
 0xd0d   : > { %8893 = vsyncadd (!%p8701_p12), %s5384_s30, 4294967040  ;;  %p18_p2 = scmp.ge.s32.totalorder %s9060_s11, 4   ;;  %s12316_s15 = smov %s8900_s16 }
 0xd0e   : > { %s12317_s16 = smov %s8904_s17  ;;  %s12318_s17 = smov %s9069_s14 }
 0xd0f   : > { %s12319_s18 = smov %s9060_s11  ;;  %20 = sbr.rel (!%p18_p2) target bundleno = 6 (0x6), region = 152 }
 0xd16   :  { %5389 = vsyncpa [#allocation4], 1 }
 0xd17   :  { %5391 = vsyncpa [#allocation4 + $0x1], 1 }
 0xd18   :  { %5392 = vsyncpa [#allocation7], 1 }
 0xd19   :  { %5393 = vsyncpa [#allocation5], 1 }
 0xd1a   :  { %5395 = vsyncpa [#allocation5 + $0x1], 1 }

</bundles_post_ra>
